<compile_context>
chip_gen: v7x
topology: tpu7x:2x2x1
jax: 0.10.0
libtpu: 0.0.40
codegen_flags: <defaults>
</compile_context>

<pallas_src>
import functools

import jax
import jax.numpy as jnp
import numpy as np
from jax import lax
from jax.experimental import pallas as pl
from jax.experimental.pallas import tpu as pltpu

_LANE = 128


def _round_up(x, m):
    return (x + m - 1) // m * m


def _vmem_limit_bytes():
    """~3/4 of physical VMEM: 96 MiB on v5e/v6e, 48 MiB on v7x (best effort)."""
    try:
        phys = int(pltpu.get_tpu_info().vmem_capacity_bytes)
    except Exception:
        phys = 64 * 1024 * 1024          # conservative (v7x per-TensorCore)
    return min((phys * 3) // 4, 112 * 1024 * 1024)


def _choose_strip_rows(H, W, Csp, Cmidp, Coutp, itemsize, budget):
    """Largest divisor of H whose per-step VMEM footprint fits the budget."""
    def footprint(th):
        sbuf = 2 * (th + 4) * (W + 2) * Csp * itemsize         # skip + upx strips
        zpad = (th + 2) * (W + 2) * Cmidp * itemsize           # conv1 out (padded)
        accs = (th + 2) * W * Cmidp * 4 + th * W * Coutp * 4   # f32 accumulators
        outb = 2 * th * W * Coutp * 4                          # double-buffered out
        return sbuf + zpad + accs + outb

    for th in range(H, 0, -1):
        if H % th == 0 and footprint(th) <= budget:
            return th
    return 1


def _bilinear_up2x(a):
    """2x bilinear upsample, align_corners=False (PyTorch nn.Upsample), NHWC."""
    def up(v, axis):
        n = v.shape[axis]
        first = lax.slice_in_dim(v, 0, 1, axis=axis)
        last = lax.slice_in_dim(v, n - 1, n, axis=axis)
        prev = jnp.concatenate([first, lax.slice_in_dim(v, 0, n - 1, axis=axis)], axis=axis)
        nxt = jnp.concatenate([lax.slice_in_dim(v, 1, n, axis=axis), last], axis=axis)
        even = 0.75 * v + 0.25 * prev       # output index 2k
        odd = 0.75 * v + 0.25 * nxt         # output index 2k+1
        out = jnp.stack([even, odd], axis=axis + 1)
        shape = list(v.shape)
        shape[axis] = 2 * n
        return out.reshape(shape)
    return up(up(a, 1), 2)


def _make_kernel(TH, W, Csp, Cmidp, Coutp, cdt):
    """Fused [concat -> conv3x3+BN+ReLU -> conv3x3+BN+ReLU] for one H-strip."""

    def kernel(skp_ref, upx_ref, w1_ref, b1_ref, w2_ref, b2_ref, o_ref,
               sbuf, ubuf, zpad, sems):
        n = pl.program_id(0)
        h = pl.program_id(1)
        row0 = h * TH                       # start row in the (H+4)-padded input

        # Kick off both halo-strip DMAs (skip / upsampled feature) up front.
        cp_s = pltpu.make_async_copy(skp_ref.at[n, pl.ds(row0, TH + 4)], sbuf, sems.at[0])
        cp_u = pltpu.make_async_copy(upx_ref.at[n, pl.ds(row0, TH + 4)], ubuf, sems.at[1])
        cp_s.start()
        cp_u.start()

        # Border-only zeroing of conv2's left/right zero padding while the
        # DMAs are in flight (the (TH+2, W) interior is fully overwritten).
        zcol = jnp.zeros((TH + 2, 1, Cmidp), cdt)
        zpad[:, 0:1, :] = zcol
        zpad[:, W + 1:W + 2, :] = zcol

        def conv_taps(buf, w_ref, c_off, c_width, rows, acc):
            # 3x3 conv as 9 accumulated MXU matmuls over shifted views of the
            # zero-padded strip (no 9*C im2col slab).
            for dy in range(3):
                for dx in range(3):
                    k = dy * 3 + dx
                    patch = buf[dy:dy + rows, dx:dx + W, :]
                    wk = w_ref[k, c_off:c_off + c_width, :]
                    acc = acc + jnp.einsum("hwc,co->hwo", patch, wk,
                                           preferred_element_type=jnp.float32)
            return acc

        # Conv1 on concat([skip, upx]) done algebraically as the sum of two
        # convs, so the channel concat never has to be materialized.
        acc1 = jnp.zeros((TH + 2, W, Cmidp), jnp.float32)
        cp_s.wait()
        acc1 = conv_taps(sbuf, w1_ref, 0, Csp, TH + 2, acc1)    # skip half (upx DMA still in flight)
        cp_u.wait()
        acc1 = conv_taps(ubuf, w1_ref, Csp, Csp, TH + 2, acc1)  # upsampled half
        y1 = jnp.maximum(acc1 + b1_ref[...], 0.0)               # folded-BN shift + ReLU (f32)
        zpad[:, 1:W + 1, :] = y1.astype(cdt)

        # conv2's top/bottom zero-padding rows: only on image-boundary strips
        # (interior strips carry real halo rows of the conv1 output).
        zrow = jnp.zeros((1, W + 2, Cmidp), cdt)

        @pl.when(h == 0)
        def _():
            zpad[0:1, :, :] = zrow

        @pl.when(h == pl.num_programs(1) - 1)
        def _():
            zpad[TH + 1:TH + 2, :, :] = zrow

        # Conv2 + folded-BN shift + ReLU; single lane-dense (128-multiple) store.
        acc2 = jnp.zeros((TH, W, Coutp), jnp.float32)
        acc2 = conv_taps(zpad, w2_ref, 0, Cmidp, TH, acc2)
        o_ref[0] = jnp.maximum(acc2 + b2_ref[...], 0.0).astype(o_ref.dtype)

    return kernel


@functools.partial(jax.jit, static_argnames=("compute_dtype", "strip_rows"))
def upconv_block_fwd(skip, x, params, compute_dtype=jnp.bfloat16, strip_rows=None):
    """UpConvBlock forward (NHWC): skip (N,H,W,Cs), x (N,H/2,W/2,Cin) -> (N,H,W,Cout)."""
    (w_up, s_up, b_up), (w1, s1, b1), (w2, s2, b2) = params
    N, H, W, Cs = skip.shape
    assert x.shape[0] == N and 2 * x.shape[1] == H and 2 * x.shape[2] == W
    Cmid = w1.shape[-1]
    Cout = w2.shape[-1]
    cdt = jnp.dtype(compute_dtype)

    # Lane-aligned channel counts (extra channels are exact zeros everywhere).
    Csp = _round_up(Cs, _LANE)
    C1p = 2 * Csp
    Cmidp = _round_up(Cmid, _LANE)
    Coutp = _round_up(Cout, _LANE)

    # InterpConv 1x1 conv + folded BN at LOW resolution (exact: per-pixel affine
    # commutes with the convex bilinear upsample); upsample + ReLU in XLA.
    z = jnp.einsum("nhwc,co->nhwo", x, w_up * s_up[None, :],
                   precision=lax.Precision.HIGHEST) + b_up
    upx = jnp.maximum(_bilinear_up2x(z), 0.0)                  # (N, H, W, Cs) f32

    # One fused pad per input: +2 rows (strip halo + conv1 zero pad), +1 column
    # each side (conv1 zero pad), channels up to the lane multiple.  The kernel
    # then never zero-fills its inputs.
    pad_cfg = ((0, 0), (2, 2), (1, 1), (0, Csp - Cs))
    skp = jnp.pad(skip.astype(cdt), pad_cfg)                   # (N, H+4, W+2, Csp)
    upp = jnp.pad(upx.astype(cdt), pad_cfg)                    # (N, H+4, W+2, Csp)

    # Fold BN scale into the conv weights (f32, before the bf16 cast), remap
    # conv1's input channels into the padded [skip | upx] layout, flatten taps.
    w1s = (w1 * s1).astype(jnp.float32)                        # (3,3,2Cs,Cmid)
    w1p = jnp.zeros((3, 3, C1p, Cmidp), jnp.float32)
    w1p = w1p.at[:, :, 0:Cs, 0:Cmid].set(w1s[:, :, 0:Cs, :])
    w1p = w1p.at[:, :, Csp:Csp + Cs, 0:Cmid].set(w1s[:, :, Cs:2 * Cs, :])
    w2s = (w2 * s2).astype(jnp.float32)                        # (3,3,Cmid,Cout)
    w2p = jnp.zeros((3, 3, Cmidp, Coutp), jnp.float32)
    w2p = w2p.at[:, :, 0:Cmid, 0:Cout].set(w2s)
    w1f = w1p.reshape(9, C1p, Cmidp).astype(cdt)
    w2f = w2p.reshape(9, Cmidp, Coutp).astype(cdt)
    b1f = jnp.pad(b1, (0, Cmidp - Cmid)).reshape(1, Cmidp).astype(jnp.float32)
    b2f = jnp.pad(b2, (0, Coutp - Cout)).reshape(1, Coutp).astype(jnp.float32)

    # Strip height re-derived from this generation's VMEM (64 MiB v7x vs
    # 128 MiB v5e/v6e); largest divisor of H whose footprint fits the budget.
    vmem_limit = _vmem_limit_bytes()
    weight_bytes = (w1f.size + w2f.size) * cdt.itemsize * 2
    if strip_rows is None:
        budget = max((vmem_limit - weight_bytes) // 2, 1 << 20)
        th = _choose_strip_rows(H, W, Csp, Cmidp, Coutp, cdt.itemsize, budget)
    else:
        th = int(strip_rows)
    assert H % th == 0, (H, th)
    ns = H // th

    kernel = _make_kernel(th, W, Csp, Cmidp, Coutp, cdt)

    out = pl.pallas_call(
        kernel,
        out_shape=jax.ShapeDtypeStruct((N, H, W, Coutp), jnp.float32),
        grid_spec=pltpu.PrefetchScalarGridSpec(
            num_scalar_prefetch=0,
            grid=(N, ns),
            in_specs=[
                pl.BlockSpec(memory_space=pl.ANY),                       # padded skip (manual DMA)
                pl.BlockSpec(memory_space=pl.ANY),                       # padded upx  (manual DMA)
                pl.BlockSpec((9, C1p, Cmidp), lambda n, h: (0, 0, 0)),   # conv1 weights (resident)
                pl.BlockSpec((1, Cmidp), lambda n, h: (0, 0)),           # conv1 bias (BN shift)
                pl.BlockSpec((9, Cmidp, Coutp), lambda n, h: (0, 0, 0)),  # conv2 weights (resident)
                pl.BlockSpec((1, Coutp), lambda n, h: (0, 0)),           # conv2 bias (BN shift)
            ],
            out_specs=pl.BlockSpec((1, th, W, Coutp), lambda n, h: (n, h, 0, 0)),
            scratch_shapes=[
                pltpu.VMEM((th + 4, W + 2, Csp), cdt),     # skip strip + 2-row halo
                pltpu.VMEM((th + 4, W + 2, Csp), cdt),     # upx  strip + 2-row halo
                pltpu.VMEM((th + 2, W + 2, Cmidp), cdt),   # conv1 output, zero-padded
                pltpu.SemaphoreType.DMA((2,)),
            ],
        ),
        compiler_params=pltpu.CompilerParams(
            dimension_semantics=("parallel", "parallel"),
            vmem_limit_bytes=vmem_limit,
        ),
    )(skp, upp, w1f, b1f, w2f, b2f)

    return out[..., :Cout]


def make_params(key, in_channels, skip_channels, out_channels):
    """Deterministic params; eval-mode BN folded into per-channel scale/shift."""
    eps = 1e-5

    def bn_fold(k, c):
        kg, kb, km, kv = jax.random.split(k, 4)
        gamma = 1.0 + 0.1 * jax.random.normal(kg, (c,), jnp.float32)
        beta = 0.1 * jax.random.normal(kb, (c,), jnp.float32)
        mean = 0.1 * jax.random.normal(km, (c,), jnp.float32)
        var = jnp.abs(1.0 + 0.1 * jax.random.normal(kv, (c,), jnp.float32))
        scale = gamma / jnp.sqrt(var + eps)
        shift = beta - mean * scale
        return scale, shift

    key, k1, k2, k3, kb1, kb2, kb3 = jax.random.split(key, 7)
    # InterpConv 1x1 conv: Cin -> Cs, stored as (Cin, Cs) [PyTorch (Cs, Cin, 1, 1)].
    w_up = 0.1 * jax.random.normal(k1, (in_channels, skip_channels), jnp.float32)
    s_up, b_up = bn_fold(kb1, skip_channels)
    # conv_block conv #1: 3x3, 2*Cs -> Cout (HWIO).
    w1 = 0.1 * jax.random.normal(k2, (3, 3, 2 * skip_channels, out_channels), jnp.float32)
    s1, b1 = bn_fold(kb2, out_channels)
    # conv_block conv #2: 3x3, Cout -> Cout (HWIO).
    w2 = 0.1 * jax.random.normal(k3, (3, 3, out_channels, out_channels), jnp.float32)
    s2, b2 = bn_fold(kb3, out_channels)
    return ((w_up, s_up, b_up), (w1, s1, b1), (w2, s2, b2))


def _bilinear_up2x_gather(a):
    """Reference 2x bilinear upsample via explicit source-index gather."""
    def up(v, axis):
        n = v.shape[axis]
        i = jnp.arange(2 * n, dtype=jnp.float32)
        s = jnp.maximum((i + 0.5) / 2.0 - 0.5, 0.0)
        i0 = jnp.floor(s).astype(jnp.int32)
        i1 = jnp.minimum(i0 + 1, n - 1)
        t = s - i0.astype(jnp.float32)
        v0 = jnp.take(v, i0, axis=axis)
        v1 = jnp.take(v, i1, axis=axis)
        shape = [1] * v.ndim
        shape[axis] = 2 * n
        t = t.reshape(shape)
        return v0 * (1.0 - t) + v1 * t
    return up(up(a, 1), 2)


def _reference(skip, x, params):
    """Pure-JAX reference following the literal PyTorch op order."""
    (w_up, s_up, b_up), (w1, s1, b1), (w2, s2, b2) = params
    xu = _bilinear_up2x_gather(x)                               # upsample first
    z = jnp.einsum("nhwc,co->nhwo", xu, w_up,
                   precision=lax.Precision.HIGHEST) * s_up + b_up
    z = jnp.maximum(z, 0.0)                                     # InterpConv ReLU
    y = jnp.concatenate([skip, z], axis=-1)                     # cat([skip, x], C)
    for (w, s, b) in ((w1, s1, b1), (w2, s2, b2)):
        y = lax.conv_general_dilated(
            y, w, window_strides=(1, 1), padding=((1, 1), (1, 1)),
            dimension_numbers=("NHWC", "HWIO", "NHWC"),
            precision=lax.Precision.HIGHEST)
        y = jnp.maximum(y * s + b, 0.0)
    return y


if __name__ == "__main__":
    N, H, W = 2, 16, 16
    in_channels, skip_channels, out_channels = 8, 4, 8

    key = jax.random.PRNGKey(0)
    key, ks, kx = jax.random.split(key, 3)
    skip = jax.random.normal(ks, (N, H, W, skip_channels), jnp.float32)
    x = jax.random.normal(kx, (N, H // 2, W // 2, in_channels), jnp.float32)
    params = make_params(key, in_channels, skip_channels, out_channels)

    ref = jax.block_until_ready(_reference(skip, x, params))

    # f32 operands, forced multi-strip grid (exercises halo + boundary logic).
    out_f32_strips = jax.block_until_ready(
        upconv_block_fwd(skip, x, params, compute_dtype=jnp.float32, strip_rows=4))
    assert out_f32_strips.shape == (N, H, W, out_channels), out_f32_strips.shape
    np.testing.assert_allclose(np.asarray(out_f32_strips), np.asarray(ref),
                               rtol=1e-4, atol=1e-4)

    # f32 operands, auto strip height (single-strip path on this toy size).
    out_f32_auto = jax.block_until_ready(
        upconv_block_fwd(skip, x, params, compute_dtype=jnp.float32))
    np.testing.assert_allclose(np.asarray(out_f32_auto), np.asarray(ref),
                               rtol=1e-4, atol=1e-4)

    # Default path: bf16 MXU operands (f32 accumulation / epilogue), auto strips.
    out_bf16 = jax.block_until_ready(upconv_block_fwd(skip, x, params))
    np.testing.assert_allclose(np.asarray(out_bf16), np.asarray(ref),
                               rtol=1e-1, atol=1e-1)

    print("KERNEL_OK")
</pallas_src>

<mosaic_0001>
module attributes {stable_mosaic.version = 11 : i64} {
  func.func @kernel(%arg0: i32, %arg1: i32, %arg2: memref<2x20x18x128xf32, #tpu.memory_space<any>>, %arg3: memref<2x20x18x128xf32, #tpu.memory_space<any>>, %arg4: memref<9x256x128xf32, #tpu.memory_space<vmem>>, %arg5: memref<1x128xf32, #tpu.memory_space<vmem>>, %arg6: memref<9x128x128xf32, #tpu.memory_space<vmem>>, %arg7: memref<1x128xf32, #tpu.memory_space<vmem>>, %arg8: memref<1x4x16x128xf32, #tpu.memory_space<vmem>>, %arg9: memref<8x18x128xf32, #tpu.memory_space<vmem>>, %arg10: memref<8x18x128xf32, #tpu.memory_space<vmem>>, %arg11: memref<6x18x128xf32, #tpu.memory_space<vmem>>, %arg12: memref<2x!tpu.dma_semaphore, #tpu.memory_space<semaphore_mem>>) attributes {dimension_semantics = [#tpu.dimension_semantics<parallel>, #tpu.dimension_semantics<parallel>], iteration_bounds = array<i64: 2, 4>, scalar_prefetch = 0 : i64, scratch_operands = 4 : i64, tpu.core_type = #tpu.core_type<tc>, window_params = [{}, {}, {pipeline_mode = #tpu.pipeline_mode<synchronous>, transform_indices = @transform_2, window_bounds = array<i64: 9, 256, 128>}, {pipeline_mode = #tpu.pipeline_mode<synchronous>, transform_indices = @transform_3, window_bounds = array<i64: 1, 128>}, {pipeline_mode = #tpu.pipeline_mode<synchronous>, transform_indices = @transform_4, window_bounds = array<i64: 9, 128, 128>}, {pipeline_mode = #tpu.pipeline_mode<synchronous>, transform_indices = @transform_5, window_bounds = array<i64: 1, 128>}, {transform_indices = @transform_6, window_bounds = array<i64: 1, 4, 16, 128>}]} {
    %c4_i32 = arith.constant 4 : i32
    %0 = arith.muli %arg1, %c4_i32 : i32
    %c0_i32 = arith.constant 0 : i32
    %c0_i32_0 = arith.constant 0 : i32
    %c0_i32_1 = arith.constant 0 : i32
    %1 = tpu.memref_slice %arg2[%arg0, %0, %c0_i32_0, %c0_i32_1] : memref<2x20x18x128xf32, #tpu.memory_space<any>> -> memref<1x8x18x128xf32, #tpu.memory_space<any>>
    %2 = tpu.memref_squeeze %1 : memref<1x8x18x128xf32, #tpu.memory_space<any>> -> memref<8x18x128xf32, #tpu.memory_space<any>>
    %3 = tpu.memref_slice %arg12[%c0_i32] : memref<2x!tpu.dma_semaphore, #tpu.memory_space<semaphore_mem>> -> memref<1x!tpu.dma_semaphore, #tpu.memory_space<semaphore_mem>>
    %4 = tpu.memref_squeeze %3 : memref<1x!tpu.dma_semaphore, #tpu.memory_space<semaphore_mem>> -> memref<!tpu.dma_semaphore, #tpu.memory_space<semaphore_mem>>
    tpu.enqueue_dma source(%2 : memref<8x18x128xf32, #tpu.memory_space<any>>) target(%arg9 : memref<8x18x128xf32, #tpu.memory_space<vmem>>) target_semaphore(%4 : memref<!tpu.dma_semaphore, #tpu.memory_space<semaphore_mem>>)
    %c1_i32 = arith.constant 1 : i32
    %c0_i32_2 = arith.constant 0 : i32
    %c0_i32_3 = arith.constant 0 : i32
    %5 = tpu.memref_slice %arg3[%arg0, %0, %c0_i32_2, %c0_i32_3] : memref<2x20x18x128xf32, #tpu.memory_space<any>> -> memref<1x8x18x128xf32, #tpu.memory_space<any>>
    %6 = tpu.memref_squeeze %5 : memref<1x8x18x128xf32, #tpu.memory_space<any>> -> memref<8x18x128xf32, #tpu.memory_space<any>>
    %7 = tpu.memref_slice %arg12[%c1_i32] : memref<2x!tpu.dma_semaphore, #tpu.memory_space<semaphore_mem>> -> memref<1x!tpu.dma_semaphore, #tpu.memory_space<semaphore_mem>>
    %8 = tpu.memref_squeeze %7 : memref<1x!tpu.dma_semaphore, #tpu.memory_space<semaphore_mem>> -> memref<!tpu.dma_semaphore, #tpu.memory_space<semaphore_mem>>
    tpu.enqueue_dma source(%6 : memref<8x18x128xf32, #tpu.memory_space<any>>) target(%arg10 : memref<8x18x128xf32, #tpu.memory_space<vmem>>) target_semaphore(%8 : memref<!tpu.dma_semaphore, #tpu.memory_space<semaphore_mem>>)
    %cst = arith.constant 0.000000e+00 : f32
    %9 = vector.broadcast %cst : f32 to vector<6x1x128xf32>
    %c0 = arith.constant 0 : index
    %c0_4 = arith.constant 0 : index
    %c0_5 = arith.constant 0 : index
    %10 = vector.load %arg11[%c0, %c0_4, %c0_5] : memref<6x18x128xf32, #tpu.memory_space<vmem>>, vector<6x1x128xf32>
    tpu.vector_store %arg11[%c0, %c0_4, %c0_5], %9 {strides = array<i32>} : memref<6x18x128xf32, #tpu.memory_space<vmem>>, vector<6x1x128xf32>,
    %c0_6 = arith.constant 0 : index
    %c17 = arith.constant 17 : index
    %c0_7 = arith.constant 0 : index
    %11 = vector.load %arg11[%c0_6, %c17, %c0_7] : memref<6x18x128xf32, #tpu.memory_space<vmem>>, vector<6x1x128xf32>
    tpu.vector_store %arg11[%c0_6, %c17, %c0_7], %9 {strides = array<i32>} : memref<6x18x128xf32, #tpu.memory_space<vmem>>, vector<6x1x128xf32>,
    %cst_8 = arith.constant 0.000000e+00 : f32
    %12 = vector.broadcast %cst_8 : f32 to vector<6x16x128xf32>
    %c0_i32_9 = arith.constant 0 : i32
    %c0_i32_10 = arith.constant 0 : i32
    %c0_i32_11 = arith.constant 0 : i32
    %13 = tpu.memref_slice %arg2[%arg0, %0, %c0_i32_10, %c0_i32_11] : memref<2x20x18x128xf32, #tpu.memory_space<any>> -> memref<1x8x18x128xf32, #tpu.memory_space<any>>
    %14 = tpu.memref_squeeze %13 : memref<1x8x18x128xf32, #tpu.memory_space<any>> -> memref<8x18x128xf32, #tpu.memory_space<any>>
    %15 = tpu.memref_slice %arg12[%c0_i32_9] : memref<2x!tpu.dma_semaphore, #tpu.memory_space<semaphore_mem>> -> memref<1x!tpu.dma_semaphore, #tpu.memory_space<semaphore_mem>>
    %16 = tpu.memref_squeeze %15 : memref<1x!tpu.dma_semaphore, #tpu.memory_space<semaphore_mem>> -> memref<!tpu.dma_semaphore, #tpu.memory_space<semaphore_mem>>
    tpu.wait_dma2 semaphore(%16 : memref<!tpu.dma_semaphore, #tpu.memory_space<semaphore_mem>>) src(%14 : memref<8x18x128xf32, #tpu.memory_space<any>>) dst(%arg9 : memref<8x18x128xf32, #tpu.memory_space<vmem>>)
    %c0_12 = arith.constant 0 : index
    %c0_13 = arith.constant 0 : index
    %c0_14 = arith.constant 0 : index
    %17 = vector.load %arg9[%c0_12, %c0_13, %c0_14] : memref<8x18x128xf32, #tpu.memory_space<vmem>>, vector<6x16x128xf32>
    %c0_15 = arith.constant 0 : index
    %c0_16 = arith.constant 0 : index
    %c0_17 = arith.constant 0 : index
    %18 = vector.load %arg4[%c0_15, %c0_16, %c0_17] : memref<9x256x128xf32, #tpu.memory_space<vmem>>, vector<1x128x128xf32>
    %19 = vector.shape_cast %18 : vector<1x128x128xf32> to vector<128x128xf32>
    "tpu.trace_start"() <{level = 10 : i32, message = "hwc,co->hwo"}> : () -> ()
    %cst_18 = arith.constant dense<0.000000e+00> : vector<6x16x128xf32>
    %20 = tpu.matmul %17, %19, %cst_18 {dimension_numbers = #tpu.dot_dimension_numbers<[2], [0], [0, 1], [1], [0, 0, 0, 1, 1, 1], [], []>} : vector<6x16x128xf32>, vector<128x128xf32>, vector<6x16x128xf32> -> vector<6x16x128xf32>
    "tpu.trace_stop"() : () -> ()
    %21 = arith.addf %12, %20 : vector<6x16x128xf32>
    %c0_19 = arith.constant 0 : index
    %c1 = arith.constant 1 : index
    %c0_20 = arith.constant 0 : index
    %22 = vector.load %arg9[%c0_19, %c1, %c0_20] : memref<8x18x128xf32, #tpu.memory_space<vmem>>, vector<6x16x128xf32>
    %c1_21 = arith.constant 1 : index
    %c0_22 = arith.constant 0 : index
    %c0_23 = arith.constant 0 : index
    %23 = vector.load %arg4[%c1_21, %c0_22, %c0_23] : memref<9x256x128xf32, #tpu.memory_space<vmem>>, vector<1x128x128xf32>
    %24 = vector.shape_cast %23 : vector<1x128x128xf32> to vector<128x128xf32>
    "tpu.trace_start"() <{level = 10 : i32, message = "hwc,co->hwo"}> : () -> ()
    %cst_24 = arith.constant dense<0.000000e+00> : vector<6x16x128xf32>
    %25 = tpu.matmul %22, %24, %cst_24 {dimension_numbers = #tpu.dot_dimension_numbers<[2], [0], [0, 1], [1], [0, 0, 0, 1, 1, 1], [], []>} : vector<6x16x128xf32>, vector<128x128xf32>, vector<6x16x128xf32> -> vector<6x16x128xf32>
    "tpu.trace_stop"() : () -> ()
    %26 = arith.addf %21, %25 : vector<6x16x128xf32>
    %c0_25 = arith.constant 0 : index
    %c2 = arith.constant 2 : index
    %c0_26 = arith.constant 0 : index
    %27 = vector.load %arg9[%c0_25, %c2, %c0_26] : memref<8x18x128xf32, #tpu.memory_space<vmem>>, vector<6x16x128xf32>
    %c2_27 = arith.constant 2 : index
    %c0_28 = arith.constant 0 : index
    %c0_29 = arith.constant 0 : index
    %28 = vector.load %arg4[%c2_27, %c0_28, %c0_29] : memref<9x256x128xf32, #tpu.memory_space<vmem>>, vector<1x128x128xf32>
    %29 = vector.shape_cast %28 : vector<1x128x128xf32> to vector<128x128xf32>
    "tpu.trace_start"() <{level = 10 : i32, message = "hwc,co->hwo"}> : () -> ()
    %cst_30 = arith.constant dense<0.000000e+00> : vector<6x16x128xf32>
    %30 = tpu.matmul %27, %29, %cst_30 {dimension_numbers = #tpu.dot_dimension_numbers<[2], [0], [0, 1], [1], [0, 0, 0, 1, 1, 1], [], []>} : vector<6x16x128xf32>, vector<128x128xf32>, vector<6x16x128xf32> -> vector<6x16x128xf32>
    "tpu.trace_stop"() : () -> ()
    %31 = arith.addf %26, %30 : vector<6x16x128xf32>
    %c1_31 = arith.constant 1 : index
    %c0_32 = arith.constant 0 : index
    %c0_33 = arith.constant 0 : index
    %32 = vector.load %arg9[%c1_31, %c0_32, %c0_33] : memref<8x18x128xf32, #tpu.memory_space<vmem>>, vector<6x16x128xf32>
    %c3 = arith.constant 3 : index
    %c0_34 = arith.constant 0 : index
    %c0_35 = arith.constant 0 : index
    %33 = vector.load %arg4[%c3, %c0_34, %c0_35] : memref<9x256x128xf32, #tpu.memory_space<vmem>>, vector<1x128x128xf32>
    %34 = vector.shape_cast %33 : vector<1x128x128xf32> to vector<128x128xf32>
    "tpu.trace_start"() <{level = 10 : i32, message = "hwc,co->hwo"}> : () -> ()
    %cst_36 = arith.constant dense<0.000000e+00> : vector<6x16x128xf32>
    %35 = tpu.matmul %32, %34, %cst_36 {dimension_numbers = #tpu.dot_dimension_numbers<[2], [0], [0, 1], [1], [0, 0, 0, 1, 1, 1], [], []>} : vector<6x16x128xf32>, vector<128x128xf32>, vector<6x16x128xf32> -> vector<6x16x128xf32>
    "tpu.trace_stop"() : () -> ()
    %36 = arith.addf %31, %35 : vector<6x16x128xf32>
    %c1_37 = arith.constant 1 : index
    %c1_38 = arith.constant 1 : index
    %c0_39 = arith.constant 0 : index
    %37 = vector.load %arg9[%c1_37, %c1_38, %c0_39] : memref<8x18x128xf32, #tpu.memory_space<vmem>>, vector<6x16x128xf32>
    %c4 = arith.constant 4 : index
    %c0_40 = arith.constant 0 : index
    %c0_41 = arith.constant 0 : index
    %38 = vector.load %arg4[%c4, %c0_40, %c0_41] : memref<9x256x128xf32, #tpu.memory_space<vmem>>, vector<1x128x128xf32>
    %39 = vector.shape_cast %38 : vector<1x128x128xf32> to vector<128x128xf32>
    "tpu.trace_start"() <{level = 10 : i32, message = "hwc,co->hwo"}> : () -> ()
    %cst_42 = arith.constant dense<0.000000e+00> : vector<6x16x128xf32>
    %40 = tpu.matmul %37, %39, %cst_42 {dimension_numbers = #tpu.dot_dimension_numbers<[2], [0], [0, 1], [1], [0, 0, 0, 1, 1, 1], [], []>} : vector<6x16x128xf32>, vector<128x128xf32>, vector<6x16x128xf32> -> vector<6x16x128xf32>
    "tpu.trace_stop"() : () -> ()
    %41 = arith.addf %36, %40 : vector<6x16x128xf32>
    %c1_43 = arith.constant 1 : index
    %c2_44 = arith.constant 2 : index
    %c0_45 = arith.constant 0 : index
    %42 = vector.load %arg9[%c1_43, %c2_44, %c0_45] : memref<8x18x128xf32, #tpu.memory_space<vmem>>, vector<6x16x128xf32>
    %c5 = arith.constant 5 : index
    %c0_46 = arith.constant 0 : index
    %c0_47 = arith.constant 0 : index
    %43 = vector.load %arg4[%c5, %c0_46, %c0_47] : memref<9x256x128xf32, #tpu.memory_space<vmem>>, vector<1x128x128xf32>
    %44 = vector.shape_cast %43 : vector<1x128x128xf32> to vector<128x128xf32>
    "tpu.trace_start"() <{level = 10 : i32, message = "hwc,co->hwo"}> : () -> ()
    %cst_48 = arith.constant dense<0.000000e+00> : vector<6x16x128xf32>
    %45 = tpu.matmul %42, %44, %cst_48 {dimension_numbers = #tpu.dot_dimension_numbers<[2], [0], [0, 1], [1], [0, 0, 0, 1, 1, 1], [], []>} : vector<6x16x128xf32>, vector<128x128xf32>, vector<6x16x128xf32> -> vector<6x16x128xf32>
    "tpu.trace_stop"() : () -> ()
    %46 = arith.addf %41, %45 : vector<6x16x128xf32>
    %c2_49 = arith.constant 2 : index
    %c0_50 = arith.constant 0 : index
    %c0_51 = arith.constant 0 : index
    %47 = vector.load %arg9[%c2_49, %c0_50, %c0_51] : memref<8x18x128xf32, #tpu.memory_space<vmem>>, vector<6x16x128xf32>
    %c6 = arith.constant 6 : index
    %c0_52 = arith.constant 0 : index
    %c0_53 = arith.constant 0 : index
    %48 = vector.load %arg4[%c6, %c0_52, %c0_53] : memref<9x256x128xf32, #tpu.memory_space<vmem>>, vector<1x128x128xf32>
    %49 = vector.shape_cast %48 : vector<1x128x128xf32> to vector<128x128xf32>
    "tpu.trace_start"() <{level = 10 : i32, message = "hwc,co->hwo"}> : () -> ()
    %cst_54 = arith.constant dense<0.000000e+00> : vector<6x16x128xf32>
    %50 = tpu.matmul %47, %49, %cst_54 {dimension_numbers = #tpu.dot_dimension_numbers<[2], [0], [0, 1], [1], [0, 0, 0, 1, 1, 1], [], []>} : vector<6x16x128xf32>, vector<128x128xf32>, vector<6x16x128xf32> -> vector<6x16x128xf32>
    "tpu.trace_stop"() : () -> ()
    %51 = arith.addf %46, %50 : vector<6x16x128xf32>
    %c2_55 = arith.constant 2 : index
    %c1_56 = arith.constant 1 : index
    %c0_57 = arith.constant 0 : index
    %52 = vector.load %arg9[%c2_55, %c1_56, %c0_57] : memref<8x18x128xf32, #tpu.memory_space<vmem>>, vector<6x16x128xf32>
    %c7 = arith.constant 7 : index
    %c0_58 = arith.constant 0 : index
    %c0_59 = arith.constant 0 : index
    %53 = vector.load %arg4[%c7, %c0_58, %c0_59] : memref<9x256x128xf32, #tpu.memory_space<vmem>>, vector<1x128x128xf32>
    %54 = vector.shape_cast %53 : vector<1x128x128xf32> to vector<128x128xf32>
    "tpu.trace_start"() <{level = 10 : i32, message = "hwc,co->hwo"}> : () -> ()
    %cst_60 = arith.constant dense<0.000000e+00> : vector<6x16x128xf32>
    %55 = tpu.matmul %52, %54, %cst_60 {dimension_numbers = #tpu.dot_dimension_numbers<[2], [0], [0, 1], [1], [0, 0, 0, 1, 1, 1], [], []>} : vector<6x16x128xf32>, vector<128x128xf32>, vector<6x16x128xf32> -> vector<6x16x128xf32>
    "tpu.trace_stop"() : () -> ()
    %56 = arith.addf %51, %55 : vector<6x16x128xf32>
    %c2_61 = arith.constant 2 : index
    %c2_62 = arith.constant 2 : index
    %c0_63 = arith.constant 0 : index
    %57 = vector.load %arg9[%c2_61, %c2_62, %c0_63] : memref<8x18x128xf32, #tpu.memory_space<vmem>>, vector<6x16x128xf32>
    %c8 = arith.constant 8 : index
    %c0_64 = arith.constant 0 : index
    %c0_65 = arith.constant 0 : index
    %58 = vector.load %arg4[%c8, %c0_64, %c0_65] : memref<9x256x128xf32, #tpu.memory_space<vmem>>, vector<1x128x128xf32>
    %59 = vector.shape_cast %58 : vector<1x128x128xf32> to vector<128x128xf32>
    "tpu.trace_start"() <{level = 10 : i32, message = "hwc,co->hwo"}> : () -> ()
    %cst_66 = arith.constant dense<0.000000e+00> : vector<6x16x128xf32>
    %60 = tpu.matmul %57, %59, %cst_66 {dimension_numbers = #tpu.dot_dimension_numbers<[2], [0], [0, 1], [1], [0, 0, 0, 1, 1, 1], [], []>} : vector<6x16x128xf32>, vector<128x128xf32>, vector<6x16x128xf32> -> vector<6x16x128xf32>
    "tpu.trace_stop"() : () -> ()
    %61 = arith.addf %56, %60 : vector<6x16x128xf32>
    %c1_i32_67 = arith.constant 1 : i32
    %c0_i32_68 = arith.constant 0 : i32
    %c0_i32_69 = arith.constant 0 : i32
    %62 = tpu.memref_slice %arg3[%arg0, %0, %c0_i32_68, %c0_i32_69] : memref<2x20x18x128xf32, #tpu.memory_space<any>> -> memref<1x8x18x128xf32, #tpu.memory_space<any>>
    %63 = tpu.memref_squeeze %62 : memref<1x8x18x128xf32, #tpu.memory_space<any>> -> memref<8x18x128xf32, #tpu.memory_space<any>>
    %64 = tpu.memref_slice %arg12[%c1_i32_67] : memref<2x!tpu.dma_semaphore, #tpu.memory_space<semaphore_mem>> -> memref<1x!tpu.dma_semaphore, #tpu.memory_space<semaphore_mem>>
    %65 = tpu.memref_squeeze %64 : memref<1x!tpu.dma_semaphore, #tpu.memory_space<semaphore_mem>> -> memref<!tpu.dma_semaphore, #tpu.memory_space<semaphore_mem>>
    tpu.wait_dma2 semaphore(%65 : memref<!tpu.dma_semaphore, #tpu.memory_space<semaphore_mem>>) src(%63 : memref<8x18x128xf32, #tpu.memory_space<any>>) dst(%arg10 : memref<8x18x128xf32, #tpu.memory_space<vmem>>)
    %c0_70 = arith.constant 0 : index
    %c0_71 = arith.constant 0 : index
    %c0_72 = arith.constant 0 : index
    %66 = vector.load %arg10[%c0_70, %c0_71, %c0_72] : memref<8x18x128xf32, #tpu.memory_space<vmem>>, vector<6x16x128xf32>
    %c0_73 = arith.constant 0 : index
    %c128 = arith.constant 128 : index
    %c0_74 = arith.constant 0 : index
    %67 = vector.load %arg4[%c0_73, %c128, %c0_74] : memref<9x256x128xf32, #tpu.memory_space<vmem>>, vector<1x128x128xf32>
    %68 = vector.shape_cast %67 : vector<1x128x128xf32> to vector<128x128xf32>
    "tpu.trace_start"() <{level = 10 : i32, message = "hwc,co->hwo"}> : () -> ()
    %cst_75 = arith.constant dense<0.000000e+00> : vector<6x16x128xf32>
    %69 = tpu.matmul %66, %68, %cst_75 {dimension_numbers = #tpu.dot_dimension_numbers<[2], [0], [0, 1], [1], [0, 0, 0, 1, 1, 1], [], []>} : vector<6x16x128xf32>, vector<128x128xf32>, vector<6x16x128xf32> -> vector<6x16x128xf32>
    "tpu.trace_stop"() : () -> ()
    %70 = arith.addf %61, %69 : vector<6x16x128xf32>
    %c0_76 = arith.constant 0 : index
    %c1_77 = arith.constant 1 : index
    %c0_78 = arith.constant 0 : index
    %71 = vector.load %arg10[%c0_76, %c1_77, %c0_78] : memref<8x18x128xf32, #tpu.memory_space<vmem>>, vector<6x16x128xf32>
    %c1_79 = arith.constant 1 : index
    %c128_80 = arith.constant 128 : index
    %c0_81 = arith.constant 0 : index
    %72 = vector.load %arg4[%c1_79, %c128_80, %c0_81] : memref<9x256x128xf32, #tpu.memory_space<vmem>>, vector<1x128x128xf32>
    %73 = vector.shape_cast %72 : vector<1x128x128xf32> to vector<128x128xf32>
    "tpu.trace_start"() <{level = 10 : i32, message = "hwc,co->hwo"}> : () -> ()
    %cst_82 = arith.constant dense<0.000000e+00> : vector<6x16x128xf32>
    %74 = tpu.matmul %71, %73, %cst_82 {dimension_numbers = #tpu.dot_dimension_numbers<[2], [0], [0, 1], [1], [0, 0, 0, 1, 1, 1], [], []>} : vector<6x16x128xf32>, vector<128x128xf32>, vector<6x16x128xf32> -> vector<6x16x128xf32>
    "tpu.trace_stop"() : () -> ()
    %75 = arith.addf %70, %74 : vector<6x16x128xf32>
    %c0_83 = arith.constant 0 : index
    %c2_84 = arith.constant 2 : index
    %c0_85 = arith.constant 0 : index
    %76 = vector.load %arg10[%c0_83, %c2_84, %c0_85] : memref<8x18x128xf32, #tpu.memory_space<vmem>>, vector<6x16x128xf32>
    %c2_86 = arith.constant 2 : index
    %c128_87 = arith.constant 128 : index
    %c0_88 = arith.constant 0 : index
    %77 = vector.load %arg4[%c2_86, %c128_87, %c0_88] : memref<9x256x128xf32, #tpu.memory_space<vmem>>, vector<1x128x128xf32>
    %78 = vector.shape_cast %77 : vector<1x128x128xf32> to vector<128x128xf32>
    "tpu.trace_start"() <{level = 10 : i32, message = "hwc,co->hwo"}> : () -> ()
    %cst_89 = arith.constant dense<0.000000e+00> : vector<6x16x128xf32>
    %79 = tpu.matmul %76, %78, %cst_89 {dimension_numbers = #tpu.dot_dimension_numbers<[2], [0], [0, 1], [1], [0, 0, 0, 1, 1, 1], [], []>} : vector<6x16x128xf32>, vector<128x128xf32>, vector<6x16x128xf32> -> vector<6x16x128xf32>
    "tpu.trace_stop"() : () -> ()
    %80 = arith.addf %75, %79 : vector<6x16x128xf32>
    %c1_90 = arith.constant 1 : index
    %c0_91 = arith.constant 0 : index
    %c0_92 = arith.constant 0 : index
    %81 = vector.load %arg10[%c1_90, %c0_91, %c0_92] : memref<8x18x128xf32, #tpu.memory_space<vmem>>, vector<6x16x128xf32>
    %c3_93 = arith.constant 3 : index
    %c128_94 = arith.constant 128 : index
    %c0_95 = arith.constant 0 : index
    %82 = vector.load %arg4[%c3_93, %c128_94, %c0_95] : memref<9x256x128xf32, #tpu.memory_space<vmem>>, vector<1x128x128xf32>
    %83 = vector.shape_cast %82 : vector<1x128x128xf32> to vector<128x128xf32>
    "tpu.trace_start"() <{level = 10 : i32, message = "hwc,co->hwo"}> : () -> ()
    %cst_96 = arith.constant dense<0.000000e+00> : vector<6x16x128xf32>
    %84 = tpu.matmul %81, %83, %cst_96 {dimension_numbers = #tpu.dot_dimension_numbers<[2], [0], [0, 1], [1], [0, 0, 0, 1, 1, 1], [], []>} : vector<6x16x128xf32>, vector<128x128xf32>, vector<6x16x128xf32> -> vector<6x16x128xf32>
    "tpu.trace_stop"() : () -> ()
    %85 = arith.addf %80, %84 : vector<6x16x128xf32>
    %c1_97 = arith.constant 1 : index
    %c1_98 = arith.constant 1 : index
    %c0_99 = arith.constant 0 : index
    %86 = vector.load %arg10[%c1_97, %c1_98, %c0_99] : memref<8x18x128xf32, #tpu.memory_space<vmem>>, vector<6x16x128xf32>
    %c4_100 = arith.constant 4 : index
    %c128_101 = arith.constant 128 : index
    %c0_102 = arith.constant 0 : index
    %87 = vector.load %arg4[%c4_100, %c128_101, %c0_102] : memref<9x256x128xf32, #tpu.memory_space<vmem>>, vector<1x128x128xf32>
    %88 = vector.shape_cast %87 : vector<1x128x128xf32> to vector<128x128xf32>
    "tpu.trace_start"() <{level = 10 : i32, message = "hwc,co->hwo"}> : () -> ()
    %cst_103 = arith.constant dense<0.000000e+00> : vector<6x16x128xf32>
    %89 = tpu.matmul %86, %88, %cst_103 {dimension_numbers = #tpu.dot_dimension_numbers<[2], [0], [0, 1], [1], [0, 0, 0, 1, 1, 1], [], []>} : vector<6x16x128xf32>, vector<128x128xf32>, vector<6x16x128xf32> -> vector<6x16x128xf32>
    "tpu.trace_stop"() : () -> ()
    %90 = arith.addf %85, %89 : vector<6x16x128xf32>
    %c1_104 = arith.constant 1 : index
    %c2_105 = arith.constant 2 : index
    %c0_106 = arith.constant 0 : index
    %91 = vector.load %arg10[%c1_104, %c2_105, %c0_106] : memref<8x18x128xf32, #tpu.memory_space<vmem>>, vector<6x16x128xf32>
    %c5_107 = arith.constant 5 : index
    %c128_108 = arith.constant 128 : index
    %c0_109 = arith.constant 0 : index
    %92 = vector.load %arg4[%c5_107, %c128_108, %c0_109] : memref<9x256x128xf32, #tpu.memory_space<vmem>>, vector<1x128x128xf32>
    %93 = vector.shape_cast %92 : vector<1x128x128xf32> to vector<128x128xf32>
    "tpu.trace_start"() <{level = 10 : i32, message = "hwc,co->hwo"}> : () -> ()
    %cst_110 = arith.constant dense<0.000000e+00> : vector<6x16x128xf32>
    %94 = tpu.matmul %91, %93, %cst_110 {dimension_numbers = #tpu.dot_dimension_numbers<[2], [0], [0, 1], [1], [0, 0, 0, 1, 1, 1], [], []>} : vector<6x16x128xf32>, vector<128x128xf32>, vector<6x16x128xf32> -> vector<6x16x128xf32>
    "tpu.trace_stop"() : () -> ()
    %95 = arith.addf %90, %94 : vector<6x16x128xf32>
    %c2_111 = arith.constant 2 : index
    %c0_112 = arith.constant 0 : index
    %c0_113 = arith.constant 0 : index
    %96 = vector.load %arg10[%c2_111, %c0_112, %c0_113] : memref<8x18x128xf32, #tpu.memory_space<vmem>>, vector<6x16x128xf32>
    %c6_114 = arith.constant 6 : index
    %c128_115 = arith.constant 128 : index
    %c0_116 = arith.constant 0 : index
    %97 = vector.load %arg4[%c6_114, %c128_115, %c0_116] : memref<9x256x128xf32, #tpu.memory_space<vmem>>, vector<1x128x128xf32>
    %98 = vector.shape_cast %97 : vector<1x128x128xf32> to vector<128x128xf32>
    "tpu.trace_start"() <{level = 10 : i32, message = "hwc,co->hwo"}> : () -> ()
    %cst_117 = arith.constant dense<0.000000e+00> : vector<6x16x128xf32>
    %99 = tpu.matmul %96, %98, %cst_117 {dimension_numbers = #tpu.dot_dimension_numbers<[2], [0], [0, 1], [1], [0, 0, 0, 1, 1, 1], [], []>} : vector<6x16x128xf32>, vector<128x128xf32>, vector<6x16x128xf32> -> vector<6x16x128xf32>
    "tpu.trace_stop"() : () -> ()
    %100 = arith.addf %95, %99 : vector<6x16x128xf32>
    %c2_118 = arith.constant 2 : index
    %c1_119 = arith.constant 1 : index
    %c0_120 = arith.constant 0 : index
    %101 = vector.load %arg10[%c2_118, %c1_119, %c0_120] : memref<8x18x128xf32, #tpu.memory_space<vmem>>, vector<6x16x128xf32>
    %c7_121 = arith.constant 7 : index
    %c128_122 = arith.constant 128 : index
    %c0_123 = arith.constant 0 : index
    %102 = vector.load %arg4[%c7_121, %c128_122, %c0_123] : memref<9x256x128xf32, #tpu.memory_space<vmem>>, vector<1x128x128xf32>
    %103 = vector.shape_cast %102 : vector<1x128x128xf32> to vector<128x128xf32>
    "tpu.trace_start"() <{level = 10 : i32, message = "hwc,co->hwo"}> : () -> ()
    %cst_124 = arith.constant dense<0.000000e+00> : vector<6x16x128xf32>
    %104 = tpu.matmul %101, %103, %cst_124 {dimension_numbers = #tpu.dot_dimension_numbers<[2], [0], [0, 1], [1], [0, 0, 0, 1, 1, 1], [], []>} : vector<6x16x128xf32>, vector<128x128xf32>, vector<6x16x128xf32> -> vector<6x16x128xf32>
    "tpu.trace_stop"() : () -> ()
    %105 = arith.addf %100, %104 : vector<6x16x128xf32>
    %c2_125 = arith.constant 2 : index
    %c2_126 = arith.constant 2 : index
    %c0_127 = arith.constant 0 : index
    %106 = vector.load %arg10[%c2_125, %c2_126, %c0_127] : memref<8x18x128xf32, #tpu.memory_space<vmem>>, vector<6x16x128xf32>
    %c8_128 = arith.constant 8 : index
    %c128_129 = arith.constant 128 : index
    %c0_130 = arith.constant 0 : index
    %107 = vector.load %arg4[%c8_128, %c128_129, %c0_130] : memref<9x256x128xf32, #tpu.memory_space<vmem>>, vector<1x128x128xf32>
    %108 = vector.shape_cast %107 : vector<1x128x128xf32> to vector<128x128xf32>
    "tpu.trace_start"() <{level = 10 : i32, message = "hwc,co->hwo"}> : () -> ()
    %cst_131 = arith.constant dense<0.000000e+00> : vector<6x16x128xf32>
    %109 = tpu.matmul %106, %108, %cst_131 {dimension_numbers = #tpu.dot_dimension_numbers<[2], [0], [0, 1], [1], [0, 0, 0, 1, 1, 1], [], []>} : vector<6x16x128xf32>, vector<128x128xf32>, vector<6x16x128xf32> -> vector<6x16x128xf32>
    "tpu.trace_stop"() : () -> ()
    %110 = arith.addf %105, %109 : vector<6x16x128xf32>
    %c0_132 = arith.constant 0 : index
    %c0_133 = arith.constant 0 : index
    %111 = vector.load %arg5[%c0_132, %c0_133] : memref<1x128xf32, #tpu.memory_space<vmem>>, vector<1x128xf32>
    %112 = vector.shape_cast %111 : vector<1x128xf32> to vector<1x1x128xf32>
    %113 = vector.broadcast %112 : vector<1x1x128xf32> to vector<6x16x128xf32>
    %114 = arith.addf %110, %113 : vector<6x16x128xf32>
    %cst_134 = arith.constant 0.000000e+00 : f32
    %115 = vector.broadcast %cst_134 : f32 to vector<6x16x128xf32>
    %116 = arith.maximumf %114, %115 : vector<6x16x128xf32>
    %c0_135 = arith.constant 0 : index
    %c1_136 = arith.constant 1 : index
    %c0_137 = arith.constant 0 : index
    %117 = vector.load %arg11[%c0_135, %c1_136, %c0_137] : memref<6x18x128xf32, #tpu.memory_space<vmem>>, vector<6x16x128xf32>
    tpu.vector_store %arg11[%c0_135, %c1_136, %c0_137], %116 {strides = array<i32>} : memref<6x18x128xf32, #tpu.memory_space<vmem>>, vector<6x16x128xf32>,
    %cst_138 = arith.constant 0.000000e+00 : f32
    %118 = vector.broadcast %cst_138 : f32 to vector<1x18x128xf32>
    %c0_i32_139 = arith.constant 0 : i32
    %119 = arith.cmpi eq, %arg1, %c0_i32_139 : i32
    %120 = arith.extui %119 : i1 to i32
    %c0_i32_140 = arith.constant 0 : i32
    %121 = arith.cmpi ne, %120, %c0_i32_140 : i32
    scf.if %121 {
      %c0_213 = arith.constant 0 : index
      %c0_214 = arith.constant 0 : index
      %c0_215 = arith.constant 0 : index
      %180 = vector.load %arg11[%c0_213, %c0_214, %c0_215] : memref<6x18x128xf32, #tpu.memory_space<vmem>>, vector<1x18x128xf32>
      tpu.vector_store %arg11[%c0_213, %c0_214, %c0_215], %118 {strides = array<i32>} : memref<6x18x128xf32, #tpu.memory_space<vmem>>, vector<1x18x128xf32>,
    } else {
    }
    %c3_i32 = arith.constant 3 : i32
    %122 = arith.cmpi eq, %arg1, %c3_i32 : i32
    %123 = arith.extui %122 : i1 to i32
    %c0_i32_141 = arith.constant 0 : i32
    %124 = arith.cmpi ne, %123, %c0_i32_141 : i32
    scf.if %124 {
      %c5_213 = arith.constant 5 : index
      %c0_214 = arith.constant 0 : index
      %c0_215 = arith.constant 0 : index
      %180 = vector.load %arg11[%c5_213, %c0_214, %c0_215] : memref<6x18x128xf32, #tpu.memory_space<vmem>>, vector<1x18x128xf32>
      tpu.vector_store %arg11[%c5_213, %c0_214, %c0_215], %118 {strides = array<i32>} : memref<6x18x128xf32, #tpu.memory_space<vmem>>, vector<1x18x128xf32>,
    } else {
    }
    %cst_142 = arith.constant 0.000000e+00 : f32
    %125 = vector.broadcast %cst_142 : f32 to vector<4x16x128xf32>
    %c0_143 = arith.constant 0 : index
    %c0_144 = arith.constant 0 : index
    %c0_145 = arith.constant 0 : index
    %126 = vector.load %arg11[%c0_143, %c0_144, %c0_145] : memref<6x18x128xf32, #tpu.memory_space<vmem>>, vector<4x16x128xf32>
    %c0_146 = arith.constant 0 : index
    %c0_147 = arith.constant 0 : index
    %c0_148 = arith.constant 0 : index
    %127 = vector.load %arg6[%c0_146, %c0_147, %c0_148] : memref<9x128x128xf32, #tpu.memory_space<vmem>>, vector<1x128x128xf32>
    %128 = vector.shape_cast %127 : vector<1x128x128xf32> to vector<128x128xf32>
    "tpu.trace_start"() <{level = 10 : i32, message = "hwc,co->hwo"}> : () -> ()
    %cst_149 = arith.constant dense<0.000000e+00> : vector<4x16x128xf32>
    %129 = tpu.matmul %126, %128, %cst_149 {dimension_numbers = #tpu.dot_dimension_numbers<[2], [0], [0, 1], [1], [0, 0, 0, 1, 1, 1], [], []>} : vector<4x16x128xf32>, vector<128x128xf32>, vector<4x16x128xf32> -> vector<4x16x128xf32>
    "tpu.trace_stop"() : () -> ()
    %130 = arith.addf %125, %129 : vector<4x16x128xf32>
    %c0_150 = arith.constant 0 : index
    %c1_151 = arith.constant 1 : index
    %c0_152 = arith.constant 0 : index
    %131 = vector.load %arg11[%c0_150, %c1_151, %c0_152] : memref<6x18x128xf32, #tpu.memory_space<vmem>>, vector<4x16x128xf32>
    %c1_153 = arith.constant 1 : index
    %c0_154 = arith.constant 0 : index
    %c0_155 = arith.constant 0 : index
    %132 = vector.load %arg6[%c1_153, %c0_154, %c0_155] : memref<9x128x128xf32, #tpu.memory_space<vmem>>, vector<1x128x128xf32>
    %133 = vector.shape_cast %132 : vector<1x128x128xf32> to vector<128x128xf32>
    "tpu.trace_start"() <{level = 10 : i32, message = "hwc,co->hwo"}> : () -> ()
    %cst_156 = arith.constant dense<0.000000e+00> : vector<4x16x128xf32>
    %134 = tpu.matmul %131, %133, %cst_156 {dimension_numbers = #tpu.dot_dimension_numbers<[2], [0], [0, 1], [1], [0, 0, 0, 1, 1, 1], [], []>} : vector<4x16x128xf32>, vector<128x128xf32>, vector<4x16x128xf32> -> vector<4x16x128xf32>
    "tpu.trace_stop"() : () -> ()
    %135 = arith.addf %130, %134 : vector<4x16x128xf32>
    %c0_157 = arith.constant 0 : index
    %c2_158 = arith.constant 2 : index
    %c0_159 = arith.constant 0 : index
    %136 = vector.load %arg11[%c0_157, %c2_158, %c0_159] : memref<6x18x128xf32, #tpu.memory_space<vmem>>, vector<4x16x128xf32>
    %c2_160 = arith.constant 2 : index
    %c0_161 = arith.constant 0 : index
    %c0_162 = arith.constant 0 : index
    %137 = vector.load %arg6[%c2_160, %c0_161, %c0_162] : memref<9x128x128xf32, #tpu.memory_space<vmem>>, vector<1x128x128xf32>
    %138 = vector.shape_cast %137 : vector<1x128x128xf32> to vector<128x128xf32>
    "tpu.trace_start"() <{level = 10 : i32, message = "hwc,co->hwo"}> : () -> ()
    %cst_163 = arith.constant dense<0.000000e+00> : vector<4x16x128xf32>
    %139 = tpu.matmul %136, %138, %cst_163 {dimension_numbers = #tpu.dot_dimension_numbers<[2], [0], [0, 1], [1], [0, 0, 0, 1, 1, 1], [], []>} : vector<4x16x128xf32>, vector<128x128xf32>, vector<4x16x128xf32> -> vector<4x16x128xf32>
    "tpu.trace_stop"() : () -> ()
    %140 = arith.addf %135, %139 : vector<4x16x128xf32>
    %c1_164 = arith.constant 1 : index
    %c0_165 = arith.constant 0 : index
    %c0_166 = arith.constant 0 : index
    %141 = vector.load %arg11[%c1_164, %c0_165, %c0_166] : memref<6x18x128xf32, #tpu.memory_space<vmem>>, vector<4x16x128xf32>
    %c3_167 = arith.constant 3 : index
    %c0_168 = arith.constant 0 : index
    %c0_169 = arith.constant 0 : index
    %142 = vector.load %arg6[%c3_167, %c0_168, %c0_169] : memref<9x128x128xf32, #tpu.memory_space<vmem>>, vector<1x128x128xf32>
    %143 = vector.shape_cast %142 : vector<1x128x128xf32> to vector<128x128xf32>
    "tpu.trace_start"() <{level = 10 : i32, message = "hwc,co->hwo"}> : () -> ()
    %cst_170 = arith.constant dense<0.000000e+00> : vector<4x16x128xf32>
    %144 = tpu.matmul %141, %143, %cst_170 {dimension_numbers = #tpu.dot_dimension_numbers<[2], [0], [0, 1], [1], [0, 0, 0, 1, 1, 1], [], []>} : vector<4x16x128xf32>, vector<128x128xf32>, vector<4x16x128xf32> -> vector<4x16x128xf32>
    "tpu.trace_stop"() : () -> ()
    %145 = arith.addf %140, %144 : vector<4x16x128xf32>
    %c1_171 = arith.constant 1 : index
    %c1_172 = arith.constant 1 : index
    %c0_173 = arith.constant 0 : index
    %146 = vector.load %arg11[%c1_171, %c1_172, %c0_173] : memref<6x18x128xf32, #tpu.memory_space<vmem>>, vector<4x16x128xf32>
    %c4_174 = arith.constant 4 : index
    %c0_175 = arith.constant 0 : index
    %c0_176 = arith.constant 0 : index
    %147 = vector.load %arg6[%c4_174, %c0_175, %c0_176] : memref<9x128x128xf32, #tpu.memory_space<vmem>>, vector<1x128x128xf32>
    %148 = vector.shape_cast %147 : vector<1x128x128xf32> to vector<128x128xf32>
    "tpu.trace_start"() <{level = 10 : i32, message = "hwc,co->hwo"}> : () -> ()
    %cst_177 = arith.constant dense<0.000000e+00> : vector<4x16x128xf32>
    %149 = tpu.matmul %146, %148, %cst_177 {dimension_numbers = #tpu.dot_dimension_numbers<[2], [0], [0, 1], [1], [0, 0, 0, 1, 1, 1], [], []>} : vector<4x16x128xf32>, vector<128x128xf32>, vector<4x16x128xf32> -> vector<4x16x128xf32>
    "tpu.trace_stop"() : () -> ()
    %150 = arith.addf %145, %149 : vector<4x16x128xf32>
    %c1_178 = arith.constant 1 : index
    %c2_179 = arith.constant 2 : index
    %c0_180 = arith.constant 0 : index
    %151 = vector.load %arg11[%c1_178, %c2_179, %c0_180] : memref<6x18x128xf32, #tpu.memory_space<vmem>>, vector<4x16x128xf32>
    %c5_181 = arith.constant 5 : index
    %c0_182 = arith.constant 0 : index
    %c0_183 = arith.constant 0 : index
    %152 = vector.load %arg6[%c5_181, %c0_182, %c0_183] : memref<9x128x128xf32, #tpu.memory_space<vmem>>, vector<1x128x128xf32>
    %153 = vector.shape_cast %152 : vector<1x128x128xf32> to vector<128x128xf32>
    "tpu.trace_start"() <{level = 10 : i32, message = "hwc,co->hwo"}> : () -> ()
    %cst_184 = arith.constant dense<0.000000e+00> : vector<4x16x128xf32>
    %154 = tpu.matmul %151, %153, %cst_184 {dimension_numbers = #tpu.dot_dimension_numbers<[2], [0], [0, 1], [1], [0, 0, 0, 1, 1, 1], [], []>} : vector<4x16x128xf32>, vector<128x128xf32>, vector<4x16x128xf32> -> vector<4x16x128xf32>
    "tpu.trace_stop"() : () -> ()
    %155 = arith.addf %150, %154 : vector<4x16x128xf32>
    %c2_185 = arith.constant 2 : index
    %c0_186 = arith.constant 0 : index
    %c0_187 = arith.constant 0 : index
    %156 = vector.load %arg11[%c2_185, %c0_186, %c0_187] : memref<6x18x128xf32, #tpu.memory_space<vmem>>, vector<4x16x128xf32>
    %c6_188 = arith.constant 6 : index
    %c0_189 = arith.constant 0 : index
    %c0_190 = arith.constant 0 : index
    %157 = vector.load %arg6[%c6_188, %c0_189, %c0_190] : memref<9x128x128xf32, #tpu.memory_space<vmem>>, vector<1x128x128xf32>
    %158 = vector.shape_cast %157 : vector<1x128x128xf32> to vector<128x128xf32>
    "tpu.trace_start"() <{level = 10 : i32, message = "hwc,co->hwo"}> : () -> ()
    %cst_191 = arith.constant dense<0.000000e+00> : vector<4x16x128xf32>
    %159 = tpu.matmul %156, %158, %cst_191 {dimension_numbers = #tpu.dot_dimension_numbers<[2], [0], [0, 1], [1], [0, 0, 0, 1, 1, 1], [], []>} : vector<4x16x128xf32>, vector<128x128xf32>, vector<4x16x128xf32> -> vector<4x16x128xf32>
    "tpu.trace_stop"() : () -> ()
    %160 = arith.addf %155, %159 : vector<4x16x128xf32>
    %c2_192 = arith.constant 2 : index
    %c1_193 = arith.constant 1 : index
    %c0_194 = arith.constant 0 : index
    %161 = vector.load %arg11[%c2_192, %c1_193, %c0_194] : memref<6x18x128xf32, #tpu.memory_space<vmem>>, vector<4x16x128xf32>
    %c7_195 = arith.constant 7 : index
    %c0_196 = arith.constant 0 : index
    %c0_197 = arith.constant 0 : index
    %162 = vector.load %arg6[%c7_195, %c0_196, %c0_197] : memref<9x128x128xf32, #tpu.memory_space<vmem>>, vector<1x128x128xf32>
    %163 = vector.shape_cast %162 : vector<1x128x128xf32> to vector<128x128xf32>
    "tpu.trace_start"() <{level = 10 : i32, message = "hwc,co->hwo"}> : () -> ()
    %cst_198 = arith.constant dense<0.000000e+00> : vector<4x16x128xf32>
    %164 = tpu.matmul %161, %163, %cst_198 {dimension_numbers = #tpu.dot_dimension_numbers<[2], [0], [0, 1], [1], [0, 0, 0, 1, 1, 1], [], []>} : vector<4x16x128xf32>, vector<128x128xf32>, vector<4x16x128xf32> -> vector<4x16x128xf32>
    "tpu.trace_stop"() : () -> ()
    %165 = arith.addf %160, %164 : vector<4x16x128xf32>
    %c2_199 = arith.constant 2 : index
    %c2_200 = arith.constant 2 : index
    %c0_201 = arith.constant 0 : index
    %166 = vector.load %arg11[%c2_199, %c2_200, %c0_201] : memref<6x18x128xf32, #tpu.memory_space<vmem>>, vector<4x16x128xf32>
    %c8_202 = arith.constant 8 : index
    %c0_203 = arith.constant 0 : index
    %c0_204 = arith.constant 0 : index
    %167 = vector.load %arg6[%c8_202, %c0_203, %c0_204] : memref<9x128x128xf32, #tpu.memory_space<vmem>>, vector<1x128x128xf32>
    %168 = vector.shape_cast %167 : vector<1x128x128xf32> to vector<128x128xf32>
    "tpu.trace_start"() <{level = 10 : i32, message = "hwc,co->hwo"}> : () -> ()
    %cst_205 = arith.constant dense<0.000000e+00> : vector<4x16x128xf32>
    %169 = tpu.matmul %166, %168, %cst_205 {dimension_numbers = #tpu.dot_dimension_numbers<[2], [0], [0, 1], [1], [0, 0, 0, 1, 1, 1], [], []>} : vector<4x16x128xf32>, vector<128x128xf32>, vector<4x16x128xf32> -> vector<4x16x128xf32>
    "tpu.trace_stop"() : () -> ()
    %170 = arith.addf %165, %169 : vector<4x16x128xf32>
    %c0_206 = arith.constant 0 : index
    %c0_207 = arith.constant 0 : index
    %171 = vector.load %arg7[%c0_206, %c0_207] : memref<1x128xf32, #tpu.memory_space<vmem>>, vector<1x128xf32>
    %172 = vector.shape_cast %171 : vector<1x128xf32> to vector<1x1x128xf32>
    %173 = vector.broadcast %172 : vector<1x1x128xf32> to vector<4x16x128xf32>
    %174 = arith.addf %170, %173 : vector<4x16x128xf32>
    %cst_208 = arith.constant 0.000000e+00 : f32
    %175 = vector.broadcast %cst_208 : f32 to vector<4x16x128xf32>
    %176 = arith.maximumf %174, %175 : vector<4x16x128xf32>
    %c0_209 = arith.constant 0 : index
    %c0_210 = arith.constant 0 : index
    %c0_211 = arith.constant 0 : index
    %c0_212 = arith.constant 0 : index
    %177 = vector.load %arg8[%c0_209, %c0_210, %c0_211, %c0_212] : memref<1x4x16x128xf32, #tpu.memory_space<vmem>>, vector<1x4x16x128xf32>
    %178 = vector.shape_cast %177 : vector<1x4x16x128xf32> to vector<4x16x128xf32>
    %179 = vector.shape_cast %176 : vector<4x16x128xf32> to vector<1x4x16x128xf32>
    tpu.vector_store %arg8[%c0_209, %c0_210, %c0_211, %c0_212], %179 {strides = array<i32>} : memref<1x4x16x128xf32, #tpu.memory_space<vmem>>, vector<1x4x16x128xf32>,
    return
  }
  func.func @transform_2(%arg0: i32, %arg1: i32) -> (i32, i32, i32) {
    %c0_i32 = arith.constant 0 : i32
    %c0_i32_0 = arith.constant 0 : i32
    %c0_i32_1 = arith.constant 0 : i32
    %c0_i32_2 = arith.constant 0 : i32
    return %c0_i32, %c0_i32_0, %c0_i32_1 : i32, i32, i32
  }
  func.func @transform_3(%arg0: i32, %arg1: i32) -> (i32, i32) {
    %c0_i32 = arith.constant 0 : i32
    %c0_i32_0 = arith.constant 0 : i32
    %c0_i32_1 = arith.constant 0 : i32
    return %c0_i32, %c0_i32_0 : i32, i32
  }
  func.func @transform_4(%arg0: i32, %arg1: i32) -> (i32, i32, i32) {
    %c0_i32 = arith.constant 0 : i32
    %c0_i32_0 = arith.constant 0 : i32
    %c0_i32_1 = arith.constant 0 : i32
    %c0_i32_2 = arith.constant 0 : i32
    return %c0_i32, %c0_i32_0, %c0_i32_1 : i32, i32, i32
  }
  func.func @transform_5(%arg0: i32, %arg1: i32) -> (i32, i32) {
    %c0_i32 = arith.constant 0 : i32
    %c0_i32_0 = arith.constant 0 : i32
    %c0_i32_1 = arith.constant 0 : i32
    return %c0_i32, %c0_i32_0 : i32, i32
  }
  func.func @transform_6(%arg0: i32, %arg1: i32) -> (i32, i32, i32, i32) {
    %c0_i32 = arith.constant 0 : i32
    %c0_i32_0 = arith.constant 0 : i32
    %c0_i32_1 = arith.constant 0 : i32
    return %arg0, %arg1, %c0_i32, %c0_i32_0 : i32, i32, i32, i32
  }
}

</mosaic_0001>

<bundles_post_ra>
// kernel: upconv_block_fwd.1
= control target key start
LH: loop header
LB: loop body
LE: loop exit
PB: predicated region body
PF: predicated region fallthrough
CT: control target
= control target key end

     0   :  { %s8562_s21 = smov 0   ;;  %s8564_s22 = smov 0   ;;  %s10498_s0 = inlined_call_operand.vmem [shape: f32[2,20,18,128], index: 0, kind: input, shape index: {}]   ;;  %s10499_s1 = inlined_call_operand.vmem [shape: f32[2,20,18,128], index: 1, kind: input, shape index: {}]   ;;  %s10500_s2 = inlined_call_operand.vmem [shape: f32[9,256,128], index: 2, kind: input, shape index: {}]   ;;  %s10501_s3 = inlined_call_operand.vmem [shape: f32[1,128], index: 3, kind: input, shape index: {}]   ;;  %s10502_s4 = inlined_call_operand.vmem [shape: f32[9,128,128], index: 4, kind: input, shape index: {}]   ;;  %s10503_s5 = inlined_call_operand.vmem [shape: f32[1,128], index: 5, kind: input, shape index: {}]   ;;  %s10504_s6 = inlined_call_operand.vmem [shape: f32[2,16,16,128], index: 6, kind: output, shape index: {}]  }
   0x1   :  { %s8566_s23 = smov 0   ;;  %s8568_s24 = smov 0  }
   0x2   :  { %s8570_s25 = smov 0  }
   0x3 LB: > { %s25_s26 = sadd.s32 1, %s8514_s23  ;;  %s28_s27 = sadd.s32 1, %s8518_s24  ;;  %s8522_s25 = sphi %s8570_s25, %s16_s25   ;;  %s8518_s24 = sphi %s8568_s24, %s10508_s24   ;;  %s8514_s23 = sphi %s8566_s23, %s10507_s23   ;;  %s8510_s22 = sphi %s8564_s22, %s10506_s22   ;;  %s8506_s21 = sphi %s8562_s21, %s10505_s21  }
   0x4   : > { %p26_p0 = scmp.ge.s32.totalorder %s25_s26, 4  ;;  %p4858_p1 = scmp.ge.s32.totalorder %s8522_s25, 1 }
   0x5   : > { %p168_p2 = scmp.lt.s32.totalorder %s8522_s25, 9 }
   0x6   : > { %s10510_s26 = smov (%p26_p0, %s25_s26), 0  ;;  %s10512_s27 = smov (!%p26_p0, %s28_s27), %s8518_s24 }
   0x7   : > { %p169_p3 = pnand %p4858_p1, %p168_p2  ;;  %p30_p4 = scmp.ge.s32.totalorder %s10512_s27, 2 }
   0x8   : > { %s4859_s28 = sshll.u32 (!%p169_p3), %s8506_s21, 2  ;;  %p195_p5 = scmp.lt.s32.totalorder (!%p169_p3), %s8510_s22, 1 }
   0x9   : > { %s10514_s27 = smov (%p30_p4, %s10512_s27), 0  ;;  %172 = sbr.rel (%p169_p3) target bundleno = 1502 (0x5de), region = 36 }
   0xa   : > { %p197_p6 = scmp.lt.s32.totalorder (!%p169_p3), %s4859_s28, 15  ;;  %s4864_s29 = smul.u32 (!%p169_p3), 96, %s8506_s21 }
   0xb   : > { %s207_s8 = smul.u32 (!%p169_p3), 480, %s8510_s22 }
   0xd   : > { %s8596_s11 = sadd.s32 (!%p169_p3), %s4864_s29, %s207_s8 }
   0xe   : > { %s8602_s15 = scalar_lea.vmem (!%p169_p3), %s10498_s0, %s8596_s11 }
   0xf   : > { %v261_v0 = vld [vmem:[%s8602_s15] sm:$0xff] (!%p169_p3)  ;;  %v263_v1 = vld [vmem:[%s8602_s15 + $0x8] sm:$0xff] (!%p169_p3)  ;;  %v265_v2 = vld [vmem:[%s8602_s15 + $0x18] sm:$0xff] (!%p169_p3) }
  0x10   : > { %s196_s30 = scalar_select %p195_p5, %s8510_s22, 1  ;;  %262 = vst [vmem:[#allocation2] sm:$0xff] %v261_v0  ;;  %264 = vst [vmem:[#allocation2 + $0x8] sm:$0xff] %v263_v1  ;;  %v267_v3 = vld [vmem:[%s8602_s15 + $0x20] sm:$0xff]  ;;  %v269_v4 = vld [vmem:[%s8602_s15 + $0x30] sm:$0xff] }
  0x11   : > { %s10516_s28 = smov (!%p197_p6, %s4859_s28), 15  ;;  %266 = vst [vmem:[#allocation2 + $0x18] sm:$0xff] %v265_v2  ;;  %v271_v5 = vld [vmem:[%s8602_s15 + $0x38] sm:$0xff]  ;;  %268 = vst [vmem:[#allocation2 + $0x20] sm:$0xff] %v267_v3  ;;  %v273_v6 = vld [vmem:[%s8602_s15 + $0x48] sm:$0xff] }
  0x12   : > { %s4861_s7 = sshll.u32 %s196_s30, 5  ;;  %s4860_s9 = sshll.u32 %s10516_s28, 1  ;;  %270 = vst [vmem:[#allocation2 + $0x30] sm:$0xff] %v269_v4  ;;  %272 = vst [vmem:[#allocation2 + $0x38] sm:$0xff] %v271_v5  ;;  %v275_v7 = vld [vmem:[%s8602_s15 + $0x50] sm:$0xff]  ;;  %v277_v8 = vld [vmem:[%s8602_s15 + $0x60] sm:$0xff] }
  0x13   : > { %s201_s10 = sadd.s32 %s4861_s7, %s4860_s9  ;;  %274 = vst [vmem:[#allocation2 + $0x48] sm:$0xff] %v273_v6  ;;  %276 = vst [vmem:[#allocation2 + $0x50] sm:$0xff] %v275_v7  ;;  %v279_v9 = vld [vmem:[%s8602_s15 + $0x68] sm:$0xff]  ;;  %v281_v10 = vld [vmem:[%s8602_s15 + $0x78] sm:$0xff] }
  0x14   : > { %s4862_s12 = sshll.u32 %s201_s10, 3  ;;  %278 = vst [vmem:[#allocation2 + $0x60] sm:$0xff] %v277_v8  ;;  %v283_v11 = vld [vmem:[%s8602_s15 + $0x80] sm:$0xff]  ;;  %280 = vst [vmem:[#allocation2 + $0x68] sm:$0xff] %v279_v9  ;;  %v285_v12 = vld [vmem:[%s8602_s15 + $0x90] sm:$0xff] }
  0x15   : > { %s8607_s18 = scalar_lea.vmem %s10504_s6, %s4862_s12  ;;  %282 = vst [vmem:[#allocation2 + $0x78] sm:$0xff] %v281_v10  ;;  %284 = vst [vmem:[#allocation2 + $0x80] sm:$0xff] %v283_v11  ;;  %v287_v13 = vld [vmem:[%s8602_s15 + $0x98] sm:$0xff]  ;;  %v289_v14 = vld [vmem:[%s8602_s15 + $0xa8] sm:$0xff] }
  0x16   : > { %286 = vst [vmem:[#allocation2 + $0x90] sm:$0xff] %v285_v12  ;;  %288 = vst [vmem:[#allocation2 + $0x98] sm:$0xff] %v287_v13  ;;  %v291_v15 = vld [vmem:[%s8602_s15 + $0xb0] sm:$0xff]  ;;  %v4866_v17 = vld [vmem:[%s8602_s15 + $0x28] sm:$0x3] }
  0x17   : > { %290 = vst [vmem:[#allocation2 + $0xa8] sm:$0xff] %v289_v14  ;;  %v4865_v16 = vld [vmem:[%s8602_s15 + $0x10] sm:$0x3]  ;;  %292 = vst [vmem:[#allocation2 + $0xb0] sm:$0xff] %v291_v15  ;;  %v4867_v18 = vld [vmem:[%s8602_s15 + $0x40] sm:$0x3] }
  0x18   : > { %303 = vst [vmem:[#allocation2 + $0x10] sm:$0x3] %v4865_v16  ;;  %305 = vst [vmem:[#allocation2 + $0x28] sm:$0x3] %v4866_v17  ;;  %v4868_v19 = vld [vmem:[%s8602_s15 + $0x58] sm:$0x3] }
  0x19   : > { %v4869_v20 = vld [vmem:[%s8602_s15 + $0x70] sm:$0x3]  ;;  %307 = vst [vmem:[#allocation2 + $0x40] sm:$0x3] %v4867_v18  ;;  %309 = vst [vmem:[#allocation2 + $0x58] sm:$0x3] %v4868_v19 }
  0x1a   : > { %311 = vst [vmem:[#allocation2 + $0x70] sm:$0x3] %v4869_v20  ;;  %v4870_v21 = vld [vmem:[%s8602_s15 + $0x88] sm:$0x3]  ;;  %v4871_v22 = vld [vmem:[%s8602_s15 + $0xa0] sm:$0x3] }
  0x1b   : > { %v4872_v23 = vld [vmem:[%s8602_s15 + $0xb8] sm:$0x3]  ;;  %313 = vst [vmem:[#allocation2 + $0x88] sm:$0x3] %v4870_v21  ;;  %315 = vst [vmem:[#allocation2 + $0xa0] sm:$0x3] %v4871_v22 }
  0x1c   : > { %317 = vst [vmem:[#allocation2 + $0xb8] sm:$0x3] %v4872_v23 }
  0x1d   : > { %321 = vsyncadd [#allocation5], 2304  ;;  %s8637_s22 = scalar_lea.vmem %s10499_s1, %s8596_s11 }
  0x1e   : > { %v375_v24 = vld [vmem:[%s8637_s22] sm:$0xff]  ;;  %v377_v25 = vld [vmem:[%s8637_s22 + $0x8] sm:$0xff]  ;;  %v379_v26 = vld [vmem:[%s8637_s22 + $0x18] sm:$0xff] }
  0x1f   : > { %376 = vst [vmem:[#allocation3] sm:$0xff] %v375_v24  ;;  %378 = vst [vmem:[#allocation3 + $0x8] sm:$0xff] %v377_v25  ;;  %v381_v27 = vld [vmem:[%s8637_s22 + $0x20] sm:$0xff]  ;;  %v383_v28 = vld [vmem:[%s8637_s22 + $0x30] sm:$0xff] }
  0x20   : > { %380 = vst [vmem:[#allocation3 + $0x18] sm:$0xff] %v379_v26  ;;  %v385_v29 = vld [vmem:[%s8637_s22 + $0x38] sm:$0xff]  ;;  %382 = vst [vmem:[#allocation3 + $0x20] sm:$0xff] %v381_v27  ;;  %v387_v30 = vld [vmem:[%s8637_s22 + $0x48] sm:$0xff] }
  0x21   : > { %384 = vst [vmem:[#allocation3 + $0x30] sm:$0xff] %v383_v28  ;;  %386 = vst [vmem:[#allocation3 + $0x38] sm:$0xff] %v385_v29  ;;  %v389_v31 = vld [vmem:[%s8637_s22 + $0x50] sm:$0xff]  ;;  %v391_v32 = vld [vmem:[%s8637_s22 + $0x60] sm:$0xff] }
  0x22   : > { %388 = vst [vmem:[#allocation3 + $0x48] sm:$0xff] %v387_v30  ;;  %390 = vst [vmem:[#allocation3 + $0x50] sm:$0xff] %v389_v31  ;;  %v393_v33 = vld [vmem:[%s8637_s22 + $0x68] sm:$0xff]  ;;  %v395_v34 = vld [vmem:[%s8637_s22 + $0x78] sm:$0xff] }
  0x23   : > { %392 = vst [vmem:[#allocation3 + $0x60] sm:$0xff] %v391_v32  ;;  %v397_v35 = vld [vmem:[%s8637_s22 + $0x80] sm:$0xff]  ;;  %394 = vst [vmem:[#allocation3 + $0x68] sm:$0xff] %v393_v33  ;;  %v399_v36 = vld [vmem:[%s8637_s22 + $0x90] sm:$0xff] }
  0x24   : > { %396 = vst [vmem:[#allocation3 + $0x78] sm:$0xff] %v395_v34  ;;  %398 = vst [vmem:[#allocation3 + $0x80] sm:$0xff] %v397_v35  ;;  %v401_v37 = vld [vmem:[%s8637_s22 + $0x98] sm:$0xff]  ;;  %v403_v38 = vld [vmem:[%s8637_s22 + $0xa8] sm:$0xff] }
  0x25   : > { %400 = vst [vmem:[#allocation3 + $0x90] sm:$0xff] %v399_v36  ;;  %402 = vst [vmem:[#allocation3 + $0x98] sm:$0xff] %v401_v37  ;;  %v405_v39 = vld [vmem:[%s8637_s22 + $0xb0] sm:$0xff]  ;;  %v4874_v41 = vld [vmem:[%s8637_s22 + $0x28] sm:$0x3] }
  0x26   : > { %404 = vst [vmem:[#allocation3 + $0xa8] sm:$0xff] %v403_v38  ;;  %v4873_v40 = vld [vmem:[%s8637_s22 + $0x10] sm:$0x3]  ;;  %406 = vst [vmem:[#allocation3 + $0xb0] sm:$0xff] %v405_v39  ;;  %v4875_v42 = vld [vmem:[%s8637_s22 + $0x40] sm:$0x3] }
  0x27   : > { %417 = vst [vmem:[#allocation3 + $0x10] sm:$0x3] %v4873_v40  ;;  %419 = vst [vmem:[#allocation3 + $0x28] sm:$0x3] %v4874_v41  ;;  %v4876_v43 = vld [vmem:[%s8637_s22 + $0x58] sm:$0x3] }
  0x28   : > { %v4877_v44 = vld [vmem:[%s8637_s22 + $0x70] sm:$0x3]  ;;  %421 = vst [vmem:[#allocation3 + $0x40] sm:$0x3] %v4875_v42  ;;  %423 = vst [vmem:[#allocation3 + $0x58] sm:$0x3] %v4876_v43 }
  0x29   : > { %425 = vst [vmem:[#allocation3 + $0x70] sm:$0x3] %v4877_v44  ;;  %v4878_v45 = vld [vmem:[%s8637_s22 + $0x88] sm:$0x3]  ;;  %v4879_v46 = vld [vmem:[%s8637_s22 + $0xa0] sm:$0x3] }
  0x2a   : > { %v4880_v47 = vld [vmem:[%s8637_s22 + $0xb8] sm:$0x3]  ;;  %427 = vst [vmem:[#allocation3 + $0x88] sm:$0x3] %v4878_v45  ;;  %429 = vst [vmem:[#allocation3 + $0xa0] sm:$0x3] %v4879_v46 }
  0x2b   : > { %431 = vst [vmem:[#allocation3 + $0xb8] sm:$0x3] %v4880_v47 }
  0x2c   : > { %435 = vsyncadd [#allocation5 + $0x1], 2304  ;;  %v8524_v48 = vmov 0.0  }
  0x2d   : > { %436 = vst [vmem:[#allocation4] sm:$0x1] %v8524_v48  ;;  %437 = vst [vmem:[#allocation4 + $0x18] sm:$0x1] %v8524_v48 }
  0x2e   : > { %438 = vst [vmem:[#allocation4 + $0x30] sm:$0x1] %v8524_v48  ;;  %439 = vst [vmem:[#allocation4 + $0x48] sm:$0x1] %v8524_v48 }
  0x2f   : > { %440 = vst [vmem:[#allocation4 + $0x60] sm:$0x1] %v8524_v48  ;;  %441 = vst [vmem:[#allocation4 + $0x78] sm:$0x1] %v8524_v48 }
  0x30   : > { %442 = vst [vmem:[#allocation4 + $0x11] sm:$0x1] %v8524_v48  ;;  %443 = vst [vmem:[#allocation4 + $0x29] sm:$0x1] %v8524_v48 }
  0x31   : > { %444 = vst [vmem:[#allocation4 + $0x41] sm:$0x1] %v8524_v48  ;;  %445 = vst [vmem:[#allocation4 + $0x59] sm:$0x1] %v8524_v48 }
  0x32   : > { %446 = vst [vmem:[#allocation4 + $0x71] sm:$0x1] %v8524_v48  ;;  %447 = vst [vmem:[#allocation4 + $0x89] sm:$0x1] %v8524_v48 }
  0x33   : > { %8500 = dma.done.wait [#allocation5], 2304 }
  0x34   : > { %8501 = vsyncadd [#allocation5], 4294964992  ;;  %v4881_v49 = vld [vmem:[%s10500_s2 + $0x100] sm:$0xff]  ;;  %v4882_v50 = vld [vmem:[%s10500_s2 + $0x108] sm:$0xff] }
  0x35   : > { %v4883_v51 = vld [vmem:[%s10500_s2 + $0x110] sm:$0xff]  ;;  %v7289_v52 = vpack.c.bf16 %v4882_v50, %v4881_v49  ;;  %v4884_v53 = vld [vmem:[%s10500_s2 + $0x118] sm:$0xff]  ;;  %v4885_v55 = vld [vmem:[%s10500_s2 + $0x120] sm:$0xff] }
  0x36   : > { %v7293_v54 = vpack.c.bf16 %v4884_v53, %v4883_v51  ;;  %v4886_v56 = vld [vmem:[%s10500_s2 + $0x128] sm:$0xff]  ;;  %v4887_v59 = vld [vmem:[%s10500_s2 + $0x130] sm:$0xff]  ;;  %v4888_v60 = vld [vmem:[%s10500_s2 + $0x138] sm:$0xff] }
  0x37   : > { %7290 = vmatprep.subr.bf16.mxu1 %v7289_v52  ;;  %v7297_v57 = vpack.c.bf16 %v4886_v56, %v4885_v55  ;;  %v480_v58 = vld [vmem:[#allocation2 + $0x1] sm:$0xff]  ;;  %v7301_v61 = vpack.c.bf16 %v4888_v60, %v4887_v59  ;;  %v4891_v1 = vld [vmem:[%s10500_s2 + $0x150] sm:$0xff]  ;;  %v4892_v2 = vld [vmem:[%s10500_s2 + $0x158] sm:$0xff] }
  0x38   : > { %7292 = vmatpush3.bf16.msra.mxu1 %v7289_v52  ;;  %6025 = vmatprep.mubr.f32.mxu1 %v480_v58  ;;  %v4889_v62 = vld [vmem:[%s10500_s2 + $0x140] sm:$0xff]  ;;  %v4890_v63 = vld [vmem:[%s10500_s2 + $0x148] sm:$0xff]  ;;  %v7309_v3 = vpack.c.bf16 %v4892_v2, %v4891_v1  ;;  %v4895_v7 = vld [vmem:[%s10500_s2 + $0x170] sm:$0xff] }
  0x39   : > { %7294 = vmatprep.subr.bf16.mxu1 %v7293_v54  ;;  %v7305_v0 = vpack.c.bf16 %v4890_v63, %v4889_v62  ;;  %v4893_v4 = vld [vmem:[%s10500_s2 + $0x160] sm:$0xff]  ;;  %v4894_v5 = vld [vmem:[%s10500_s2 + $0x168] sm:$0xff]  ;;  %v4896_v8 = vld [vmem:[%s10500_s2 + $0x178] sm:$0xff] }
  0x3a   : > { %v7313_v6 = vpack.c.bf16 %v4894_v5, %v4893_v4  ;;  %v7317_v9 = vpack.c.bf16 %v4896_v8, %v4895_v7  ;;  %v464_v10 = vld [vmem:[%s10500_s2] sm:$0xff]  ;;  %v465_v11 = vld [vmem:[%s10500_s2 + $0x8] sm:$0xff]  ;;  %v466_v14 = vld [vmem:[%s10500_s2 + $0x10] sm:$0xff] }
  0x3b   : > { %v8717_v12 = vld [vmem:[#allocation2 + $0x1a] sm:$0xff]  ;;  %v7321_v13 = vpack.c.bf16 %v465_v11, %v464_v10  ;;  %v481_v16 = vld [vmem:[#allocation2 + $0x9] sm:$0xff]  ;;  %v8737_v23 = vld [vmem:[#allocation2 + $0x31] sm:$0xff] }
  0x3c   : > { %7296 = vmatpush3.bf16.msra.mxu1 %v7293_v54  ;;  %6275 = vmatprep.mubr.f32.mxu0 %v8717_v12  ;;  %v467_v15 = vld [vmem:[%s10500_s2 + $0x18] sm:$0xff]  ;;  %v468_v19 = vld [vmem:[%s10500_s2 + $0x20] sm:$0xff]  ;;  %v469_v20 = vld [vmem:[%s10500_s2 + $0x28] sm:$0xff] }
  0x3d   : > { %7298 = vmatprep.subr.bf16.mxu1 %v7297_v57  ;;  %v7325_v17 = vpack.c.bf16 %v467_v15, %v466_v14  ;;  %v8726_v18 = vld [vmem:[#allocation2 + $0x19] sm:$0xff]  ;;  %v8735_v21 = vld [vmem:[#allocation2 + $0x21] sm:$0xff]  ;;  %v7329_v22 = vpack.c.bf16 %v469_v20, %v468_v19  ;;  %v470_v24 = vld [vmem:[%s10500_s2 + $0x30] sm:$0xff] }
  0x3e   : > { %v471_v25 = vld [vmem:[%s10500_s2 + $0x38] sm:$0xff]  ;;  %v8749_v28 = vld [vmem:[#allocation2 + $0x49] sm:$0xff]  ;;  %v472_v29 = vld [vmem:[%s10500_s2 + $0x40] sm:$0xff] }
  0x3f   : > { %v8747_v26 = vld [vmem:[#allocation2 + $0x39] sm:$0xff]  ;;  %v7333_v27 = vpack.c.bf16 %v471_v25, %v470_v24  ;;  %v473_v30 = vld [vmem:[%s10500_s2 + $0x48] sm:$0xff]  ;;  %v8759_v31 = vld [vmem:[#allocation2 + $0x51] sm:$0xff] }
  0x40   : > { %7300 = vmatpush3.bf16.msra.mxu1 %v7297_v57  ;;  %v7337_v32 = vpack.c.bf16 %v473_v30, %v472_v29  ;;  %v8761_v33 = vld [vmem:[#allocation2 + $0x61] sm:$0xff]  ;;  %v474_v34 = vld [vmem:[%s10500_s2 + $0x50] sm:$0xff]  ;;  %v475_v35 = vld [vmem:[%s10500_s2 + $0x58] sm:$0xff] }
  0x41   : > { %7302 = vmatprep.subr.bf16.mxu1 %v7301_v61  ;;  %v8771_v36 = vld [vmem:[#allocation2 + $0x69] sm:$0xff]  ;;  %v7341_v37 = vpack.c.bf16 %v475_v35, %v474_v34  ;;  %v8773_v38 = vld [vmem:[#allocation2 + $0x79] sm:$0xff]  ;;  %v8783_v41 = vld [vmem:[#allocation2 + $0x81] sm:$0xff] }
  0x42   : > { %v476_v39 = vld [vmem:[%s10500_s2 + $0x60] sm:$0xff]  ;;  %v477_v40 = vld [vmem:[%s10500_s2 + $0x68] sm:$0xff]  ;;  %v478_v44 = vld [vmem:[%s10500_s2 + $0x70] sm:$0xff] }
  0x43   : > { %v7345_v42 = vpack.c.bf16 %v477_v40, %v476_v39  ;;  %v452_v43 = vld [vmem:[#allocation2] sm:$0xff]  ;;  %v479_v45 = vld [vmem:[%s10500_s2 + $0x78] sm:$0xff]  ;;  %v4946_v47 = vld [vmem:[%s10500_s2 + $0x508] sm:$0xff] }
  0x44   : > { %7304 = vmatpush3.bf16.msra.mxu1 %v7301_v61  ;;  %v4945_v46 = vld [vmem:[%s10500_s2 + $0x500] sm:$0xff]  ;;  %v4947_v48 = vld [vmem:[%s10500_s2 + $0x510] sm:$0xff]  ;;  %v4948_v50 = vld [vmem:[%s10500_s2 + $0x518] sm:$0xff]  ;;  %v7349_v51 = vpack.c.bf16 %v479_v45, %v478_v44 }
  0x45   : > { %7306 = vmatprep.subr.bf16.mxu1 %v7305_v0  ;;  %v7449_v49 = vpack.c.bf16 %v4946_v47, %v4945_v46  ;;  %v7453_v52 = vpack.c.bf16 %v4948_v50, %v4947_v48  ;;  %v4949_v53 = vld [vmem:[%s10500_s2 + $0x520] sm:$0xff]  ;;  %v4950_v54 = vld [vmem:[%s10500_s2 + $0x528] sm:$0xff]  ;;  %v4899_v59 = vld [vmem:[%s10500_s2 + $0x210] sm:$0xff] }
  0x46   : > { %v4897_v55 = vld [vmem:[%s10500_s2 + $0x200] sm:$0xff]  ;;  %v4898_v56 = vld [vmem:[%s10500_s2 + $0x208] sm:$0xff]  ;;  %v7457_v57 = vpack.c.bf16 %v4950_v54, %v4949_v53  ;;  %v4900_v60 = vld [vmem:[%s10500_s2 + $0x218] sm:$0xff] }
  0x47   : > { %7450 = vmatprep.subr.bf16.mxu0 %v7449_v49  ;;  %v7353_v58 = vpack.c.bf16 %v4898_v56, %v4897_v55  ;;  %v4951_v61 = vld [vmem:[%s10500_s2 + $0x530] sm:$0xff]  ;;  %v4952_v62 = vld [vmem:[%s10500_s2 + $0x538] sm:$0xff]  ;;  %v453_v63 = vld [vmem:[#allocation2 + $0x8] sm:$0xff] }
  0x48   : > { %7308 = vmatpush3.bf16.msra.mxu1 %v7305_v0  ;;  %7452 = vmatpush3.bf16.msra.mxu0 %v7449_v49  ;;  %v7357_v0 = vpack.c.bf16 %v4900_v60, %v4899_v59  ;;  %v4901_v1 = vld [vmem:[%s10500_s2 + $0x220] sm:$0xff]  ;;  %v8831_v2 = vld [vmem:[#allocation2 + $0x18] sm:$0xff]  ;;  %v4902_v4 = vld [vmem:[%s10500_s2 + $0x228] sm:$0xff] }
  0x49   : > { %7310 = vmatprep.subr.bf16.mxu1 %v7309_v3  ;;  %7454 = vmatprep.subr.bf16.mxu0 %v7453_v52  ;;  %v4953_v5 = vld [vmem:[%s10500_s2 + $0x540] sm:$0xff]  ;;  %v7361_v8 = vpack.c.bf16 %v4902_v4, %v4901_v1  ;;  %v8848_v10 = vld [vmem:[#allocation2 + $0x30] sm:$0xff]  ;;  %v4956_v15 = vld [vmem:[%s10500_s2 + $0x558] sm:$0xff] }
  0x4a   : > { %v8843_v7 = vld [vmem:[#allocation2 + $0x20] sm:$0xff]  ;;  %v4955_v14 = vld [vmem:[%s10500_s2 + $0x550] sm:$0xff]  ;;  %v8866_v20 = vld [vmem:[#allocation2 + $0x48] sm:$0xff] }
  0x4b   : > { %v4905_v19 = vld [vmem:[%s10500_s2 + $0x240] sm:$0xff]  ;;  %v4906_v24 = vld [vmem:[%s10500_s2 + $0x248] sm:$0xff]  ;;  %v8879_v29 = vld [vmem:[#allocation2 + $0x50] sm:$0xff] }
  0x4c   : > { %7312 = vmatpush3.bf16.msra.mxu1 %v7309_v3  ;;  %7456 = vmatpush3.bf16.msra.mxu0 %v7453_v52  ;;  %v7461_v3 = vpack.c.bf16 %v4952_v62, %v4951_v61  ;;  %v4957_v25 = vld [vmem:[%s10500_s2 + $0x560] sm:$0xff]  ;;  %v7369_v30 = vpack.c.bf16 %v4906_v24, %v4905_v19  ;;  %v4959_v39 = vld [vmem:[%s10500_s2 + $0x570] sm:$0xff]  ;;  %v4960_v40 = vld [vmem:[%s10500_s2 + $0x578] sm:$0xff] }
  0x4d   : > { %7314 = vmatprep.subr.bf16.mxu1 %v7313_v6  ;;  %7458 = vmatprep.subr.bf16.mxu0 %v7457_v57  ;;  %v8884_v34 = vld [vmem:[#allocation2 + $0x60] sm:$0xff]  ;;  %v8902_v45 = vld [vmem:[#allocation2 + $0x78] sm:$0xff]  ;;  %v7477_v46 = vpack.c.bf16 %v4960_v40, %v4959_v39  ;;  %v4910_v47 = vld [vmem:[%s10500_s2 + $0x268] sm:$0xff] }
  0x4e   : > { %v4909_v44 = vld [vmem:[%s10500_s2 + $0x260] sm:$0xff]  ;;  %v4962_v49 = vld [vmem:[%s10500_s2 + $0x608] sm:$0xff]  ;;  %v4963_v54 = vld [vmem:[%s10500_s2 + $0x610] sm:$0xff] }
  0x4f   : > { %v4961_v48 = vld [vmem:[%s10500_s2 + $0x600] sm:$0xff]  ;;  %v4964_v55 = vld [vmem:[%s10500_s2 + $0x618] sm:$0xff]  ;;  %v4911_v56 = vld [vmem:[%s10500_s2 + $0x270] sm:$0xff] }
  0x50   : > { %7316 = vmatpush3.bf16.msra.mxu1 %v7313_v6  ;;  %v4954_v6 = vld [vmem:[%s10500_s2 + $0x548] sm:$0xff]  ;;  %7460 = vmatpush3.bf16.msra.mxu0 %v7457_v57  ;;  %v8915_v50 = vld [vmem:[#allocation2 + $0x80] sm:$0xff]  ;;  %v7481_v53 = vpack.c.bf16 %v4962_v49, %v4961_v48  ;;  %v4912_v57 = vld [vmem:[%s10500_s2 + $0x278] sm:$0xff] }
  0x51   : > { %7318 = vmatprep.subr.bf16.mxu1 %v7317_v9  ;;  %7462 = vmatprep.subr.bf16.mxu0 %v7461_v3  ;;  %v7465_v11 = vpack.c.bf16 %v4954_v6, %v4953_v5  ;;  %v759_v52 = vld [vmem:[#allocation2 + $0x2] sm:$0xff]  ;;  %v7381_v59 = vpack.c.bf16 %v4912_v57, %v4911_v56  ;;  %v8942_v1 = vld [vmem:[#allocation2 + $0x32] sm:$0xff] }
  0x52   : > { %v762_v60 = vld [vmem:[#allocation2 + $0x22] sm:$0xff]  ;;  %v4915_v5 = vld [vmem:[%s10500_s2 + $0x310] sm:$0xff]  ;;  %v4916_v6 = vld [vmem:[%s10500_s2 + $0x318] sm:$0xff] }
  0x53   : > { %v4965_v61 = vld [vmem:[%s10500_s2 + $0x620] sm:$0xff]  ;;  %v4966_v62 = vld [vmem:[%s10500_s2 + $0x628] sm:$0xff]  ;;  %v8966_v19 = vld [vmem:[#allocation2 + $0x52] sm:$0xff] }
  0x54   : > { %7320 = vmatpush3.bf16.msra.mxu1 %v7317_v9  ;;  %v4903_v9 = vld [vmem:[%s10500_s2 + $0x230] sm:$0xff]  ;;  %7464 = vmatpush3.bf16.msra.mxu0 %v7461_v3  ;;  %v7489_v3 = vpack.c.bf16 %v4966_v62, %v4965_v61  ;;  %v4918_v24 = vld [vmem:[%s10500_s2 + $0x328] sm:$0xff]  ;;  %v4920_v39 = vld [vmem:[%s10500_s2 + $0x338] sm:$0xff] }
  0x55   : > { %7322 = vmatprep.subr.bf16.mxu1 %v7321_v13  ;;  %7466 = vmatprep.subr.bf16.mxu0 %v7465_v11  ;;  %v4972_v40 = vld [vmem:[%s10500_s2 + $0x658] sm:$0xff]  ;;  %v4922_v48 = vld [vmem:[%s10500_s2 + $0x348] sm:$0xff]  ;;  %v4973_v49 = vld [vmem:[%s10500_s2 + $0x660] sm:$0xff] }
  0x56   : > { %v4924_v56 = vld [vmem:[%s10500_s2 + $0x358] sm:$0xff]  ;;  %v4975_v57 = vld [vmem:[%s10500_s2 + $0x670] sm:$0xff]  ;;  %v4925_v61 = vld [vmem:[%s10500_s2 + $0x360] sm:$0xff] }
  0x57   : > { %6026 = vmatmul.mubr.f32.vlgmr.msra.gmra.mrb[0].mxu1 %v481_v16  ;;  %v8861_v16 = vld [vmem:[#allocation2 + $0x38] sm:$0xff]  ;;  %v4926_v62 = vld [vmem:[%s10500_s2 + $0x368] sm:$0xff] }
  0x58   : > { %7324 = vmatpush3.bf16.msra.mxu1 %v7321_v13  ;;  %6028 = vmatprep.mubr.f32.mxu1 %v8726_v18  ;;  %v4904_v13 = vld [vmem:[%s10500_s2 + $0x238] sm:$0xff] }
  0x59   : > { %7326 = vmatprep.subr.bf16.mxu1 %v7325_v17  ;;  %7468 = vmatpush3.bf16.msra.mxu0 %v7465_v11  ;;  %v4967_v11 = vld [vmem:[%s10500_s2 + $0x630] sm:$0xff] }
  0x5b   : > { %6029 = vmatmul.mubr.f32.gmra.mrb[2].mxu1 %v8735_v21 }
  0x5c   : > { %7328 = vmatpush3.bf16.msra.mxu1 %v7325_v17  ;;  %6031 = vmatprep.mubr.f32.mxu1 %v8737_v23  ;;  %v7365_v17 = vpack.c.bf16 %v4904_v13, %v4903_v9  ;;  %v8953_v9 = vld [vmem:[#allocation2 + $0x4a] sm:$0xff]  ;;  %v4968_v13 = vld [vmem:[%s10500_s2 + $0x638] sm:$0xff] }
  0x5d   : > { %7330 = vmatprep.subr.bf16.mxu1 %v7329_v22 }
  0x5f   : > { %6032 = vmatmul.mubr.f32.gmra.mrb[4].mxu1 %v8747_v26 }
  0x60   : > { %7332 = vmatpush3.bf16.msra.mxu1 %v7329_v22  ;;  %6034 = vmatprep.mubr.f32.mxu1 %v8749_v28  ;;  %v7469_v22 = vpack.c.bf16 %v4956_v15, %v4955_v14  ;;  %v760_v14 = vld [vmem:[#allocation2 + $0xa] sm:$0xff]  ;;  %v7389_v15 = vpack.c.bf16 %v4916_v6, %v4915_v5  ;;  %v7409_v6 = vpack.c.bf16 %v4926_v62, %v4925_v61 }
  0x61   : > { %7334 = vmatprep.subr.bf16.mxu1 %v7333_v27  ;;  %v4978_v5 = vld [vmem:[%s10500_s2 + $0x708] sm:$0xff] }
  0x62   : > { %7470 = vmatprep.subr.bf16.mxu0 %v7469_v22  ;;  %v4938_v62 = vld [vmem:[%s10500_s2 + $0x448] sm:$0xff] }
  0x63   : > { %6035 = vmatmul.mubr.f32.gmra.mrb[6].mxu1 %v8759_v31  ;;  %7472 = vmatpush3.bf16.msra.mxu0 %v7469_v22  ;;  %v7493_v22 = vpack.c.bf16 %v4968_v13, %v4967_v11  ;;  %v4979_v11 = vld [vmem:[%s10500_s2 + $0x710] sm:$0xff]  ;;  %v4980_v13 = vld [vmem:[%s10500_s2 + $0x718] sm:$0xff] }
  0x64   : > { %7336 = vmatpush3.bf16.msra.mxu1 %v7333_v27  ;;  %6037 = vmatprep.mubr.f32.mxu1 %v8761_v33  ;;  %v4958_v27 = vld [vmem:[%s10500_s2 + $0x568] sm:$0xff] }
  0x65   : > { %7338 = vmatprep.subr.bf16.mxu1 %v7337_v32  ;;  %v7473_v35 = vpack.c.bf16 %v4958_v27, %v4957_v25  ;;  %v4969_v25 = vld [vmem:[%s10500_s2 + $0x640] sm:$0xff]  ;;  %v4970_v27 = vld [vmem:[%s10500_s2 + $0x648] sm:$0xff] }
  0x67   : > { %6038 = vmatmul.mubr.f32.gmra.mrb[8].mxu1 %v8771_v36  ;;  %7474 = vmatprep.subr.bf16.mxu0 %v7473_v35 }
  0x68   : > { %7340 = vmatpush3.bf16.msra.mxu1 %v7337_v32  ;;  %6040 = vmatprep.mubr.f32.mxu1 %v8773_v38  ;;  %v4907_v32 = vld [vmem:[%s10500_s2 + $0x250] sm:$0xff] }
  0x69   : > { %7342 = vmatprep.subr.bf16.mxu1 %v7341_v37  ;;  %7476 = vmatpush3.bf16.msra.mxu0 %v7473_v35  ;;  %v8982_v35 = vld [vmem:[#allocation2 + $0x62] sm:$0xff] }
  0x6a   : > { %7478 = vmatprep.subr.bf16.mxu0 %v7477_v46 }
  0x6b   : > { %6041 = vmatmul.mubr.f32.gmra.mrb[10].mxu1 %v8783_v41 }
  0x6c   : > { %7344 = vmatpush3.bf16.msra.mxu1 %v7341_v37  ;;  %6075 = vmatprep.mubr.f32.mxu1 %v452_v43  ;;  %v4908_v37 = vld [vmem:[%s10500_s2 + $0x258] sm:$0xff] }
  0x6d   : > { %7346 = vmatprep.subr.bf16.mxu1 %v7345_v42  ;;  %v7373_v43 = vpack.c.bf16 %v4908_v37, %v4907_v32  ;;  %7480 = vmatpush3.bf16.msra.mxu0 %v7477_v46  ;;  %v4919_v32 = vld [vmem:[%s10500_s2 + $0x330] sm:$0xff]  ;;  %v7497_v37 = vpack.c.bf16 %v4970_v27, %v4969_v25  ;;  %v4981_v25 = vld [vmem:[%s10500_s2 + $0x720] sm:$0xff]  ;;  %v4982_v27 = vld [vmem:[%s10500_s2 + $0x728] sm:$0xff] }
  0x6e   : > { %7482 = vmatprep.subr.bf16.mxu0 %v7481_v53  ;;  %v8998_v46 = vld [vmem:[#allocation2 + $0x6a] sm:$0xff] }
  0x70   : > { %7348 = vmatpush3.bf16.msra.mxu1 %v7345_v42  ;;  %v8897_v42 = vld [vmem:[#allocation2 + $0x68] sm:$0xff]  ;;  %6276 = vmatmul.mubr.f32.vlgmr.msra.gmra.mrb[0].mxu0 %v762_v60 }
  0x71   : > { %7350 = vmatprep.subr.bf16.mxu1 %v7349_v51  ;;  %7484 = vmatpush3.bf16.msra.mxu0 %v7481_v53  ;;  %v9012_v53 = vld [vmem:[#allocation2 + $0x7a] sm:$0xff] }
  0x72   : > { %6278 = vmatprep.mubr.f32.mxu0 %v8942_v1 }
  0x74   : > { %7352 = vmatpush3.bf16.msra.mxu1 %v7349_v51  ;;  %v7377_v51 = vpack.c.bf16 %v4910_v47, %v4909_v44  ;;  %v4921_v44 = vld [vmem:[%s10500_s2 + $0x340] sm:$0xff] }
  0x75   : > { %7354 = vmatprep.subr.bf16.mxu1 %v7353_v58 }
  0x77   : > { %6076 = vmatmul.mubr.f32.vlgmr.msra.gmra.mrb[0].mxu1 %v453_v63  ;;  %v4913_v63 = vld [vmem:[%s10500_s2 + $0x300] sm:$0xff] }
  0x78   : > { %7356 = vmatpush3.bf16.msra.mxu1 %v7353_v58  ;;  %6078 = vmatprep.mubr.f32.mxu1 %v8831_v2  ;;  %v7485_v58 = vpack.c.bf16 %v4964_v55, %v4963_v54  ;;  %v4923_v55 = vld [vmem:[%s10500_s2 + $0x350] sm:$0xff] }
  0x79   : > { %7358 = vmatprep.subr.bf16.mxu1 %v7357_v0 }
  0x7a   : > { %7486 = vmatprep.subr.bf16.mxu0 %v7485_v58 }
  0x7b   : > { %6079 = vmatmul.mubr.f32.gmra.mrb[2].mxu1 %v8843_v7  ;;  %7488 = vmatpush3.bf16.msra.mxu0 %v7485_v58  ;;  %v4976_v58 = vld [vmem:[%s10500_s2 + $0x678] sm:$0xff] }
  0x7c   : > { %7360 = vmatpush3.bf16.msra.mxu1 %v7357_v0  ;;  %6081 = vmatprep.mubr.f32.mxu1 %v8848_v10  ;;  %v4914_v0 = vld [vmem:[%s10500_s2 + $0x308] sm:$0xff] }
  0x7d   : > { %7362 = vmatprep.subr.bf16.mxu1 %v7361_v8  ;;  %v7385_v4 = vpack.c.bf16 %v4914_v0, %v4913_v63  ;;  %7490 = vmatprep.subr.bf16.mxu0 %v7489_v3  ;;  %v9038_v63 = vld [vmem:[#allocation2 + $0x92] sm:$0xff]  ;;  %v7509_v0 = vpack.c.bf16 %v4976_v58, %v4975_v57 }
  0x7e   : > { %v4936_v57 = vld [vmem:[%s10500_s2 + $0x438] sm:$0xff] }
  0x7f   : > { %6082 = vmatmul.mubr.f32.gmra.mrb[4].mxu1 %v8861_v16  ;;  %7492 = vmatpush3.bf16.msra.mxu0 %v7489_v3  ;;  %v9041_v3 = vld [vmem:[#allocation2 + $0x9a] sm:$0xff] }
  0x80   : > { %7364 = vmatpush3.bf16.msra.mxu1 %v7361_v8  ;;  %6084 = vmatprep.mubr.f32.mxu1 %v8866_v20  ;;  %v8951_v8 = vld [vmem:[#allocation2 + $0x3a] sm:$0xff] }
  0x81   : > { %7366 = vmatprep.subr.bf16.mxu1 %v7365_v17  ;;  %6279 = vmatmul.mubr.f32.gmra.mrb[2].mxu0 %v8951_v8 }
  0x82   : > { %6281 = vmatprep.mubr.f32.mxu0 %v8953_v9  ;;  %7494 = vmatprep.subr.bf16.mxu0 %v7493_v22 }
  0x83   : > { %6085 = vmatmul.mubr.f32.gmra.mrb[6].mxu1 %v8879_v29  ;;  %7496 = vmatpush3.bf16.msra.mxu0 %v7493_v22  ;;  %v7517_v22 = vpack.c.bf16 %v4980_v13, %v4979_v11  ;;  %v4940_v11 = vld [vmem:[%s10500_s2 + $0x458] sm:$0xff] }
  0x84   : > { %7368 = vmatpush3.bf16.msra.mxu1 %v7365_v17  ;;  %6087 = vmatprep.mubr.f32.mxu1 %v8884_v34  ;;  %v4917_v17 = vld [vmem:[%s10500_s2 + $0x320] sm:$0xff] }
  0x85   : > { %7370 = vmatprep.subr.bf16.mxu1 %v7369_v30  ;;  %6282 = vmatmul.mubr.f32.gmra.mrb[4].mxu0 %v8966_v19 }
  0x86   : > { %6284 = vmatprep.mubr.f32.mxu0 %v8982_v35  ;;  %7498 = vmatprep.subr.bf16.mxu0 %v7497_v37 }
  0x87   : > { %6088 = vmatmul.mubr.f32.gmra.mrb[8].mxu1 %v8897_v42  ;;  %7500 = vmatpush3.bf16.msra.mxu0 %v7497_v37 }
  0x88   : > { %7372 = vmatpush3.bf16.msra.mxu1 %v7369_v30  ;;  %6090 = vmatprep.mubr.f32.mxu1 %v8902_v45  ;;  %v7393_v30 = vpack.c.bf16 %v4918_v24, %v4917_v17 }
  0x89   : > { %7374 = vmatprep.subr.bf16.mxu1 %v7373_v43  ;;  %6285 = vmatmul.mubr.f32.gmra.mrb[6].mxu0 %v8998_v46 }
  0x8a   : > { %6287 = vmatprep.mubr.f32.mxu0 %v9012_v53 }
  0x8b   : > { %6091 = vmatmul.mubr.f32.gmra.mrb[10].mxu1 %v8915_v50 }
  0x8c   : > { %7376 = vmatpush3.bf16.msra.mxu1 %v7373_v43  ;;  %6125 = vmatprep.mubr.f32.mxu1 %v759_v52  ;;  %v7397_v43 = vpack.c.bf16 %v4920_v39, %v4919_v32  ;;  %v7401_v52 = vpack.c.bf16 %v4922_v48, %v4921_v44  ;;  %v7521_v32 = vpack.c.bf16 %v4982_v27, %v4981_v25  ;;  %v4931_v39 = vld [vmem:[%s10500_s2 + $0x410] sm:$0xff]  ;;  %v4994_v25 = vld [vmem:[%s10500_s2 + $0x808] sm:$0xff] }
  0x8d   : > { %7378 = vmatprep.subr.bf16.mxu1 %v7377_v51 }
  0x90   : > { %7380 = vmatpush3.bf16.msra.mxu1 %v7377_v51  ;;  %v4974_v51 = vld [vmem:[%s10500_s2 + $0x668] sm:$0xff] }
  0x91   : > { %7382 = vmatprep.subr.bf16.mxu1 %v7381_v59  ;;  %v7505_v54 = vpack.c.bf16 %v4974_v51, %v4973_v49  ;;  %v4934_v49 = vld [vmem:[%s10500_s2 + $0x428] sm:$0xff]  ;;  %v4985_v51 = vld [vmem:[%s10500_s2 + $0x740] sm:$0xff] }
  0x94   : > { %7384 = vmatpush3.bf16.msra.mxu1 %v7381_v59  ;;  %v7405_v59 = vpack.c.bf16 %v4924_v56, %v4923_v55  ;;  %v4935_v55 = vld [vmem:[%s10500_s2 + $0x430] sm:$0xff] }
  0x95   : > { %7386 = vmatprep.subr.bf16.mxu1 %v7385_v4  ;;  %v7429_v58 = vpack.c.bf16 %v4936_v57, %v4935_v55  ;;  %v5004_v55 = vld [vmem:[%s10500_s2 + $0x858] sm:$0xff]  ;;  %v5005_v57 = vld [vmem:[%s10500_s2 + $0x860] sm:$0xff] }
  0x97   : > { %6126 = vmatmul.mubr.f32.vlgmr.msra.gmra.mrb[0].mxu1 %v760_v14  ;;  %v4927_v14 = vld [vmem:[%s10500_s2 + $0x370] sm:$0xff] }
  0x98   : > { %7388 = vmatpush3.bf16.msra.mxu1 %v7385_v4  ;;  %6128 = vmatprep.mubr.f32.mxu1 %v8717_v12  ;;  %v4971_v12 = vld [vmem:[%s10500_s2 + $0x650] sm:$0xff]  ;;  %v4977_v4 = vld [vmem:[%s10500_s2 + $0x700] sm:$0xff] }
  0x99   : > { %7390 = vmatprep.subr.bf16.mxu1 %v7389_v15  ;;  %v7501_v47 = vpack.c.bf16 %v4972_v40, %v4971_v12  ;;  %v7513_v17 = vpack.c.bf16 %v4978_v5, %v4977_v4  ;;  %v4932_v12 = vld [vmem:[%s10500_s2 + $0x418] sm:$0xff]  ;;  %v4983_v40 = vld [vmem:[%s10500_s2 + $0x730] sm:$0xff] }
  0x9a   : > { %v7421_v44 = vpack.c.bf16 %v4932_v12, %v4931_v39  ;;  %v936_v4 = vld [vmem:[#allocation2 + $0x90] sm:$0xff] }
  0x9b   : > { %6129 = vmatmul.mubr.f32.gmra.mrb[2].mxu1 %v762_v60  ;;  %7502 = vmatprep.subr.bf16.mxu0 %v7501_v47  ;;  %v9029_v60 = vld [vmem:[#allocation2 + $0x82] sm:$0xff] }
  0x9c   : > { %7392 = vmatpush3.bf16.msra.mxu1 %v7389_v15  ;;  %6131 = vmatprep.mubr.f32.mxu1 %v8942_v1  ;;  %v4928_v15 = vld [vmem:[%s10500_s2 + $0x378] sm:$0xff] }
  0x9d   : > { %7394 = vmatprep.subr.bf16.mxu1 %v7393_v30  ;;  %7504 = vmatpush3.bf16.msra.mxu0 %v7501_v47  ;;  %v7413_v24 = vpack.c.bf16 %v4928_v15, %v4927_v14  ;;  %v4933_v47 = vld [vmem:[%s10500_s2 + $0x420] sm:$0xff]  ;;  %v937_v14 = vld [vmem:[#allocation2 + $0x98] sm:$0xff]  ;;  %v4942_v15 = vld [vmem:[%s10500_s2 + $0x468] sm:$0xff] }
  0x9e   : > { %7506 = vmatprep.subr.bf16.mxu0 %v7505_v54  ;;  %6288 = vmatmul.mubr.f32.gmra.mrb[8].mxu0 %v9029_v60 }
  0x9f   : > { %6132 = vmatmul.mubr.f32.gmra.mrb[4].mxu1 %v8951_v8  ;;  %6290 = vmatprep.mubr.f32.mxu0 %v9038_v63 }
  0xa0   : > { %7396 = vmatpush3.bf16.msra.mxu1 %v7393_v30  ;;  %6134 = vmatprep.mubr.f32.mxu1 %v8953_v9  ;;  %v4929_v30 = vld [vmem:[%s10500_s2 + $0x400] sm:$0xff] }
  0xa1   : > { %7398 = vmatprep.subr.bf16.mxu1 %v7397_v43  ;;  %7508 = vmatpush3.bf16.msra.mxu0 %v7505_v54  ;;  %v7425_v54 = vpack.c.bf16 %v4934_v49, %v4933_v47  ;;  %v5000_v47 = vld [vmem:[%s10500_s2 + $0x838] sm:$0xff]  ;;  %v5001_v49 = vld [vmem:[%s10500_s2 + $0x840] sm:$0xff] }
  0xa2   : > { %7510 = vmatprep.subr.bf16.mxu0 %v7509_v0  ;;  %6291 = vmatmul.mubr.f32.gmra.mrb[10].mxu0 %v9041_v3 }
  0xa3   : > { %6135 = vmatmul.mubr.f32.gmra.mrb[6].mxu1 %v8966_v19  ;;  %6325 = vmatprep.mubr.f32.mxu0 %v8848_v10 }
  0xa4   : > { %7400 = vmatpush3.bf16.msra.mxu1 %v7397_v43  ;;  %6137 = vmatprep.mubr.f32.mxu1 %v8982_v35  ;;  %v4984_v43 = vld [vmem:[%s10500_s2 + $0x738] sm:$0xff] }
  0xa5   : > { %7402 = vmatprep.subr.bf16.mxu1 %v7401_v52  ;;  %7512 = vmatpush3.bf16.msra.mxu0 %v7509_v0  ;;  %v7525_v48 = vpack.c.bf16 %v4984_v43, %v4983_v40  ;;  %v4997_v40 = vld [vmem:[%s10500_s2 + $0x820] sm:$0xff]  ;;  %v4998_v43 = vld [vmem:[%s10500_s2 + $0x828] sm:$0xff] }
  0xa6   : > { %7514 = vmatprep.subr.bf16.mxu0 %v7513_v17 }
  0xa7   : > { %6138 = vmatmul.mubr.f32.gmra.mrb[8].mxu1 %v8998_v46 }
  0xa8   : > { %7404 = vmatpush3.bf16.msra.mxu1 %v7401_v52  ;;  %6140 = vmatprep.mubr.f32.mxu1 %v9012_v53  ;;  %v4986_v52 = vld [vmem:[%s10500_s2 + $0x748] sm:$0xff] }
  0xa9   : > { %7406 = vmatprep.subr.bf16.mxu1 %v7405_v59  ;;  %6326 = vmatmul.mubr.f32.vlgmr.msra.gmra.mrb[0].mxu0 %v8861_v16  ;;  %v7529_v56 = vpack.c.bf16 %v4986_v52, %v4985_v51  ;;  %v5002_v51 = vld [vmem:[%s10500_s2 + $0x848] sm:$0xff] }
  0xaa   : > { %7516 = vmatpush3.bf16.msra.mxu0 %v7513_v17  ;;  %6328 = vmatprep.mubr.f32.mxu0 %v8866_v20  ;;  %v1435_v17 = vld [vmem:[#allocation2 + $0xa8] sm:$0xff]  ;;  %v7561_v52 = vpack.c.bf16 %v5002_v51, %v5001_v49 }
  0xab   : > { %6141 = vmatmul.mubr.f32.gmra.mrb[10].mxu1 %v9029_v60  ;;  %7518 = vmatprep.subr.bf16.mxu0 %v7517_v22 }
  0xac   : > { %7408 = vmatpush3.bf16.msra.mxu1 %v7405_v59  ;;  %6175 = vmatprep.mubr.f32.mxu1 %v8831_v2  ;;  %v4930_v2 = vld [vmem:[%s10500_s2 + $0x408] sm:$0xff]  ;;  %v4937_v59 = vld [vmem:[%s10500_s2 + $0x440] sm:$0xff] }
  0xad   : > { %7410 = vmatprep.subr.bf16.mxu1 %v7409_v6  ;;  %v7417_v37 = vpack.c.bf16 %v4930_v2, %v4929_v30  ;;  %6329 = vmatmul.mubr.f32.gmra.mrb[2].mxu0 %v8879_v29  ;;  %v7433_v0 = vpack.c.bf16 %v4938_v62, %v4937_v59  ;;  %v4995_v30 = vld [vmem:[%s10500_s2 + $0x810] sm:$0xff]  ;;  %v5008_v59 = vld [vmem:[%s10500_s2 + $0x878] sm:$0xff] }
  0xae   : > { %7520 = vmatpush3.bf16.msra.mxu0 %v7517_v22  ;;  %6331 = vmatprep.mubr.f32.mxu0 %v8884_v34  ;;  %v4943_v2 = vld [vmem:[%s10500_s2 + $0x470] sm:$0xff] }
  0xaf   : > { %7522 = vmatprep.subr.bf16.mxu0 %v7521_v32 }
  0xb0   : > { %7412 = vmatpush3.bf16.msra.mxu1 %v7409_v6  ;;  %v4939_v6 = vld [vmem:[%s10500_s2 + $0x450] sm:$0xff] }
  0xb1   : > { %7414 = vmatprep.subr.bf16.mxu1 %v7413_v24  ;;  %6332 = vmatmul.mubr.f32.gmra.mrb[4].mxu0 %v8897_v42  ;;  %v7437_v13 = vpack.c.bf16 %v4940_v11, %v4939_v6 }
  0xb2   : > { %7524 = vmatpush3.bf16.msra.mxu0 %v7521_v32  ;;  %6334 = vmatprep.mubr.f32.mxu0 %v8902_v45  ;;  %v4944_v32 = vld [vmem:[%s10500_s2 + $0x478] sm:$0xff] }
  0xb3   : > { %7526 = vmatprep.subr.bf16.mxu0 %v7525_v48  ;;  %v7445_v12 = vpack.c.bf16 %v4944_v32, %v4943_v2 }
  0xb4   : > { %7416 = vmatpush3.bf16.msra.mxu1 %v7413_v24  ;;  %v1436_v24 = vld [vmem:[#allocation2 + $0xb0] sm:$0xff] }
  0xb5   : > { %7418 = vmatprep.subr.bf16.mxu1 %v7417_v37  ;;  %6335 = vmatmul.mubr.f32.gmra.mrb[6].mxu0 %v8915_v50 }
  0xb6   : > { %7528 = vmatpush3.bf16.msra.mxu0 %v7525_v48  ;;  %6337 = vmatprep.mubr.f32.mxu0 %v936_v4 }
  0xb7   : > { %6176 = vmatmul.mubr.f32.vlgmr.msra.gmra.mrb[0].mxu1 %v8843_v7  ;;  %v4987_v7 = vld [vmem:[%s10500_s2 + $0x750] sm:$0xff]  ;;  %7530 = vmatprep.subr.bf16.mxu0 %v7529_v56 }
  0xb8   : > { %7420 = vmatpush3.bf16.msra.mxu1 %v7417_v37  ;;  %6178 = vmatprep.mubr.f32.mxu1 %v8848_v10  ;;  %v4988_v10 = vld [vmem:[%s10500_s2 + $0x758] sm:$0xff] }
  0xb9   : > { %7422 = vmatprep.subr.bf16.mxu1 %v7421_v44  ;;  %v7533_v61 = vpack.c.bf16 %v4988_v10, %v4987_v7  ;;  %6338 = vmatmul.mubr.f32.gmra.mrb[8].mxu0 %v937_v14  ;;  %v5006_v7 = vld [vmem:[%s10500_s2 + $0x868] sm:$0xff] }
  0xba   : > { %7532 = vmatpush3.bf16.msra.mxu0 %v7529_v56  ;;  %6340 = vmatprep.mubr.f32.mxu0 %v1435_v17  ;;  %v1103_v56 = vld [vmem:[#allocation2 + $0x99] sm:$0xff]  ;;  %v1601_v10 = vld [vmem:[#allocation2 + $0xa9] sm:$0xff] }
  0xbb   : > { %6179 = vmatmul.mubr.f32.gmra.mrb[2].mxu1 %v8861_v16  ;;  %v4989_v16 = vld [vmem:[%s10500_s2 + $0x760] sm:$0xff]  ;;  %7534 = vmatprep.subr.bf16.mxu0 %v7533_v61 }
  0xbc   : > { %7424 = vmatpush3.bf16.msra.mxu1 %v7421_v44  ;;  %6181 = vmatprep.mubr.f32.mxu1 %v8866_v20  ;;  %v4990_v20 = vld [vmem:[%s10500_s2 + $0x768] sm:$0xff]  ;;  %v4999_v44 = vld [vmem:[%s10500_s2 + $0x830] sm:$0xff] }
  0xbd   : > { %7426 = vmatprep.subr.bf16.mxu1 %v7425_v54  ;;  %v7537_v5 = vpack.c.bf16 %v4990_v20, %v4989_v16  ;;  %6341 = vmatmul.mubr.f32.gmra.mrb[10].mxu0 %v1436_v24  ;;  %v7557_v48 = vpack.c.bf16 %v5000_v47, %v4999_v44 }
  0xbe   : > { %7536 = vmatpush3.bf16.msra.mxu0 %v7533_v61  ;;  %6375 = vmatprep.mubr.f32.mxu0 %v8737_v23 }
  0xbf   : > { %6182 = vmatmul.mubr.f32.gmra.mrb[4].mxu1 %v8879_v29  ;;  %v4991_v29 = vld [vmem:[%s10500_s2 + $0x770] sm:$0xff]  ;;  %7538 = vmatprep.subr.bf16.mxu0 %v7537_v5 }
  0xc0   : > { %7428 = vmatpush3.bf16.msra.mxu1 %v7425_v54  ;;  %6184 = vmatprep.mubr.f32.mxu1 %v8884_v34  ;;  %v4992_v34 = vld [vmem:[%s10500_s2 + $0x778] sm:$0xff]  ;;  %v5003_v54 = vld [vmem:[%s10500_s2 + $0x850] sm:$0xff] }
  0xc1   : > { %7430 = vmatprep.subr.bf16.mxu1 %v7429_v58  ;;  %v7541_v22 = vpack.c.bf16 %v4992_v34, %v4991_v29 }
  0xc2   : > { %7540 = vmatpush3.bf16.msra.mxu0 %v7537_v5 }
  0xc3   : > { %6185 = vmatmul.mubr.f32.gmra.mrb[6].mxu1 %v8897_v42  ;;  %v4941_v42 = vld [vmem:[%s10500_s2 + $0x460] sm:$0xff]  ;;  %7542 = vmatprep.subr.bf16.mxu0 %v7541_v22 }
  0xc4   : > { %7432 = vmatpush3.bf16.msra.mxu1 %v7429_v58  ;;  %6187 = vmatprep.mubr.f32.mxu1 %v8902_v45  ;;  %v4993_v45 = vld [vmem:[%s10500_s2 + $0x800] sm:$0xff]  ;;  %v7441_v27 = vpack.c.bf16 %v4942_v15, %v4941_v42  ;;  %v5007_v58 = vld [vmem:[%s10500_s2 + $0x870] sm:$0xff] }
  0xc5   : > { %7434 = vmatprep.subr.bf16.mxu1 %v7433_v0  ;;  %v7545_v37 = vpack.c.bf16 %v4994_v25, %v4993_v45 }
  0xc6   : > { %7544 = vmatpush3.bf16.msra.mxu0 %v7541_v22 }
  0xc7   : > { %6188 = vmatmul.mubr.f32.gmra.mrb[8].mxu1 %v8915_v50  ;;  %v4996_v50 = vld [vmem:[%s10500_s2 + $0x818] sm:$0xff]  ;;  %7546 = vmatprep.subr.bf16.mxu0 %v7545_v37 }
  0xc8   : > { %7436 = vmatpush3.bf16.msra.mxu1 %v7433_v0  ;;  %6190 = vmatprep.mubr.f32.mxu1 %v936_v4  ;;  %v7549_v39 = vpack.c.bf16 %v4996_v50, %v4995_v30 }
  0xc9   : > { %7438 = vmatprep.subr.bf16.mxu1 %v7437_v13  ;;  %6376 = vmatmul.mubr.f32.vlgmr.msra.gmra.mrb[0].mxu0 %v8747_v26 }
  0xca   : > { %7548 = vmatpush3.bf16.msra.mxu0 %v7545_v37  ;;  %6378 = vmatprep.mubr.f32.mxu0 %v8749_v28 }
  0xcb   : > { %6191 = vmatmul.mubr.f32.gmra.mrb[10].mxu1 %v937_v14  ;;  %7550 = vmatprep.subr.bf16.mxu0 %v7549_v39 }
  0xcc   : > { %7440 = vmatpush3.bf16.msra.mxu1 %v7437_v13  ;;  %6225 = vmatprep.mubr.f32.mxu1 %v8726_v18  ;;  %v7553_v18 = vpack.c.bf16 %v4998_v43, %v4997_v40 }
  0xcd   : > { %7442 = vmatprep.subr.bf16.mxu1 %v7441_v27  ;;  %6379 = vmatmul.mubr.f32.gmra.mrb[2].mxu0 %v8759_v31 }
  0xce   : > { %7552 = vmatpush3.bf16.msra.mxu0 %v7549_v39  ;;  %6381 = vmatprep.mubr.f32.mxu0 %v8761_v33 }
  0xcf   : > { %7554 = vmatprep.subr.bf16.mxu0 %v7553_v18 }
  0xd0   : > { %7444 = vmatpush3.bf16.msra.mxu1 %v7441_v27 }
  0xd1   : > { %7446 = vmatprep.subr.bf16.mxu1 %v7445_v12  ;;  %6382 = vmatmul.mubr.f32.gmra.mrb[4].mxu0 %v8771_v36 }
  0xd2   : > { %7556 = vmatpush3.bf16.msra.mxu0 %v7553_v18  ;;  %6384 = vmatprep.mubr.f32.mxu0 %v8773_v38 }
  0xd3   : > { %7558 = vmatprep.subr.bf16.mxu0 %v7557_v48 }
  0xd4   : > { %7448 = vmatpush3.bf16.msra.mxu1 %v7445_v12 }
  0xd5   : > { %6385 = vmatmul.mubr.f32.gmra.mrb[6].mxu0 %v8783_v41 }
  0xd6   : > { %7560 = vmatpush3.bf16.msra.mxu0 %v7557_v48 }
  0xd7   : > { %6226 = vmatmul.mubr.f32.vlgmr.msra.gmra.mrb[0].mxu1 %v8735_v21  ;;  %v1102_v21 = vld [vmem:[#allocation2 + $0x91] sm:$0xff]  ;;  %7562 = vmatprep.subr.bf16.mxu0 %v7561_v52 }
  0xd8   : > { %6228 = vmatprep.mubr.f32.mxu1 %v8737_v23  ;;  %v7565_v23 = vpack.c.bf16 %v5004_v55, %v5003_v54  ;;  %6387 = vmatprep.mubr.f32.mxu0 %v1102_v21 }
  0xd9   : > { %6388 = vmatmul.mubr.f32.gmra.mrb[8].mxu0 %v1103_v56 }
  0xda   : > { %7564 = vmatpush3.bf16.msra.mxu0 %v7561_v52  ;;  %6390 = vmatprep.mubr.f32.mxu0 %v1601_v10 }
  0xdb   : > { %6229 = vmatmul.mubr.f32.gmra.mrb[2].mxu1 %v8747_v26  ;;  %v1602_v26 = vld [vmem:[#allocation2 + $0xb1] sm:$0xff]  ;;  %7566 = vmatprep.subr.bf16.mxu0 %v7565_v23 }
  0xdc   : > { %6231 = vmatprep.mubr.f32.mxu1 %v8749_v28  ;;  %v7569_v28 = vpack.c.bf16 %v5006_v7, %v5005_v57 }
  0xdd   : > { %6391 = vmatmul.mubr.f32.gmra.mrb[10].mxu0 %v1602_v26 }
  0xde   : > { %7568 = vmatpush3.bf16.msra.mxu0 %v7565_v23  ;;  %6425 = vmatprep.mubr.f32.mxu0 %v8942_v1 }
  0xdf   : > { %6232 = vmatmul.mubr.f32.gmra.mrb[4].mxu1 %v8759_v31  ;;  %7570 = vmatprep.subr.bf16.mxu0 %v7569_v28  ;;  %v7573_v31 = vpack.c.bf16 %v5008_v59, %v5007_v58 }
  0xe0   : > { %6234 = vmatprep.mubr.f32.mxu1 %v8761_v33  ;;  %v1767_v33 = vld [vmem:[#allocation2 + $0xaa] sm:$0xff] }
  0xe2   : > { %7572 = vmatpush3.bf16.msra.mxu0 %v7569_v28 }
  0xe3   : > { %6235 = vmatmul.mubr.f32.gmra.mrb[6].mxu1 %v8771_v36  ;;  %7574 = vmatprep.subr.bf16.mxu0 %v7573_v31  ;;  %v1768_v36 = vld [vmem:[#allocation2 + $0xb2] sm:$0xff] }
  0xe4   : > { %6237 = vmatprep.mubr.f32.mxu1 %v8773_v38 }
  0xe6   : > { %7576 = vmatpush3.bf16.msra.mxu0 %v7573_v31 }
  0xe7   : > { %6238 = vmatmul.mubr.f32.gmra.mrb[8].mxu1 %v8783_v41 }
  0xe8   : > { %6240 = vmatprep.mubr.f32.mxu1 %v1102_v21 }
  0xe9   : > { %6426 = vmatmul.mubr.f32.vlgmr.msra.gmra.mrb[0].mxu0 %v8951_v8 }
  0xea   : > { %6428 = vmatprep.mubr.f32.mxu0 %v8953_v9 }
  0xeb   : > { %6241 = vmatmul.mubr.f32.gmra.mrb[10].mxu1 %v1103_v56 }
  0xed   : > { %6429 = vmatmul.mubr.f32.gmra.mrb[2].mxu0 %v8966_v19 }
  0xee   : > { %6431 = vmatprep.mubr.f32.mxu0 %v8982_v35 }
  0xf1   : > { %6432 = vmatmul.mubr.f32.gmra.mrb[4].mxu0 %v8998_v46 }
  0xf2   : > { %6434 = vmatprep.mubr.f32.mxu0 %v9012_v53 }
  0xf5   : > { %6435 = vmatmul.mubr.f32.gmra.mrb[6].mxu0 %v9029_v60 }
  0xf6   : > { %6437 = vmatprep.mubr.f32.mxu0 %v9038_v63 }
  0xf9   : > { %6438 = vmatmul.mubr.f32.gmra.mrb[8].mxu0 %v9041_v3 }
  0xfa   : > { %6440 = vmatprep.mubr.f32.mxu0 %v1767_v33 }
  0xfd   : > { %6441 = vmatmul.mubr.f32.gmra.mrb[10].mxu0 %v1768_v36 }
 0x1aa   : > { %v9243_v38 = vpop.f32.mrb[0].mxu1 }
 0x1ab   : > { %v9245_v41 = vpop.f32.mrb[1].mxu1 }
 0x1ae   : > { %v9247_v1 = vpop.f32.mrb[2].mxu1 }
 0x1af   : > { %v9249_v8 = vpop.f32.mrb[3].mxu1 }
 0x1b2   : > { %v9251_v9 = vpop.f32.mrb[4].mxu1 }
 0x1b3   : > { %v9253_v19 = vpop.f32.mrb[5].mxu1 }
 0x1b6   : > { %v9255_v35 = vpop.f32.mrb[6].mxu1 }
 0x1b7   : > { %v9257_v46 = vpop.f32.mrb[7].mxu1 }
 0x1ba   : > { %v9259_v53 = vpop.f32.mrb[8].mxu1 }
 0x1bb   : > { %v9261_v60 = vpop.f32.mrb[9].mxu1 }
 0x1be   : > { %v9263_v63 = vpop.f32.mrb[10].mxu1 }
 0x1bf   : > { %v9265_v3 = vpop.f32.mrb[11].mxu1 }
 0x1c0   : > { %8502 = dma.done.wait [#allocation5 + $0x1], 2304 }
 0x1c1   : > { %8503 = vsyncadd [#allocation5 + $0x1], 4294964992  ;;  %v1937_v61 = vld [vmem:[%s10500_s2 + $0x80] sm:$0xff]  ;;  %v1938_v62 = vld [vmem:[%s10500_s2 + $0x88] sm:$0xff]  ;;  %p5138_p7 = scmp.ne.s32.totalorder %s8506_s21, 0 }
 0x1c2   : > { %v1939_v16 = vld [vmem:[%s10500_s2 + $0x90] sm:$0xff]  ;;  %v7577_v20 = vpack.c.bf16 %v1938_v62, %v1937_v61  ;;  %v1940_v0 = vld [vmem:[%s10500_s2 + $0x98] sm:$0xff]  ;;  %v1941_v5 = vld [vmem:[%s10500_s2 + $0xa0] sm:$0xff] }
 0x1c3   : > { %v7581_v4 = vpack.c.bf16 %v1940_v0, %v1939_v16  ;;  %v1942_v6 = vld [vmem:[%s10500_s2 + $0xa8] sm:$0xff]  ;;  %v1925_v29 = vld [vmem:[#allocation3] sm:$0xff]  ;;  %v1943_v34 = vld [vmem:[%s10500_s2 + $0xb0] sm:$0xff] }
 0x1c4   : > { %7578 = vmatprep.subr.bf16.mxu0 %v7577_v20  ;;  %v7585_v11 = vpack.c.bf16 %v1942_v6, %v1941_v5  ;;  %v1944_v13 = vld [vmem:[%s10500_s2 + $0xb8] sm:$0xff]  ;;  %6475 = vmatprep.mubr.f32.mxu0 %v1925_v29  ;;  %v1945_v42 = vld [vmem:[%s10500_s2 + $0xc0] sm:$0xff]  ;;  %v1946_v15 = vld [vmem:[%s10500_s2 + $0xc8] sm:$0xff] }
 0x1c5   : > { %7580 = vmatpush3.bf16.msra.mxu0 %v7577_v20  ;;  %v7589_v14 = vpack.c.bf16 %v1944_v13, %v1943_v34  ;;  %v7593_v17 = vpack.c.bf16 %v1946_v15, %v1945_v42  ;;  %v1947_v22 = vld [vmem:[%s10500_s2 + $0xd0] sm:$0xff]  ;;  %v1948_v24 = vld [vmem:[%s10500_s2 + $0xd8] sm:$0xff]  ;;  %v1949_v25 = vld [vmem:[%s10500_s2 + $0xe0] sm:$0xff] }
 0x1c6   : > { %7582 = vmatprep.subr.bf16.mxu0 %v7581_v4  ;;  %v7597_v45 = vpack.c.bf16 %v1948_v24, %v1947_v22  ;;  %v1950_v27 = vld [vmem:[%s10500_s2 + $0xe8] sm:$0xff]  ;;  %v1951_v50 = vld [vmem:[%s10500_s2 + $0xf0] sm:$0xff]  ;;  %v1952_v2 = vld [vmem:[%s10500_s2 + $0xf8] sm:$0xff] }
 0x1c7   : > { %v7601_v30 = vpack.c.bf16 %v1950_v27, %v1949_v25  ;;  %v7605_v32 = vpack.c.bf16 %v1952_v2, %v1951_v50  ;;  %v5009_v37 = vld [vmem:[%s10500_s2 + $0x180] sm:$0xff]  ;;  %v5010_v39 = vld [vmem:[%s10500_s2 + $0x188] sm:$0xff]  ;;  %v5011_v40 = vld [vmem:[%s10500_s2 + $0x190] sm:$0xff] }
 0x1c8   : > { %v7609_v12 = vpack.c.bf16 %v5010_v39, %v5009_v37  ;;  %v5012_v43 = vld [vmem:[%s10500_s2 + $0x198] sm:$0xff]  ;;  %v1926_v18 = vld [vmem:[#allocation3 + $0x8] sm:$0xff]  ;;  %v5013_v48 = vld [vmem:[%s10500_s2 + $0x1a0] sm:$0xff] }
 0x1c9   : > { %7584 = vmatpush3.bf16.msra.mxu0 %v7581_v4  ;;  %v7613_v44 = vpack.c.bf16 %v5012_v43, %v5011_v40  ;;  %v9327_v47 = vld [vmem:[#allocation3 + $0x18] sm:$0xff]  ;;  %v5014_v49 = vld [vmem:[%s10500_s2 + $0x1a8] sm:$0xff]  ;;  %v9336_v51 = vld [vmem:[#allocation3 + $0x20] sm:$0xff] }
 0x1ca   : > { %7586 = vmatprep.subr.bf16.mxu0 %v7585_v11  ;;  %v7617_v52 = vpack.c.bf16 %v5014_v49, %v5013_v48  ;;  %v9338_v54 = vld [vmem:[#allocation3 + $0x30] sm:$0xff]  ;;  %v5016_v21 = vld [vmem:[%s10500_s2 + $0x1b8] sm:$0xff]  ;;  %v9350_v57 = vld [vmem:[#allocation3 + $0x48] sm:$0xff] }
 0x1cb   : > { %v5015_v55 = vld [vmem:[%s10500_s2 + $0x1b0] sm:$0xff]  ;;  %v9348_v23 = vld [vmem:[#allocation3 + $0x38] sm:$0xff]  ;;  %v5017_v7 = vld [vmem:[%s10500_s2 + $0x1c0] sm:$0xff] }
 0x1cc   : > { %v7621_v56 = vpack.c.bf16 %v5016_v21, %v5015_v55  ;;  %v5018_v10 = vld [vmem:[%s10500_s2 + $0x1c8] sm:$0xff]  ;;  %v9360_v26 = vld [vmem:[#allocation3 + $0x50] sm:$0xff]  ;;  %v9362_v58 = vld [vmem:[#allocation3 + $0x60] sm:$0xff] }
 0x1cd   : > { %7588 = vmatpush3.bf16.msra.mxu0 %v7585_v11  ;;  %v7625_v28 = vpack.c.bf16 %v5018_v10, %v5017_v7  ;;  %v5019_v59 = vld [vmem:[%s10500_s2 + $0x1d0] sm:$0xff]  ;;  %v5020_v31 = vld [vmem:[%s10500_s2 + $0x1d8] sm:$0xff]  ;;  %v9372_v33 = vld [vmem:[#allocation3 + $0x68] sm:$0xff] }
 0x1ce   : > { %7590 = vmatprep.subr.bf16.mxu0 %v7589_v14  ;;  %v7629_v36 = vpack.c.bf16 %v5020_v31, %v5019_v59  ;;  %v9374_v61 = vld [vmem:[#allocation3 + $0x78] sm:$0xff]  ;;  %v5021_v62 = vld [vmem:[%s10500_s2 + $0x1e0] sm:$0xff]  ;;  %v5022_v16 = vld [vmem:[%s10500_s2 + $0x1e8] sm:$0xff] }
 0x1cf   : > { %v9384_v20 = vld [vmem:[#allocation3 + $0x80] sm:$0xff]  ;;  %v7633_v0 = vpack.c.bf16 %v5022_v16, %v5021_v62  ;;  %v5023_v5 = vld [vmem:[%s10500_s2 + $0x1f0] sm:$0xff]  ;;  %v5024_v6 = vld [vmem:[%s10500_s2 + $0x1f8] sm:$0xff] }
 0x1d0   : > { %v2090_v4 = vld [vmem:[#allocation3 + $0x1] sm:$0xff]  ;;  %v7637_v11 = vpack.c.bf16 %v5024_v6, %v5023_v5  ;;  %v5028_v42 = vld [vmem:[%s10500_s2 + $0x298] sm:$0xff]  ;;  %v2091_v15 = vld [vmem:[#allocation3 + $0x9] sm:$0xff] }
 0x1d1   : > { %7592 = vmatpush3.bf16.msra.mxu0 %v7589_v14  ;;  %v5025_v29 = vld [vmem:[%s10500_s2 + $0x280] sm:$0xff]  ;;  %v5026_v34 = vld [vmem:[%s10500_s2 + $0x288] sm:$0xff]  ;;  %v5027_v14 = vld [vmem:[%s10500_s2 + $0x290] sm:$0xff] }
 0x1d2   : > { %7594 = vmatprep.subr.bf16.mxu0 %v7593_v17  ;;  %v7641_v13 = vpack.c.bf16 %v5026_v34, %v5025_v29  ;;  %v9405_v22 = vld [vmem:[#allocation3 + $0x19] sm:$0xff]  ;;  %v9414_v25 = vld [vmem:[#allocation3 + $0x21] sm:$0xff]  ;;  %v5031_v50 = vld [vmem:[%s10500_s2 + $0x2b0] sm:$0xff] }
 0x1d3   : > { %v5029_v24 = vld [vmem:[%s10500_s2 + $0x2a0] sm:$0xff]  ;;  %v5032_v2 = vld [vmem:[%s10500_s2 + $0x2b8] sm:$0xff]  ;;  %v9428_v39 = vld [vmem:[#allocation3 + $0x49] sm:$0xff] }
 0x1d4   : > { %v7653_v37 = vpack.c.bf16 %v5032_v2, %v5031_v50  ;;  %v5034_v40 = vld [vmem:[%s10500_s2 + $0x2c8] sm:$0xff]  ;;  %v9438_v43 = vld [vmem:[#allocation3 + $0x51] sm:$0xff]  ;;  %v9452_v21 = vld [vmem:[#allocation3 + $0x79] sm:$0xff] }
 0x1d5   : > { %7596 = vmatpush3.bf16.msra.mxu0 %v7593_v17  ;;  %v7645_v17 = vpack.c.bf16 %v5028_v42, %v5027_v14  ;;  %v5035_v48 = vld [vmem:[%s10500_s2 + $0x2d0] sm:$0xff]  ;;  %v5036_v49 = vld [vmem:[%s10500_s2 + $0x2d8] sm:$0xff]  ;;  %v5038_v7 = vld [vmem:[%s10500_s2 + $0x2e8] sm:$0xff] }
 0x1d6   : > { %7598 = vmatprep.subr.bf16.mxu0 %v7597_v45  ;;  %v7661_v55 = vpack.c.bf16 %v5036_v49, %v5035_v48  ;;  %v9462_v10 = vld [vmem:[#allocation3 + $0x81] sm:$0xff]  ;;  %v5039_v31 = vld [vmem:[%s10500_s2 + $0x2f0] sm:$0xff]  ;;  %v5044_v6 = vld [vmem:[%s10500_s2 + $0x398] sm:$0xff] }
 0x1d7   : > { %v2255_v59 = vld [vmem:[#allocation3 + $0x2] sm:$0xff]  ;;  %v5043_v5 = vld [vmem:[%s10500_s2 + $0x390] sm:$0xff]  ;;  %v9483_v34 = vld [vmem:[#allocation3 + $0x1a] sm:$0xff] }
 0x1d8   : > { %v5041_v16 = vld [vmem:[%s10500_s2 + $0x380] sm:$0xff]  ;;  %v7677_v29 = vpack.c.bf16 %v5044_v6, %v5043_v5  ;;  %v5046_v14 = vld [vmem:[%s10500_s2 + $0x3a8] sm:$0xff]  ;;  %v5051_v49 = vld [vmem:[%s10500_s2 + $0x3d0] sm:$0xff] }
 0x1d9   : > { %7600 = vmatpush3.bf16.msra.mxu0 %v7597_v45  ;;  %v5030_v45 = vld [vmem:[%s10500_s2 + $0x2a8] sm:$0xff]  ;;  %v5057_v5 = vld [vmem:[%s10500_s2 + $0x480] sm:$0xff] }
 0x1da   : > { %7602 = vmatprep.subr.bf16.mxu0 %v7601_v30  ;;  %v7649_v27 = vpack.c.bf16 %v5030_v45, %v5029_v24  ;;  %v9492_v42 = vld [vmem:[#allocation3 + $0x22] sm:$0xff]  ;;  %v5047_v24 = vld [vmem:[%s10500_s2 + $0x3b0] sm:$0xff]  ;;  %v5048_v45 = vld [vmem:[%s10500_s2 + $0x3b8] sm:$0xff] }
 0x1db   : > { %v7685_v50 = vpack.c.bf16 %v5048_v45, %v5047_v24  ;;  %v9506_v2 = vld [vmem:[#allocation3 + $0x4a] sm:$0xff]  ;;  %v9518_v48 = vld [vmem:[#allocation3 + $0x62] sm:$0xff] }
 0x1dc   : > { %v5058_v6 = vld [vmem:[%s10500_s2 + $0x488] sm:$0xff]  ;;  %v5063_v45 = vld [vmem:[%s10500_s2 + $0x4b0] sm:$0xff] }
 0x1dd   : > { %7604 = vmatpush3.bf16.msra.mxu0 %v7601_v30  ;;  %v9416_v30 = vld [vmem:[#allocation3 + $0x31] sm:$0xff] }
 0x1de   : > { %7606 = vmatprep.subr.bf16.mxu0 %v7605_v32 }
 0x1e1   : > { %7608 = vmatpush3.bf16.msra.mxu0 %v7605_v32  ;;  %v9426_v32 = vld [vmem:[#allocation3 + $0x39] sm:$0xff] }
 0x1e2   : > { %7610 = vmatprep.subr.bf16.mxu0 %v7609_v12 }
 0x1e4   : > { %6476 = vmatmul.mubr.f32.vlgmr.msra.gmra.mrb[0].mxu0 %v1926_v18 }
 0x1e5   : > { %7612 = vmatpush3.bf16.msra.mxu0 %v7609_v12  ;;  %6478 = vmatprep.mubr.f32.mxu0 %v9327_v47  ;;  %v5033_v12 = vld [vmem:[%s10500_s2 + $0x2c0] sm:$0xff] }
 0x1e6   : > { %7614 = vmatprep.subr.bf16.mxu0 %v7613_v44  ;;  %v7657_v18 = vpack.c.bf16 %v5034_v40, %v5033_v12  ;;  %v5050_v12 = vld [vmem:[%s10500_s2 + $0x3c8] sm:$0xff]  ;;  %v9516_v40 = vld [vmem:[#allocation3 + $0x52] sm:$0xff] }
 0x1e8   : > { %6479 = vmatmul.mubr.f32.gmra.mrb[2].mxu0 %v9336_v51 }
 0x1e9   : > { %7616 = vmatpush3.bf16.msra.mxu0 %v7613_v44  ;;  %6481 = vmatprep.mubr.f32.mxu0 %v9338_v54  ;;  %v9440_v44 = vld [vmem:[#allocation3 + $0x61] sm:$0xff] }
 0x1ea   : > { %7618 = vmatprep.subr.bf16.mxu0 %v7617_v52 }
 0x1ec   : > { %6482 = vmatmul.mubr.f32.gmra.mrb[4].mxu0 %v9348_v23 }
 0x1ed   : > { %7620 = vmatpush3.bf16.msra.mxu0 %v7617_v52  ;;  %6484 = vmatprep.mubr.f32.mxu0 %v9350_v57  ;;  %v9450_v52 = vld [vmem:[#allocation3 + $0x69] sm:$0xff] }
 0x1ee   : > { %7622 = vmatprep.subr.bf16.mxu0 %v7621_v56 }
 0x1f0   : > { %6485 = vmatmul.mubr.f32.gmra.mrb[6].mxu0 %v9360_v26 }
 0x1f1   : > { %7624 = vmatpush3.bf16.msra.mxu0 %v7621_v56  ;;  %6487 = vmatprep.mubr.f32.mxu0 %v9362_v58  ;;  %v5037_v56 = vld [vmem:[%s10500_s2 + $0x2e0] sm:$0xff] }
 0x1f2   : > { %7626 = vmatprep.subr.bf16.mxu0 %v7625_v28 }
 0x1f4   : > { %6488 = vmatmul.mubr.f32.gmra.mrb[8].mxu0 %v9372_v33 }
 0x1f5   : > { %7628 = vmatpush3.bf16.msra.mxu0 %v7625_v28  ;;  %6490 = vmatprep.mubr.f32.mxu0 %v9374_v61  ;;  %v7665_v28 = vpack.c.bf16 %v5038_v7, %v5037_v56  ;;  %v9528_v56 = vld [vmem:[#allocation3 + $0x6a] sm:$0xff] }
 0x1f6   : > { %7630 = vmatprep.subr.bf16.mxu0 %v7629_v36 }
 0x1f8   : > { %6491 = vmatmul.mubr.f32.gmra.mrb[10].mxu0 %v9384_v20 }
 0x1f9   : > { %7632 = vmatpush3.bf16.msra.mxu0 %v7629_v36  ;;  %6525 = vmatprep.mubr.f32.mxu0 %v2090_v4  ;;  %v5040_v36 = vld [vmem:[%s10500_s2 + $0x2f8] sm:$0xff] }
 0x1fa   : > { %7634 = vmatprep.subr.bf16.mxu0 %v7633_v0  ;;  %v7669_v62 = vpack.c.bf16 %v5040_v36, %v5039_v31  ;;  %v5054_v31 = vld [vmem:[%s10500_s2 + $0x3e8] sm:$0xff] }
 0x1fb   : > { %v9540_v36 = vld [vmem:[#allocation3 + $0x82] sm:$0xff] }
 0x1fd   : > { %7636 = vmatpush3.bf16.msra.mxu0 %v7633_v0  ;;  %v5042_v0 = vld [vmem:[%s10500_s2 + $0x388] sm:$0xff] }
 0x1fe   : > { %7638 = vmatprep.subr.bf16.mxu0 %v7637_v11  ;;  %v7673_v4 = vpack.c.bf16 %v5042_v0, %v5041_v16  ;;  %v5055_v16 = vld [vmem:[%s10500_s2 + $0x3f0] sm:$0xff]  ;;  %v5056_v0 = vld [vmem:[%s10500_s2 + $0x3f8] sm:$0xff] }
 0x201   : > { %7640 = vmatpush3.bf16.msra.mxu0 %v7637_v11  ;;  %v2256_v11 = vld [vmem:[#allocation3 + $0xa] sm:$0xff] }
 0x202   : > { %7642 = vmatprep.subr.bf16.mxu0 %v7641_v13 }
 0x204   : > { %6526 = vmatmul.mubr.f32.vlgmr.msra.gmra.mrb[0].mxu0 %v2091_v15 }
 0x205   : > { %7644 = vmatpush3.bf16.msra.mxu0 %v7641_v13  ;;  %6528 = vmatprep.mubr.f32.mxu0 %v9405_v22  ;;  %v5045_v13 = vld [vmem:[%s10500_s2 + $0x3a0] sm:$0xff] }
 0x206   : > { %7646 = vmatprep.subr.bf16.mxu0 %v7645_v17  ;;  %v7681_v15 = vpack.c.bf16 %v5046_v14, %v5045_v13  ;;  %v5061_v14 = vld [vmem:[%s10500_s2 + $0x4a0] sm:$0xff] }
 0x208   : > { %6529 = vmatmul.mubr.f32.gmra.mrb[2].mxu0 %v9414_v25 }
 0x209   : > { %7648 = vmatpush3.bf16.msra.mxu0 %v7645_v17  ;;  %6531 = vmatprep.mubr.f32.mxu0 %v9416_v30  ;;  %v9494_v17 = vld [vmem:[#allocation3 + $0x32] sm:$0xff] }
 0x20a   : > { %7650 = vmatprep.subr.bf16.mxu0 %v7649_v27 }
 0x20c   : > { %6532 = vmatmul.mubr.f32.gmra.mrb[4].mxu0 %v9426_v32 }
 0x20d   : > { %7652 = vmatpush3.bf16.msra.mxu0 %v7649_v27  ;;  %6534 = vmatprep.mubr.f32.mxu0 %v9428_v39  ;;  %v9504_v27 = vld [vmem:[#allocation3 + $0x3a] sm:$0xff] }
 0x20e   : > { %7654 = vmatprep.subr.bf16.mxu0 %v7653_v37 }
 0x210   : > { %6535 = vmatmul.mubr.f32.gmra.mrb[6].mxu0 %v9438_v43 }
 0x211   : > { %7656 = vmatpush3.bf16.msra.mxu0 %v7653_v37  ;;  %6537 = vmatprep.mubr.f32.mxu0 %v9440_v44  ;;  %v5049_v37 = vld [vmem:[%s10500_s2 + $0x3c0] sm:$0xff] }
 0x212   : > { %7658 = vmatprep.subr.bf16.mxu0 %v7657_v18 }
 0x214   : > { %6538 = vmatmul.mubr.f32.gmra.mrb[8].mxu0 %v9450_v52 }
 0x215   : > { %7660 = vmatpush3.bf16.msra.mxu0 %v7657_v18  ;;  %6540 = vmatprep.mubr.f32.mxu0 %v9452_v21  ;;  %v7689_v18 = vpack.c.bf16 %v5050_v12, %v5049_v37  ;;  %v5065_v37 = vld [vmem:[%s10500_s2 + $0x4c0] sm:$0xff]  ;;  %v5066_v12 = vld [vmem:[%s10500_s2 + $0x4c8] sm:$0xff] }
 0x216   : > { %7662 = vmatprep.subr.bf16.mxu0 %v7661_v55 }
 0x218   : > { %6541 = vmatmul.mubr.f32.gmra.mrb[10].mxu0 %v9462_v10 }
 0x219   : > { %7664 = vmatpush3.bf16.msra.mxu0 %v7661_v55  ;;  %6575 = vmatprep.mubr.f32.mxu0 %v2255_v59  ;;  %v5052_v55 = vld [vmem:[%s10500_s2 + $0x3d8] sm:$0xff]  ;;  %v5053_v59 = vld [vmem:[%s10500_s2 + $0x3e0] sm:$0xff] }
 0x21a   : > { %7666 = vmatprep.subr.bf16.mxu0 %v7665_v28  ;;  %v7693_v7 = vpack.c.bf16 %v5052_v55, %v5051_v49  ;;  %v5067_v49 = vld [vmem:[%s10500_s2 + $0x4d0] sm:$0xff]  ;;  %v5068_v55 = vld [vmem:[%s10500_s2 + $0x4d8] sm:$0xff] }
 0x21d   : > { %7668 = vmatpush3.bf16.msra.mxu0 %v7665_v28  ;;  %v9530_v28 = vld [vmem:[#allocation3 + $0x7a] sm:$0xff] }
 0x21e   : > { %7670 = vmatprep.subr.bf16.mxu0 %v7669_v62 }
 0x221   : > { %7672 = vmatpush3.bf16.msra.mxu0 %v7669_v62  ;;  %v7697_v62 = vpack.c.bf16 %v5054_v31, %v5053_v59  ;;  %v9594_v59 = vld [vmem:[#allocation3 + $0x90] sm:$0xff]  ;;  %v5069_v31 = vld [vmem:[%s10500_s2 + $0x4e0] sm:$0xff] }
 0x222   : > { %7674 = vmatprep.subr.bf16.mxu0 %v7673_v4 }
 0x224   : > { %6576 = vmatmul.mubr.f32.vlgmr.msra.gmra.mrb[0].mxu0 %v2256_v11  ;;  %v7705_v11 = vpack.c.bf16 %v5058_v6, %v5057_v5  ;;  %v5072_v5 = vld [vmem:[%s10500_s2 + $0x4f8] sm:$0xff] }
 0x225   : > { %7676 = vmatpush3.bf16.msra.mxu0 %v7673_v4  ;;  %6578 = vmatprep.mubr.f32.mxu0 %v9483_v34  ;;  %v7701_v4 = vpack.c.bf16 %v5056_v0, %v5055_v16  ;;  %v9604_v16 = vld [vmem:[#allocation3 + $0x98] sm:$0xff] }
 0x226   : > { %7678 = vmatprep.subr.bf16.mxu0 %v7677_v29 }
 0x228   : > { %6579 = vmatmul.mubr.f32.gmra.mrb[2].mxu0 %v9492_v42 }
 0x229   : > { %7680 = vmatpush3.bf16.msra.mxu0 %v7677_v29  ;;  %6581 = vmatprep.mubr.f32.mxu0 %v9494_v17  ;;  %v5059_v29 = vld [vmem:[%s10500_s2 + $0x490] sm:$0xff] }
 0x22a   : > { %7682 = vmatprep.subr.bf16.mxu0 %v7681_v15 }
 0x22c   : > { %6582 = vmatmul.mubr.f32.gmra.mrb[4].mxu0 %v9504_v27 }
 0x22d   : > { %7684 = vmatpush3.bf16.msra.mxu0 %v7681_v15  ;;  %6584 = vmatprep.mubr.f32.mxu0 %v9506_v2  ;;  %v5062_v15 = vld [vmem:[%s10500_s2 + $0x4a8] sm:$0xff] }
 0x22e   : > { %7686 = vmatprep.subr.bf16.mxu0 %v7685_v50  ;;  %v7713_v24 = vpack.c.bf16 %v5062_v15, %v5061_v14  ;;  %v5077_v15 = vld [vmem:[%s10500_s2 + $0x5a0] sm:$0xff] }
 0x230   : > { %6585 = vmatmul.mubr.f32.gmra.mrb[6].mxu0 %v9516_v40 }
 0x231   : > { %7688 = vmatpush3.bf16.msra.mxu0 %v7685_v50  ;;  %6587 = vmatprep.mubr.f32.mxu0 %v9518_v48  ;;  %v5064_v50 = vld [vmem:[%s10500_s2 + $0x4b8] sm:$0xff] }
 0x232   : > { %7690 = vmatprep.subr.bf16.mxu0 %v7689_v18 }
 0x234   : > { %6588 = vmatmul.mubr.f32.gmra.mrb[8].mxu0 %v9528_v56 }
 0x235   : > { %7692 = vmatpush3.bf16.msra.mxu0 %v7689_v18  ;;  %6590 = vmatprep.mubr.f32.mxu0 %v9530_v28  ;;  %v7721_v18 = vpack.c.bf16 %v5066_v12, %v5065_v37  ;;  %v5081_v37 = vld [vmem:[%s10500_s2 + $0x5c0] sm:$0xff]  ;;  %v5082_v12 = vld [vmem:[%s10500_s2 + $0x5c8] sm:$0xff] }
 0x236   : > { %7694 = vmatprep.subr.bf16.mxu0 %v7693_v7 }
 0x238   : > { %6591 = vmatmul.mubr.f32.gmra.mrb[10].mxu0 %v9540_v36 }
 0x239   : > { %7696 = vmatpush3.bf16.msra.mxu0 %v7693_v7  ;;  %6625 = vmatprep.mubr.f32.mxu0 %v9327_v47  ;;  %v5060_v47 = vld [vmem:[%s10500_s2 + $0x498] sm:$0xff]  ;;  %v7725_v7 = vpack.c.bf16 %v5068_v55, %v5067_v49  ;;  %v5083_v49 = vld [vmem:[%s10500_s2 + $0x5d0] sm:$0xff] }
 0x23a   : > { %7698 = vmatprep.subr.bf16.mxu0 %v7697_v62  ;;  %v7709_v13 = vpack.c.bf16 %v5060_v47, %v5059_v29  ;;  %v5074_v29 = vld [vmem:[%s10500_s2 + $0x588] sm:$0xff]  ;;  %v5084_v55 = vld [vmem:[%s10500_s2 + $0x5d8] sm:$0xff] }
 0x23d   : > { %7700 = vmatpush3.bf16.msra.mxu0 %v7697_v62  ;;  %v5070_v62 = vld [vmem:[%s10500_s2 + $0x4e8] sm:$0xff] }
 0x23e   : > { %7702 = vmatprep.subr.bf16.mxu0 %v7701_v4  ;;  %v7729_v0 = vpack.c.bf16 %v5070_v62, %v5069_v31  ;;  %v9658_v31 = vld [vmem:[#allocation3 + $0x91] sm:$0xff]  ;;  %v5085_v62 = vld [vmem:[%s10500_s2 + $0x5e0] sm:$0xff] }
 0x241   : > { %7704 = vmatpush3.bf16.msra.mxu0 %v7701_v4  ;;  %v5071_v4 = vld [vmem:[%s10500_s2 + $0x4f0] sm:$0xff] }
 0x242   : > { %7706 = vmatprep.subr.bf16.mxu0 %v7705_v11  ;;  %v7733_v6 = vpack.c.bf16 %v5072_v5, %v5071_v4  ;;  %v9668_v4 = vld [vmem:[#allocation3 + $0x99] sm:$0xff] }
 0x244   : > { %6626 = vmatmul.mubr.f32.vlgmr.msra.gmra.mrb[0].mxu0 %v9336_v51  ;;  %v7717_v51 = vpack.c.bf16 %v5064_v50, %v5063_v45  ;;  %v5079_v50 = vld [vmem:[%s10500_s2 + $0x5b0] sm:$0xff] }
 0x245   : > { %7708 = vmatpush3.bf16.msra.mxu0 %v7705_v11  ;;  %6628 = vmatprep.mubr.f32.mxu0 %v9338_v54  ;;  %v5073_v11 = vld [vmem:[%s10500_s2 + $0x580] sm:$0xff] }
 0x246   : > { %7710 = vmatprep.subr.bf16.mxu0 %v7709_v13  ;;  %v7737_v47 = vpack.c.bf16 %v5074_v29, %v5073_v11  ;;  %v5088_v11 = vld [vmem:[%s10500_s2 + $0x5f8] sm:$0xff] }
 0x248   : > { %6629 = vmatmul.mubr.f32.gmra.mrb[2].mxu0 %v9348_v23 }
 0x249   : > { %7712 = vmatpush3.bf16.msra.mxu0 %v7709_v13  ;;  %6631 = vmatprep.mubr.f32.mxu0 %v9350_v57  ;;  %v5075_v13 = vld [vmem:[%s10500_s2 + $0x590] sm:$0xff] }
 0x24a   : > { %7714 = vmatprep.subr.bf16.mxu0 %v7713_v24 }
 0x24c   : > { %6632 = vmatmul.mubr.f32.gmra.mrb[4].mxu0 %v9360_v26 }
 0x24d   : > { %7716 = vmatpush3.bf16.msra.mxu0 %v7713_v24  ;;  %6634 = vmatprep.mubr.f32.mxu0 %v9362_v58  ;;  %v5078_v24 = vld [vmem:[%s10500_s2 + $0x5a8] sm:$0xff] }
 0x24e   : > { %7718 = vmatprep.subr.bf16.mxu0 %v7717_v51  ;;  %v7745_v45 = vpack.c.bf16 %v5078_v24, %v5077_v15  ;;  %v5093_v24 = vld [vmem:[%s10500_s2 + $0x6a0] sm:$0xff] }
 0x250   : > { %6635 = vmatmul.mubr.f32.gmra.mrb[6].mxu0 %v9372_v33 }
 0x251   : > { %7720 = vmatpush3.bf16.msra.mxu0 %v7717_v51  ;;  %6637 = vmatprep.mubr.f32.mxu0 %v9374_v61  ;;  %v5080_v51 = vld [vmem:[%s10500_s2 + $0x5b8] sm:$0xff] }
 0x252   : > { %7722 = vmatprep.subr.bf16.mxu0 %v7721_v18 }
 0x254   : > { %6638 = vmatmul.mubr.f32.gmra.mrb[8].mxu0 %v9384_v20 }
 0x255   : > { %7724 = vmatpush3.bf16.msra.mxu0 %v7721_v18  ;;  %6640 = vmatprep.mubr.f32.mxu0 %v9594_v59  ;;  %v7753_v18 = vpack.c.bf16 %v5082_v12, %v5081_v37  ;;  %v5097_v37 = vld [vmem:[%s10500_s2 + $0x6c0] sm:$0xff]  ;;  %v5098_v12 = vld [vmem:[%s10500_s2 + $0x6c8] sm:$0xff] }
 0x256   : > { %7726 = vmatprep.subr.bf16.mxu0 %v7725_v7 }
 0x258   : > { %6641 = vmatmul.mubr.f32.gmra.mrb[10].mxu0 %v9604_v16 }
 0x259   : > { %7728 = vmatpush3.bf16.msra.mxu0 %v7725_v7  ;;  %6675 = vmatprep.mubr.f32.mxu0 %v9405_v22  ;;  %v5076_v22 = vld [vmem:[%s10500_s2 + $0x598] sm:$0xff]  ;;  %v7757_v7 = vpack.c.bf16 %v5084_v55, %v5083_v49  ;;  %v5099_v49 = vld [vmem:[%s10500_s2 + $0x6d0] sm:$0xff] }
 0x25a   : > { %7730 = vmatprep.subr.bf16.mxu0 %v7729_v0  ;;  %v7741_v14 = vpack.c.bf16 %v5076_v22, %v5075_v13  ;;  %v5090_v13 = vld [vmem:[%s10500_s2 + $0x688] sm:$0xff]  ;;  %v5100_v55 = vld [vmem:[%s10500_s2 + $0x6d8] sm:$0xff] }
 0x25d   : > { %7732 = vmatpush3.bf16.msra.mxu0 %v7729_v0  ;;  %v5086_v0 = vld [vmem:[%s10500_s2 + $0x5e8] sm:$0xff] }
 0x25e   : > { %7734 = vmatprep.subr.bf16.mxu0 %v7733_v6  ;;  %v7761_v5 = vpack.c.bf16 %v5086_v0, %v5085_v62  ;;  %v9722_v62 = vld [vmem:[#allocation3 + $0x92] sm:$0xff]  ;;  %v5101_v0 = vld [vmem:[%s10500_s2 + $0x6e0] sm:$0xff] }
 0x261   : > { %7736 = vmatpush3.bf16.msra.mxu0 %v7733_v6  ;;  %v5087_v6 = vld [vmem:[%s10500_s2 + $0x5f0] sm:$0xff] }
 0x262   : > { %7738 = vmatprep.subr.bf16.mxu0 %v7737_v47  ;;  %v7765_v29 = vpack.c.bf16 %v5088_v11, %v5087_v6  ;;  %v9732_v6 = vld [vmem:[#allocation3 + $0x9a] sm:$0xff] }
 0x264   : > { %6676 = vmatmul.mubr.f32.vlgmr.msra.gmra.mrb[0].mxu0 %v9414_v25  ;;  %v7749_v25 = vpack.c.bf16 %v5080_v51, %v5079_v50  ;;  %v5095_v51 = vld [vmem:[%s10500_s2 + $0x6b0] sm:$0xff] }
 0x265   : > { %7740 = vmatpush3.bf16.msra.mxu0 %v7737_v47  ;;  %6678 = vmatprep.mubr.f32.mxu0 %v9416_v30  ;;  %v5089_v47 = vld [vmem:[%s10500_s2 + $0x680] sm:$0xff] }
 0x266   : > { %7742 = vmatprep.subr.bf16.mxu0 %v7741_v14  ;;  %v7769_v22 = vpack.c.bf16 %v5090_v13, %v5089_v47  ;;  %v5104_v47 = vld [vmem:[%s10500_s2 + $0x6f8] sm:$0xff] }
 0x268   : > { %6679 = vmatmul.mubr.f32.gmra.mrb[2].mxu0 %v9426_v32 }
 0x269   : > { %7744 = vmatpush3.bf16.msra.mxu0 %v7741_v14  ;;  %6681 = vmatprep.mubr.f32.mxu0 %v9428_v39  ;;  %v5091_v14 = vld [vmem:[%s10500_s2 + $0x690] sm:$0xff] }
 0x26a   : > { %7746 = vmatprep.subr.bf16.mxu0 %v7745_v45 }
 0x26c   : > { %6682 = vmatmul.mubr.f32.gmra.mrb[4].mxu0 %v9438_v43 }
 0x26d   : > { %7748 = vmatpush3.bf16.msra.mxu0 %v7745_v45  ;;  %6684 = vmatprep.mubr.f32.mxu0 %v9440_v44  ;;  %v5094_v45 = vld [vmem:[%s10500_s2 + $0x6a8] sm:$0xff] }
 0x26e   : > { %7750 = vmatprep.subr.bf16.mxu0 %v7749_v25  ;;  %v7777_v50 = vpack.c.bf16 %v5094_v45, %v5093_v24  ;;  %v5109_v45 = vld [vmem:[%s10500_s2 + $0x7a0] sm:$0xff] }
 0x270   : > { %6685 = vmatmul.mubr.f32.gmra.mrb[6].mxu0 %v9450_v52 }
 0x271   : > { %7752 = vmatpush3.bf16.msra.mxu0 %v7749_v25  ;;  %6687 = vmatprep.mubr.f32.mxu0 %v9452_v21  ;;  %v5096_v25 = vld [vmem:[%s10500_s2 + $0x6b8] sm:$0xff] }
 0x272   : > { %7754 = vmatprep.subr.bf16.mxu0 %v7753_v18 }
 0x274   : > { %6688 = vmatmul.mubr.f32.gmra.mrb[8].mxu0 %v9462_v10 }
 0x275   : > { %7756 = vmatpush3.bf16.msra.mxu0 %v7753_v18  ;;  %6690 = vmatprep.mubr.f32.mxu0 %v9658_v31  ;;  %v7785_v18 = vpack.c.bf16 %v5098_v12, %v5097_v37  ;;  %v5114_v37 = vld [vmem:[%s10500_s2 + $0x7c8] sm:$0xff]  ;;  %v5116_v12 = vld [vmem:[%s10500_s2 + $0x7d8] sm:$0xff] }
 0x276   : > { %7758 = vmatprep.subr.bf16.mxu0 %v7757_v7 }
 0x278   : > { %6691 = vmatmul.mubr.f32.gmra.mrb[10].mxu0 %v9668_v4 }
 0x279   : > { %7760 = vmatpush3.bf16.msra.mxu0 %v7757_v7  ;;  %6725 = vmatprep.mubr.f32.mxu0 %v9483_v34  ;;  %v5092_v34 = vld [vmem:[%s10500_s2 + $0x698] sm:$0xff]  ;;  %v7789_v7 = vpack.c.bf16 %v5100_v55, %v5099_v49  ;;  %v5118_v49 = vld [vmem:[%s10500_s2 + $0x7e8] sm:$0xff]  ;;  %v2928_v55 = vld [vmem:[#allocation3 + $0xb0] sm:$0xff] }
 0x27a   : > { %7762 = vmatprep.subr.bf16.mxu0 %v7761_v5  ;;  %v7773_v15 = vpack.c.bf16 %v5092_v34, %v5091_v14  ;;  %v5106_v14 = vld [vmem:[%s10500_s2 + $0x788] sm:$0xff] }
 0x27d   : > { %7764 = vmatpush3.bf16.msra.mxu0 %v7761_v5  ;;  %v5102_v5 = vld [vmem:[%s10500_s2 + $0x6e8] sm:$0xff] }
 0x27e   : > { %7766 = vmatprep.subr.bf16.mxu0 %v7765_v29  ;;  %v7793_v11 = vpack.c.bf16 %v5102_v5, %v5101_v0  ;;  %v5122_v5 = vld [vmem:[%s10500_s2 + $0x888] sm:$0xff] }
 0x281   : > { %7768 = vmatpush3.bf16.msra.mxu0 %v7765_v29  ;;  %v5103_v29 = vld [vmem:[%s10500_s2 + $0x6f0] sm:$0xff] }
 0x282   : > { %7770 = vmatprep.subr.bf16.mxu0 %v7769_v22  ;;  %v7797_v13 = vpack.c.bf16 %v5104_v47, %v5103_v29  ;;  %v5123_v29 = vld [vmem:[%s10500_s2 + $0x890] sm:$0xff] }
 0x284   : > { %6726 = vmatmul.mubr.f32.vlgmr.msra.gmra.mrb[0].mxu0 %v9492_v42  ;;  %v7781_v42 = vpack.c.bf16 %v5096_v25, %v5095_v51  ;;  %v5111_v25 = vld [vmem:[%s10500_s2 + $0x7b0] sm:$0xff] }
 0x285   : > { %7772 = vmatpush3.bf16.msra.mxu0 %v7769_v22  ;;  %6728 = vmatprep.mubr.f32.mxu0 %v9494_v17  ;;  %v5105_v22 = vld [vmem:[%s10500_s2 + $0x780] sm:$0xff] }
 0x286   : > { %7774 = vmatprep.subr.bf16.mxu0 %v7773_v15  ;;  %v7801_v34 = vpack.c.bf16 %v5106_v14, %v5105_v22  ;;  %v5126_v22 = vld [vmem:[%s10500_s2 + $0x8a8] sm:$0xff] }
 0x288   : > { %6729 = vmatmul.mubr.f32.gmra.mrb[2].mxu0 %v9504_v27 }
 0x289   : > { %7776 = vmatpush3.bf16.msra.mxu0 %v7773_v15  ;;  %6731 = vmatprep.mubr.f32.mxu0 %v9506_v2  ;;  %v5107_v15 = vld [vmem:[%s10500_s2 + $0x790] sm:$0xff] }
 0x28a   : > { %7778 = vmatprep.subr.bf16.mxu0 %v7777_v50 }
 0x28c   : > { %6732 = vmatmul.mubr.f32.gmra.mrb[4].mxu0 %v9516_v40 }
 0x28d   : > { %7780 = vmatpush3.bf16.msra.mxu0 %v7777_v50  ;;  %6734 = vmatprep.mubr.f32.mxu0 %v9518_v48  ;;  %v5110_v50 = vld [vmem:[%s10500_s2 + $0x7a8] sm:$0xff] }
 0x28e   : > { %7782 = vmatprep.subr.bf16.mxu0 %v7781_v42  ;;  %v7809_v51 = vpack.c.bf16 %v5110_v50, %v5109_v45  ;;  %v3092_v45 = vld [vmem:[#allocation3 + $0xa9] sm:$0xff] }
 0x28f   : > { %v5134_v50 = vld [vmem:[%s10500_s2 + $0x8e8] sm:$0xff] }
 0x290   : > { %6735 = vmatmul.mubr.f32.gmra.mrb[6].mxu0 %v9528_v56 }
 0x291   : > { %7784 = vmatpush3.bf16.msra.mxu0 %v7781_v42  ;;  %6737 = vmatprep.mubr.f32.mxu0 %v9530_v28  ;;  %v5112_v42 = vld [vmem:[%s10500_s2 + $0x7b8] sm:$0xff] }
 0x292   : > { %7786 = vmatprep.subr.bf16.mxu0 %v7785_v18 }
 0x294   : > { %6738 = vmatmul.mubr.f32.gmra.mrb[8].mxu0 %v9540_v36 }
 0x295   : > { %7788 = vmatpush3.bf16.msra.mxu0 %v7785_v18  ;;  %6740 = vmatprep.mubr.f32.mxu0 %v9722_v62  ;;  %v2927_v18 = vld [vmem:[#allocation3 + $0xa8] sm:$0xff] }
 0x296   : > { %7790 = vmatprep.subr.bf16.mxu0 %v7789_v7 }
 0x298   : > { %6741 = vmatmul.mubr.f32.gmra.mrb[10].mxu0 %v9732_v6 }
 0x299   : > { %7792 = vmatpush3.bf16.msra.mxu0 %v7789_v7  ;;  %6775 = vmatprep.mubr.f32.mxu0 %v9338_v54  ;;  %v5108_v54 = vld [vmem:[%s10500_s2 + $0x798] sm:$0xff] }
 0x29a   : > { %7794 = vmatprep.subr.bf16.mxu0 %v7793_v11  ;;  %v7805_v24 = vpack.c.bf16 %v5108_v54, %v5107_v15  ;;  %v5120_v7 = vld [vmem:[%s10500_s2 + $0x7f8] sm:$0xff]  ;;  %v5130_v54 = vld [vmem:[%s10500_s2 + $0x8c8] sm:$0xff] }
 0x29b   : > { %v5128_v15 = vld [vmem:[%s10500_s2 + $0x8b8] sm:$0xff] }
 0x29d   : > { %7796 = vmatpush3.bf16.msra.mxu0 %v7793_v11 }
 0x29e   : > { %7798 = vmatprep.subr.bf16.mxu0 %v7797_v13 }
 0x2a1   : > { %7800 = vmatpush3.bf16.msra.mxu0 %v7797_v13  ;;  %v5125_v13 = vld [vmem:[%s10500_s2 + $0x8a0] sm:$0xff] }
 0x2a2   : > { %7802 = vmatprep.subr.bf16.mxu0 %v7801_v34  ;;  %v7841_v14 = vpack.c.bf16 %v5126_v22, %v5125_v13 }
 0x2a4   : > { %6776 = vmatmul.mubr.f32.vlgmr.msra.gmra.mrb[0].mxu0 %v9348_v23  ;;  %v7813_v23 = vpack.c.bf16 %v5112_v42, %v5111_v25  ;;  %v5136_v25 = vld [vmem:[%s10500_s2 + $0x8f8] sm:$0xff] }
 0x2a5   : > { %7804 = vmatpush3.bf16.msra.mxu0 %v7801_v34  ;;  %6778 = vmatprep.mubr.f32.mxu0 %v9350_v57  ;;  %v5113_v57 = vld [vmem:[%s10500_s2 + $0x7c0] sm:$0xff]  ;;  %v5127_v34 = vld [vmem:[%s10500_s2 + $0x8b0] sm:$0xff] }
 0x2a6   : > { %7806 = vmatprep.subr.bf16.mxu0 %v7805_v24 }
 0x2a8   : > { %6779 = vmatmul.mubr.f32.gmra.mrb[2].mxu0 %v9360_v26  ;;  %v7817_v26 = vpack.c.bf16 %v5114_v37, %v5113_v57 }
 0x2a9   : > { %7808 = vmatpush3.bf16.msra.mxu0 %v7805_v24  ;;  %6781 = vmatprep.mubr.f32.mxu0 %v9362_v58  ;;  %v5115_v58 = vld [vmem:[%s10500_s2 + $0x7d0] sm:$0xff]  ;;  %v5132_v24 = vld [vmem:[%s10500_s2 + $0x8d8] sm:$0xff] }
 0x2aa   : > { %7810 = vmatprep.subr.bf16.mxu0 %v7809_v51 }
 0x2ac   : > { %6782 = vmatmul.mubr.f32.gmra.mrb[4].mxu0 %v9372_v33  ;;  %v7821_v33 = vpack.c.bf16 %v5116_v12, %v5115_v58 }
 0x2ad   : > { %7812 = vmatpush3.bf16.msra.mxu0 %v7809_v51  ;;  %6784 = vmatprep.mubr.f32.mxu0 %v9374_v61  ;;  %v5117_v61 = vld [vmem:[%s10500_s2 + $0x7e0] sm:$0xff]  ;;  %v3093_v51 = vld [vmem:[#allocation3 + $0xb1] sm:$0xff] }
 0x2ae   : > { %7814 = vmatprep.subr.bf16.mxu0 %v7813_v23 }
 0x2b0   : > { %6785 = vmatmul.mubr.f32.gmra.mrb[6].mxu0 %v9384_v20  ;;  %v7825_v20 = vpack.c.bf16 %v5118_v49, %v5117_v61 }
 0x2b1   : > { %7816 = vmatpush3.bf16.msra.mxu0 %v7813_v23  ;;  %6787 = vmatprep.mubr.f32.mxu0 %v9594_v59  ;;  %v5119_v59 = vld [vmem:[%s10500_s2 + $0x7f0] sm:$0xff] }
 0x2b2   : > { %7818 = vmatprep.subr.bf16.mxu0 %v7817_v26  ;;  %v7829_v0 = vpack.c.bf16 %v5120_v7, %v5119_v59 }
 0x2b4   : > { %6788 = vmatmul.mubr.f32.gmra.mrb[8].mxu0 %v9604_v16  ;;  %v5121_v16 = vld [vmem:[%s10500_s2 + $0x880] sm:$0xff] }
 0x2b5   : > { %7820 = vmatpush3.bf16.msra.mxu0 %v7817_v26  ;;  %6790 = vmatprep.mubr.f32.mxu0 %v2927_v18  ;;  %v7833_v11 = vpack.c.bf16 %v5122_v5, %v5121_v16 }
 0x2b6   : > { %7822 = vmatprep.subr.bf16.mxu0 %v7821_v33 }
 0x2b8   : > { %6791 = vmatmul.mubr.f32.gmra.mrb[10].mxu0 %v2928_v55 }
 0x2b9   : > { %7824 = vmatpush3.bf16.msra.mxu0 %v7821_v33  ;;  %6825 = vmatprep.mubr.f32.mxu0 %v9416_v30  ;;  %v5124_v30 = vld [vmem:[%s10500_s2 + $0x898] sm:$0xff] }
 0x2ba   : > { %7826 = vmatprep.subr.bf16.mxu0 %v7825_v20  ;;  %v7837_v47 = vpack.c.bf16 %v5124_v30, %v5123_v29 }
 0x2bd   : > { %7828 = vmatpush3.bf16.msra.mxu0 %v7825_v20 }
 0x2be   : > { %7830 = vmatprep.subr.bf16.mxu0 %v7829_v0 }
 0x2c1   : > { %7832 = vmatpush3.bf16.msra.mxu0 %v7829_v0 }
 0x2c2   : > { %7834 = vmatprep.subr.bf16.mxu0 %v7833_v11 }
 0x2c4   : > { %6826 = vmatmul.mubr.f32.vlgmr.msra.gmra.mrb[0].mxu0 %v9426_v32  ;;  %v7845_v32 = vpack.c.bf16 %v5128_v15, %v5127_v34 }
 0x2c5   : > { %7836 = vmatpush3.bf16.msra.mxu0 %v7833_v11  ;;  %6828 = vmatprep.mubr.f32.mxu0 %v9428_v39  ;;  %v5129_v39 = vld [vmem:[%s10500_s2 + $0x8c0] sm:$0xff] }
 0x2c6   : > { %7838 = vmatprep.subr.bf16.mxu0 %v7837_v47 }
 0x2c8   : > { %6829 = vmatmul.mubr.f32.gmra.mrb[2].mxu0 %v9438_v43  ;;  %v7849_v43 = vpack.c.bf16 %v5130_v54, %v5129_v39 }
 0x2c9   : > { %7840 = vmatpush3.bf16.msra.mxu0 %v7837_v47  ;;  %6831 = vmatprep.mubr.f32.mxu0 %v9440_v44  ;;  %v5131_v44 = vld [vmem:[%s10500_s2 + $0x8d0] sm:$0xff] }
 0x2ca   : > { %7842 = vmatprep.subr.bf16.mxu0 %v7841_v14 }
 0x2cc   : > { %6832 = vmatmul.mubr.f32.gmra.mrb[4].mxu0 %v9450_v52  ;;  %v7853_v52 = vpack.c.bf16 %v5132_v24, %v5131_v44 }
 0x2cd   : > { %7844 = vmatpush3.bf16.msra.mxu0 %v7841_v14  ;;  %6834 = vmatprep.mubr.f32.mxu0 %v9452_v21  ;;  %v5133_v21 = vld [vmem:[%s10500_s2 + $0x8e0] sm:$0xff] }
 0x2ce   : > { %7846 = vmatprep.subr.bf16.mxu0 %v7845_v32 }
 0x2d0   : > { %6835 = vmatmul.mubr.f32.gmra.mrb[6].mxu0 %v9462_v10  ;;  %v7857_v10 = vpack.c.bf16 %v5134_v50, %v5133_v21 }
 0x2d1   : > { %7848 = vmatpush3.bf16.msra.mxu0 %v7845_v32  ;;  %6837 = vmatprep.mubr.f32.mxu0 %v9658_v31  ;;  %v5135_v31 = vld [vmem:[%s10500_s2 + $0x8f0] sm:$0xff] }
 0x2d2   : > { %7850 = vmatprep.subr.bf16.mxu0 %v7849_v43  ;;  %v7861_v42 = vpack.c.bf16 %v5136_v25, %v5135_v31 }
 0x2d4   : > { %6838 = vmatmul.mubr.f32.gmra.mrb[8].mxu0 %v9668_v4  ;;  %v3258_v4 = vld [vmem:[#allocation3 + $0xb2] sm:$0xff] }
 0x2d5   : > { %7852 = vmatpush3.bf16.msra.mxu0 %v7849_v43  ;;  %6840 = vmatprep.mubr.f32.mxu0 %v3092_v45 }
 0x2d6   : > { %7854 = vmatprep.subr.bf16.mxu0 %v7853_v52 }
 0x2d8   : > { %6841 = vmatmul.mubr.f32.gmra.mrb[10].mxu0 %v3093_v51 }
 0x2d9   : > { %7856 = vmatpush3.bf16.msra.mxu0 %v7853_v52  ;;  %6875 = vmatprep.mubr.f32.mxu0 %v9494_v17  ;;  %v3257_v17 = vld [vmem:[#allocation3 + $0xaa] sm:$0xff] }
 0x2da   : > { %7858 = vmatprep.subr.bf16.mxu0 %v7857_v10 }
 0x2dd   : > { %7860 = vmatpush3.bf16.msra.mxu0 %v7857_v10 }
 0x2de   : > { %7862 = vmatprep.subr.bf16.mxu0 %v7861_v42 }
 0x2e1   : > { %7864 = vmatpush3.bf16.msra.mxu0 %v7861_v42 }
 0x2e4   : > { %6876 = vmatmul.mubr.f32.vlgmr.msra.gmra.mrb[0].mxu0 %v9504_v27 }
 0x2e5   : > { %6878 = vmatprep.mubr.f32.mxu0 %v9506_v2  ;;  %v5137_v2 = vld [vmem:[%s10501_s3] ss:$0 sm:$0xff] }
 0x2e8   : > { %6879 = vmatmul.mubr.f32.gmra.mrb[2].mxu0 %v9516_v40 }
 0x2e9   : > { %6881 = vmatprep.mubr.f32.mxu0 %v9518_v48 }
 0x2ec   : > { %6882 = vmatmul.mubr.f32.gmra.mrb[4].mxu0 %v9528_v56 }
 0x2ed   : > { %6884 = vmatprep.mubr.f32.mxu0 %v9530_v28 }
 0x2f0   : > { %6885 = vmatmul.mubr.f32.gmra.mrb[6].mxu0 %v9540_v36 }
 0x2f1   : > { %6887 = vmatprep.mubr.f32.mxu0 %v9722_v62 }
 0x2f4   : > { %6888 = vmatmul.mubr.f32.gmra.mrb[8].mxu0 %v9732_v6 }
 0x2f5   : > { %6890 = vmatprep.mubr.f32.mxu0 %v3257_v17 }
 0x2f8   : > { %6891 = vmatmul.mubr.f32.gmra.mrb[10].mxu0 %v3258_v4 }
 0x3b7   : > { %v6877_v27 = vpop.f32.mrb[0].mxu0 }
 0x3b8   : > { %v8169_v40 = vadd.f32 %v6877_v27, %v9243_v38  ;;  %v3341_v48 = vpop.f32.mrb[1].mxu0 }
 0x3b9   : > { %v8170_v56 = vadd.f32 %v3341_v48, %v9245_v41 }
 0x3ba   : > { %v3420_v28 = vadd.f32 %v8169_v40, %v5137_v2 }
 0x3bb   : > { %v3419_v36 = vadd.f32 %v8170_v56, %v5137_v2  ;;  %v6880_v23 = vpop.f32.mrb[2].mxu0 }
 0x3bc   : > { %v3432_v62 = vmax.f32 %v3420_v28, 0.0  ;;  %v8171_v57 = vadd.f32 %v6880_v23, %v9247_v1  ;;  %v3351_v6 = vpop.f32.mrb[3].mxu0 }
 0x3bd   : > { %v3431_v37 = vmax.f32 %v3419_v36, 0.0  ;;  %v8172_v26 = vadd.f32 %v3351_v6, %v9249_v8 }
 0x3be   : > { %3444 = vst [vmem:[#allocation4 + $0x9] sm:$0xff] %v3432_v62  ;;  %v3422_v58 = vadd.f32 %v8171_v57, %v5137_v2 }
 0x3bf   : > { %3443 = vst [vmem:[#allocation4 + $0x1] sm:$0xff] %v3431_v37  ;;  %v3421_v12 = vadd.f32 %v8172_v26, %v5137_v2  ;;  %v6883_v33 = vpop.f32.mrb[4].mxu0 }
 0x3c0   : > { %v3434_v18 = vmax.f32 %v3422_v58, 0.0  ;;  %v8173_v38 = vadd.f32 %v6883_v33, %v9251_v9  ;;  %v3361_v61 = vpop.f32.mrb[5].mxu0 }
 0x3c1   : > { %v3433_v41 = vmax.f32 %v3421_v12, 0.0  ;;  %v8174_v49 = vadd.f32 %v3361_v61, %v9253_v19 }
 0x3c2   : > { %3446 = vst [vmem:[#allocation4 + $0x21] sm:$0xff] %v3434_v18  ;;  %v3424_v55 = vadd.f32 %v8173_v38, %v5137_v2 }
 0x3c3   : > { %3445 = vst [vmem:[#allocation4 + $0x19] sm:$0xff] %v3433_v41  ;;  %v3423_v1 = vadd.f32 %v8174_v49, %v5137_v2  ;;  %v6886_v20 = vpop.f32.mrb[6].mxu0 }
 0x3c4   : > { %v3436_v59 = vmax.f32 %v3424_v55, 0.0  ;;  %v8175_v8 = vadd.f32 %v6886_v20, %v9255_v35  ;;  %v3371_v7 = vpop.f32.mrb[7].mxu0 }
 0x3c5   : > { %v3435_v0 = vmax.f32 %v3423_v1, 0.0  ;;  %v8176_v16 = vadd.f32 %v3371_v7, %v9257_v46 }
 0x3c6   : > { %3448 = vst [vmem:[#allocation4 + $0x39] sm:$0xff] %v3436_v59  ;;  %v3426_v5 = vadd.f32 %v8175_v8, %v5137_v2 }
 0x3c7   : > { %3447 = vst [vmem:[#allocation4 + $0x31] sm:$0xff] %v3435_v0  ;;  %v3425_v9 = vadd.f32 %v8176_v16, %v5137_v2  ;;  %v6889_v11 = vpop.f32.mrb[8].mxu0 }
 0x3c8   : > { %v3438_v29 = vmax.f32 %v3426_v5, 0.0  ;;  %v8177_v19 = vadd.f32 %v6889_v11, %v9259_v53  ;;  %v3381_v30 = vpop.f32.mrb[9].mxu0 }
 0x3c9   : > { %v3437_v47 = vmax.f32 %v3425_v9, 0.0  ;;  %v8178_v13 = vadd.f32 %v3381_v30, %v9261_v60  ;;  %v8525_v60 = vmov (!%p5138_p7), 0.0  }
 0x3ca   : > { %3450 = vst [vmem:[#allocation4 + $0x51] sm:$0xff] %v3438_v29  ;;  %v3428_v22 = vadd.f32 %v8177_v19, %v5137_v2  ;;  %3459 = vst [vmem:[#allocation4] sm:$0xff] (!%p5138_p7), %v8525_v60 }
 0x3cb   : > { %3449 = vst [vmem:[#allocation4 + $0x49] sm:$0xff] %v3437_v47  ;;  %v3427_v35 = vadd.f32 %v8178_v13, %v5137_v2  ;;  %v6892_v14 = vpop.f32.mrb[10].mxu0  ;;  %3460 = vst [vmem:[#allocation4 + $0x8] sm:$0xff] (!%p5138_p7), %v8525_v60 }
 0x3cc   : > { %v3440_v34 = vmax.f32 %v3428_v22, 0.0  ;;  %v8179_v46 = vadd.f32 %v6892_v14, %v9263_v63  ;;  %v3391_v15 = vpop.f32.mrb[11].mxu0  ;;  %3461 = vst [vmem:[#allocation4 + $0x10] sm:$0x3] (!%p5138_p7), %v8525_v60 }
 0x3cd   : > { %v3439_v32 = vmax.f32 %v3427_v35, 0.0  ;;  %v8180_v39 = vadd.f32 %v3391_v15, %v9265_v3  ;;  %3458 = sbr.rel (%p5138_p7) target bundleno = 980 (0x3d4), region = 114 }
 0x3ce   : > { %3452 = vst [vmem:[#allocation4 + $0x69] sm:$0xff] %v3440_v34  ;;  %v3430_v54 = vadd.f32 %v8179_v46, %v5137_v2 }
 0x3cf   : > { %3451 = vst [vmem:[#allocation4 + $0x61] sm:$0xff] %v3439_v32  ;;  %v3429_v53 = vadd.f32 %v8180_v39, %v5137_v2 }
 0x3d0   : > { %v3442_v43 = vmax.f32 %v3430_v54, 0.0 }
 0x3d1   : > { %v3441_v44 = vmax.f32 %v3429_v53, 0.0 }
 0x3d2   : > { %3454 = vst [vmem:[#allocation4 + $0x81] sm:$0xff] %v3442_v43 }
 0x3d3   : > { %3453 = vst [vmem:[#allocation4 + $0x79] sm:$0xff] %v3441_v44 }
 0x3d4 PF: > { %p5139_p8 = scmp.ne.s32.totalorder %s8506_s21, 3 }
 0x3d5   : > { %v8526_v63 = vmov (!%p5139_p8), 0.0  }
 0x3d6   : > { %3465 = sbr.rel (%p5139_p8) target bundleno = 989 (0x3dd), region = 118  ;;  %3467 = vst [vmem:[#allocation4 + $0x78] sm:$0xff] (!%p5139_p8), %v8526_v63  ;;  %3468 = vst [vmem:[#allocation4 + $0x80] sm:$0xff] (!%p5139_p8), %v8526_v63 }
 0x3d7   : > { %3469 = vst [vmem:[#allocation4 + $0x88] sm:$0x3] (!%p5139_p8), %v8526_v63 }
 0x3dd PF: > { %v5140_v3 = vld [vmem:[%s10502_s4 + $0x80] sm:$0xff]  ;;  %v5141_v24 = vld [vmem:[%s10502_s4 + $0x88] sm:$0xff]  ;;  %v5142_v52 = vld [vmem:[%s10502_s4 + $0x90] sm:$0xff] }
 0x3de   : > { %v7865_v45 = vpack.c.bf16 %v5141_v24, %v5140_v3  ;;  %v5143_v21 = vld [vmem:[%s10502_s4 + $0x98] sm:$0xff]  ;;  %v5144_v51 = vld [vmem:[%s10502_s4 + $0xa0] sm:$0xff]  ;;  %v5145_v10 = vld [vmem:[%s10502_s4 + $0xa8] sm:$0xff] }
 0x3df   : > { %v7869_v50 = vpack.c.bf16 %v5143_v21, %v5142_v52  ;;  %v7873_v31 = vpack.c.bf16 %v5145_v10, %v5144_v51  ;;  %v3494_v25 = vld [vmem:[#allocation4 + $0x1] sm:$0xff]  ;;  %v5146_v42 = vld [vmem:[%s10502_s4 + $0xb0] sm:$0xff]  ;;  %v5147_v17 = vld [vmem:[%s10502_s4 + $0xb8] sm:$0xff] }
 0x3e0   : > { %7866 = vmatprep.subr.bf16.mxu1 %v7865_v45  ;;  %6925 = vmatprep.mubr.f32.mxu1 %v3494_v25  ;;  %v7877_v4 = vpack.c.bf16 %v5147_v17, %v5146_v42  ;;  %v5148_v27 = vld [vmem:[%s10502_s4 + $0xc0] sm:$0xff]  ;;  %v5149_v2 = vld [vmem:[%s10502_s4 + $0xc8] sm:$0xff]  ;;  %v5150_v48 = vld [vmem:[%s10502_s4 + $0xd0] sm:$0xff] }
 0x3e1   : > { %7868 = vmatpush3.bf16.msra.mxu1 %v7865_v45  ;;  %v7881_v40 = vpack.c.bf16 %v5149_v2, %v5148_v27  ;;  %v5151_v56 = vld [vmem:[%s10502_s4 + $0xd8] sm:$0xff]  ;;  %v5152_v36 = vld [vmem:[%s10502_s4 + $0xe0] sm:$0xff]  ;;  %v5153_v23 = vld [vmem:[%s10502_s4 + $0xe8] sm:$0xff] }
 0x3e2   : > { %7870 = vmatprep.subr.bf16.mxu1 %v7869_v50  ;;  %v7885_v28 = vpack.c.bf16 %v5151_v56, %v5150_v48  ;;  %v7889_v62 = vpack.c.bf16 %v5153_v23, %v5152_v36  ;;  %v5154_v57 = vld [vmem:[%s10502_s4 + $0xf0] sm:$0xff]  ;;  %v5155_v6 = vld [vmem:[%s10502_s4 + $0xf8] sm:$0xff]  ;;  %v3478_v26 = vld [vmem:[%s10502_s4] sm:$0xff] }
 0x3e3   : > { %v7893_v37 = vpack.c.bf16 %v5155_v6, %v5154_v57  ;;  %v3479_v58 = vld [vmem:[%s10502_s4 + $0x8] sm:$0xff]  ;;  %v9938_v12 = vld [vmem:[#allocation4 + $0x32] sm:$0xff]  ;;  %v3482_v55 = vld [vmem:[%s10502_s4 + $0x20] sm:$0xff] }
 0x3e4   : > { %7277 = vmatprep.mubr.f32.mxu0 %v9938_v12  ;;  %v7897_v33 = vpack.c.bf16 %v3479_v58, %v3478_v26  ;;  %v3480_v18 = vld [vmem:[%s10502_s4 + $0x10] sm:$0xff]  ;;  %v3481_v38 = vld [vmem:[%s10502_s4 + $0x18] sm:$0xff]  ;;  %v3483_v1 = vld [vmem:[%s10502_s4 + $0x28] sm:$0xff] }
 0x3e5   : > { %7872 = vmatpush3.bf16.msra.mxu1 %v7869_v50  ;;  %v3495_v61 = vld [vmem:[#allocation4 + $0x9] sm:$0xff]  ;;  %v7901_v41 = vpack.c.bf16 %v3481_v38, %v3480_v18  ;;  %v9947_v49 = vld [vmem:[#allocation4 + $0x19] sm:$0xff]  ;;  %v9956_v20 = vld [vmem:[#allocation4 + $0x21] sm:$0xff]  ;;  %v7905_v59 = vpack.c.bf16 %v3483_v1, %v3482_v55 }
 0x3e6   : > { %7874 = vmatprep.subr.bf16.mxu1 %v7873_v31  ;;  %v9958_v8 = vld [vmem:[#allocation4 + $0x31] sm:$0xff]  ;;  %v9968_v16 = vld [vmem:[#allocation4 + $0x39] sm:$0xff]  ;;  %v9970_v9 = vld [vmem:[#allocation4 + $0x49] sm:$0xff] }
 0x3e7   : > { %v3484_v7 = vld [vmem:[%s10502_s4 + $0x30] sm:$0xff]  ;;  %v3485_v0 = vld [vmem:[%s10502_s4 + $0x38] sm:$0xff]  ;;  %v3486_v11 = vld [vmem:[%s10502_s4 + $0x40] sm:$0xff] }
 0x3e8   : > { %v7909_v5 = vpack.c.bf16 %v3485_v0, %v3484_v7  ;;  %v3487_v29 = vld [vmem:[%s10502_s4 + $0x48] sm:$0xff]  ;;  %v9980_v19 = vld [vmem:[#allocation4 + $0x51] sm:$0xff]  ;;  %v3470_v47 = vld [vmem:[#allocation4] sm:$0xff] }
 0x3e9   : > { %7876 = vmatpush3.bf16.msra.mxu1 %v7873_v31  ;;  %v7913_v30 = vpack.c.bf16 %v3487_v29, %v3486_v11  ;;  %v3488_v13 = vld [vmem:[%s10502_s4 + $0x50] sm:$0xff]  ;;  %v3489_v22 = vld [vmem:[%s10502_s4 + $0x58] sm:$0xff]  ;;  %v3490_v14 = vld [vmem:[%s10502_s4 + $0x60] sm:$0xff] }
 0x3ea   : > { %7878 = vmatprep.subr.bf16.mxu1 %v7877_v4  ;;  %v7917_v35 = vpack.c.bf16 %v3489_v22, %v3488_v13  ;;  %v3491_v34 = vld [vmem:[%s10502_s4 + $0x68] sm:$0xff]  ;;  %v3492_v15 = vld [vmem:[%s10502_s4 + $0x70] sm:$0xff]  ;;  %v3493_v32 = vld [vmem:[%s10502_s4 + $0x78] sm:$0xff] }
 0x3eb   : > { %v7921_v46 = vpack.c.bf16 %v3491_v34, %v3490_v14  ;;  %v7925_v39 = vpack.c.bf16 %v3493_v32, %v3492_v15  ;;  %v5156_v54 = vld [vmem:[%s10502_s4 + $0x100] sm:$0xff]  ;;  %v5157_v53 = vld [vmem:[%s10502_s4 + $0x108] sm:$0xff]  ;;  %v5158_v44 = vld [vmem:[%s10502_s4 + $0x110] sm:$0xff] }
 0x3ec   : > { %v7929_v43 = vpack.c.bf16 %v5157_v53, %v5156_v54  ;;  %v5159_v60 = vld [vmem:[%s10502_s4 + $0x118] sm:$0xff]  ;;  %v3471_v63 = vld [vmem:[#allocation4 + $0x8] sm:$0xff]  ;;  %v5160_v52 = vld [vmem:[%s10502_s4 + $0x120] sm:$0xff] }
 0x3ed   : > { %7880 = vmatpush3.bf16.msra.mxu1 %v7877_v4  ;;  %v7933_v3 = vpack.c.bf16 %v5159_v60, %v5158_v44  ;;  %v10013_v24 = vld [vmem:[#allocation4 + $0x18] sm:$0xff]  ;;  %v5161_v45 = vld [vmem:[%s10502_s4 + $0x128] sm:$0xff]  ;;  %v10022_v21 = vld [vmem:[#allocation4 + $0x20] sm:$0xff] }
 0x3ee   : > { %7882 = vmatprep.subr.bf16.mxu1 %v7881_v40  ;;  %v7937_v50 = vpack.c.bf16 %v5161_v45, %v5160_v52  ;;  %v10024_v51 = vld [vmem:[#allocation4 + $0x30] sm:$0xff]  ;;  %v5163_v31 = vld [vmem:[%s10502_s4 + $0x138] sm:$0xff]  ;;  %v10036_v17 = vld [vmem:[#allocation4 + $0x48] sm:$0xff] }
 0x3ef   : > { %v5162_v10 = vld [vmem:[%s10502_s4 + $0x130] sm:$0xff]  ;;  %v10034_v25 = vld [vmem:[#allocation4 + $0x38] sm:$0xff]  ;;  %v5164_v4 = vld [vmem:[%s10502_s4 + $0x140] sm:$0xff] }
 0x3f0   : > { %v7941_v42 = vpack.c.bf16 %v5163_v31, %v5162_v10  ;;  %v5165_v27 = vld [vmem:[%s10502_s4 + $0x148] sm:$0xff]  ;;  %v10046_v2 = vld [vmem:[#allocation4 + $0x50] sm:$0xff]  ;;  %v5168_v23 = vld [vmem:[%s10502_s4 + $0x160] sm:$0xff] }
 0x3f1   : > { %7884 = vmatpush3.bf16.msra.mxu1 %v7881_v40  ;;  %v7945_v40 = vpack.c.bf16 %v5165_v27, %v5164_v4  ;;  %v3729_v48 = vld [vmem:[#allocation4 + $0x2] sm:$0xff]  ;;  %v5166_v56 = vld [vmem:[%s10502_s4 + $0x150] sm:$0xff]  ;;  %v5255_v13 = vld [vmem:[%s10502_s4 + $0x418] sm:$0xff] }
 0x3f2   : > { %7886 = vmatprep.subr.bf16.mxu1 %v7885_v28  ;;  %v5170_v6 = vld [vmem:[%s10502_s4 + $0x170] sm:$0xff]  ;;  %v5172_v58 = vld [vmem:[%s10502_s4 + $0x180] sm:$0xff]  ;;  %v5253_v7 = vld [vmem:[%s10502_s4 + $0x408] sm:$0xff] }
 0x3f3   : > { %v5174_v38 = vld [vmem:[%s10502_s4 + $0x190] sm:$0xff]  ;;  %v5252_v55 = vld [vmem:[%s10502_s4 + $0x400] sm:$0xff]  ;;  %v5181_v53 = vld [vmem:[%s10502_s4 + $0x1c8] sm:$0xff] }
 0x3f4   : > { %v5176_v0 = vld [vmem:[%s10502_s4 + $0x1a0] sm:$0xff]  ;;  %v10093_v11 = vpack.c.bf16 %v5253_v7, %v5252_v55  ;;  %v5178_v22 = vld [vmem:[%s10502_s4 + $0x1b0] sm:$0xff]  ;;  %v5183_v45 = vld [vmem:[%s10502_s4 + $0x1d8] sm:$0xff] }
 0x3f5   : > { %7888 = vmatpush3.bf16.msra.mxu1 %v7885_v28  ;;  %v5167_v28 = vld [vmem:[%s10502_s4 + $0x158] sm:$0xff]  ;;  %v10096_v29 = vld [vmem:[#allocation4 + $0x22] sm:$0xff]  ;;  %v10121_v32 = vld [vmem:[#allocation4 + $0x4a] sm:$0xff] }
 0x3f6   : > { %7890 = vmatprep.subr.bf16.mxu1 %v7889_v62  ;;  %v7949_v36 = vpack.c.bf16 %v5167_v28, %v5166_v56  ;;  %8122 = vmatprep.subr.bf16.mxu0 %v10093_v11  ;;  %v10116_v34 = vld [vmem:[#allocation4 + $0x3a] sm:$0xff]  ;;  %v10138_v44 = vld [vmem:[#allocation4 + $0x52] sm:$0xff] }
 0x3f7   : > { %8124 = vmatpush3.bf16.msra.mxu0 %v10093_v11  ;;  %v5180_v54 = vld [vmem:[%s10502_s4 + $0x1c0] sm:$0xff]  ;;  %v5258_v60 = vld [vmem:[%s10502_s4 + $0x430] sm:$0xff]  ;;  %v5263_v56 = vld [vmem:[%s10502_s4 + $0x458] sm:$0xff] }
 0x3f8   : > { %v5182_v52 = vld [vmem:[%s10502_s4 + $0x1d0] sm:$0xff]  ;;  %v5260_v10 = vld [vmem:[%s10502_s4 + $0x440] sm:$0xff] }
 0x3f9   : > { %7892 = vmatpush3.bf16.msra.mxu1 %v7889_v62  ;;  %v5169_v62 = vld [vmem:[%s10502_s4 + $0x168] sm:$0xff]  ;;  %v7981_v31 = vpack.c.bf16 %v5183_v45, %v5182_v52  ;;  %v5184_v4 = vld [vmem:[%s10502_s4 + $0x1e0] sm:$0xff]  ;;  %v5186_v28 = vld [vmem:[%s10502_s4 + $0x1f0] sm:$0xff] }
 0x3fa   : > { %7894 = vmatprep.subr.bf16.mxu1 %v7893_v37  ;;  %v7953_v57 = vpack.c.bf16 %v5169_v62, %v5168_v23  ;;  %v5264_v62 = vld [vmem:[%s10502_s4 + $0x460] sm:$0xff]  ;;  %v5202_v52 = vld [vmem:[%s10502_s4 + $0x270] sm:$0xff] }
 0x3fb   : > { %v5192_v7 = vld [vmem:[%s10502_s4 + $0x220] sm:$0xff] }
 0x3fd   : > { %7896 = vmatpush3.bf16.msra.mxu1 %v7893_v37  ;;  %v5171_v37 = vld [vmem:[%s10502_s4 + $0x178] sm:$0xff] }
 0x3fe   : > { %7898 = vmatprep.subr.bf16.mxu1 %v7897_v33  ;;  %v7957_v26 = vpack.c.bf16 %v5171_v37, %v5170_v6  ;;  %v5265_v6 = vld [vmem:[%s10502_s4 + $0x468] sm:$0xff]  ;;  %v5188_v37 = vld [vmem:[%s10502_s4 + $0x200] sm:$0xff] }
 0x400   : > { %6926 = vmatmul.mubr.f32.vlgmr.msra.gmra.mrb[12].mxu1 %v3495_v61  ;;  %v5175_v61 = vld [vmem:[%s10502_s4 + $0x198] sm:$0xff] }
 0x401   : > { %7900 = vmatpush3.bf16.msra.mxu1 %v7897_v33  ;;  %6928 = vmatprep.mubr.f32.mxu1 %v9947_v49  ;;  %v5173_v33 = vld [vmem:[%s10502_s4 + $0x188] sm:$0xff]  ;;  %v7965_v1 = vpack.c.bf16 %v5175_v61, %v5174_v38  ;;  %v5267_v38 = vld [vmem:[%s10502_s4 + $0x478] sm:$0xff]  ;;  %v5190_v61 = vld [vmem:[%s10502_s4 + $0x210] sm:$0xff] }
 0x402   : > { %7902 = vmatprep.subr.bf16.mxu1 %v7901_v41  ;;  %v7961_v18 = vpack.c.bf16 %v5173_v33, %v5172_v58  ;;  %v10204_v58 = vpack.c.bf16 %v5265_v6, %v5264_v62  ;;  %v5211_v62 = vld [vmem:[%s10502_s4 + $0x2b8] sm:$0xff]  ;;  %v5212_v6 = vld [vmem:[%s10502_s4 + $0x2c0] sm:$0xff] }
 0x404   : > { %6929 = vmatmul.mubr.f32.gmra.mrb[14].mxu1 %v9956_v20 }
 0x405   : > { %7904 = vmatpush3.bf16.msra.mxu1 %v7901_v41  ;;  %6931 = vmatprep.mubr.f32.mxu1 %v9958_v8  ;;  %v3730_v41 = vld [vmem:[#allocation4 + $0xa] sm:$0xff] }
 0x406   : > { %7906 = vmatprep.subr.bf16.mxu1 %v7905_v59 }
 0x408   : > { %6932 = vmatmul.mubr.f32.gmra.mrb[16].mxu1 %v9968_v16 }
 0x409   : > { %7908 = vmatpush3.bf16.msra.mxu1 %v7905_v59  ;;  %6934 = vmatprep.mubr.f32.mxu1 %v9970_v9  ;;  %v10082_v59 = vld [vmem:[#allocation4 + $0x1a] sm:$0xff] }
 0x40a   : > { %7910 = vmatprep.subr.bf16.mxu1 %v7909_v5 }
 0x40c   : > { %6935 = vmatmul.mubr.f32.gmra.mrb[18].mxu1 %v9980_v19 }
 0x40d   : > { %7912 = vmatpush3.bf16.msra.mxu1 %v7909_v5  ;;  %6969 = vmatprep.mubr.f32.mxu1 %v3470_v47  ;;  %v5177_v5 = vld [vmem:[%s10502_s4 + $0x1a8] sm:$0xff] }
 0x40e   : > { %7914 = vmatprep.subr.bf16.mxu1 %v7913_v30  ;;  %v7969_v47 = vpack.c.bf16 %v5177_v5, %v5176_v0  ;;  %v5193_v0 = vld [vmem:[%s10502_s4 + $0x228] sm:$0xff] }
 0x40f   : > { %v8001_v5 = vpack.c.bf16 %v5193_v0, %v5192_v7  ;;  %v5218_v0 = vld [vmem:[%s10502_s4 + $0x2f0] sm:$0xff] }
 0x411   : > { %7916 = vmatpush3.bf16.msra.mxu1 %v7913_v30  ;;  %v5254_v30 = vld [vmem:[%s10502_s4 + $0x410] sm:$0xff] }
 0x412   : > { %7918 = vmatprep.subr.bf16.mxu1 %v7917_v35  ;;  %v10112_v14 = vpack.c.bf16 %v5255_v13, %v5254_v30  ;;  %v5194_v30 = vld [vmem:[%s10502_s4 + $0x230] sm:$0xff]  ;;  %v10242_v13 = vld [vmem:[#allocation4 + $0x60] sm:$0xff] }
 0x414   : > { %8126 = vmatprep.subr.bf16.mxu0 %v10112_v14 }
 0x415   : > { %7920 = vmatpush3.bf16.msra.mxu1 %v7917_v35  ;;  %v5179_v35 = vld [vmem:[%s10502_s4 + $0x1b8] sm:$0xff]  ;;  %8128 = vmatpush3.bf16.msra.mxu0 %v10112_v14 }
 0x416   : > { %7922 = vmatprep.subr.bf16.mxu1 %v7921_v46  ;;  %v7973_v15 = vpack.c.bf16 %v5179_v35, %v5178_v22  ;;  %v5196_v22 = vld [vmem:[%s10502_s4 + $0x240] sm:$0xff]  ;;  %v5197_v35 = vld [vmem:[%s10502_s4 + $0x248] sm:$0xff] }
 0x419   : > { %7924 = vmatpush3.bf16.msra.mxu1 %v7921_v46  ;;  %v5256_v46 = vld [vmem:[%s10502_s4 + $0x420] sm:$0xff] }
 0x41a   : > { %7926 = vmatprep.subr.bf16.mxu1 %v7925_v39 }
 0x41d   : > { %7928 = vmatpush3.bf16.msra.mxu1 %v7925_v39  ;;  %v5257_v39 = vld [vmem:[%s10502_s4 + $0x428] sm:$0xff] }
 0x41e   : > { %7930 = vmatprep.subr.bf16.mxu1 %v7929_v43 }
 0x420   : > { %6970 = vmatmul.mubr.f32.vlgmr.msra.gmra.mrb[12].mxu1 %v3471_v63  ;;  %v7977_v63 = vpack.c.bf16 %v5181_v53, %v5180_v54  ;;  %v5199_v54 = vld [vmem:[%s10502_s4 + $0x258] sm:$0xff] }
 0x421   : > { %7932 = vmatpush3.bf16.msra.mxu1 %v7929_v43  ;;  %6972 = vmatprep.mubr.f32.mxu1 %v10013_v24  ;;  %v10134_v43 = vpack.c.bf16 %v5257_v39, %v5256_v46  ;;  %v10253_v46 = vld [vmem:[#allocation4 + $0x68] sm:$0xff]  ;;  %v5198_v39 = vld [vmem:[%s10502_s4 + $0x250] sm:$0xff] }
 0x422   : > { %7934 = vmatprep.subr.bf16.mxu1 %v7933_v3  ;;  %v8013_v53 = vpack.c.bf16 %v5199_v54, %v5198_v39  ;;  %v5224_v39 = vld [vmem:[%s10502_s4 + $0x320] sm:$0xff]  ;;  %v5225_v54 = vld [vmem:[%s10502_s4 + $0x328] sm:$0xff] }
 0x423   : > { %8130 = vmatprep.subr.bf16.mxu0 %v10134_v43 }
 0x424   : > { %6973 = vmatmul.mubr.f32.gmra.mrb[14].mxu1 %v10022_v21  ;;  %8132 = vmatpush3.bf16.msra.mxu0 %v10134_v43 }
 0x425   : > { %7936 = vmatpush3.bf16.msra.mxu1 %v7933_v3  ;;  %6975 = vmatprep.mubr.f32.mxu1 %v10024_v51  ;;  %v5259_v3 = vld [vmem:[%s10502_s4 + $0x438] sm:$0xff] }
 0x426   : > { %7938 = vmatprep.subr.bf16.mxu1 %v7937_v50 }
 0x428   : > { %6976 = vmatmul.mubr.f32.gmra.mrb[16].mxu1 %v10034_v25 }
 0x429   : > { %7940 = vmatpush3.bf16.msra.mxu1 %v7937_v50  ;;  %6978 = vmatprep.mubr.f32.mxu1 %v10036_v17  ;;  %v10154_v50 = vpack.c.bf16 %v5259_v3, %v5258_v60  ;;  %v5200_v60 = vld [vmem:[%s10502_s4 + $0x260] sm:$0xff] }
 0x42a   : > { %7942 = vmatprep.subr.bf16.mxu1 %v7941_v42 }
 0x42b   : > { %8134 = vmatprep.subr.bf16.mxu0 %v10154_v50 }
 0x42c   : > { %6979 = vmatmul.mubr.f32.gmra.mrb[18].mxu1 %v10046_v2  ;;  %8136 = vmatpush3.bf16.msra.mxu0 %v10154_v50 }
 0x42d   : > { %7944 = vmatpush3.bf16.msra.mxu1 %v7941_v42  ;;  %7013 = vmatprep.mubr.f32.mxu1 %v3729_v48  ;;  %v5261_v42 = vld [vmem:[%s10502_s4 + $0x448] sm:$0xff] }
 0x42e   : > { %7946 = vmatprep.subr.bf16.mxu1 %v7945_v40  ;;  %v10172_v27 = vpack.c.bf16 %v5261_v42, %v5260_v10  ;;  %v5204_v10 = vld [vmem:[%s10502_s4 + $0x280] sm:$0xff] }
 0x430   : > { %8138 = vmatprep.subr.bf16.mxu0 %v10172_v27 }
 0x431   : > { %7948 = vmatpush3.bf16.msra.mxu1 %v7945_v40  ;;  %v5262_v40 = vld [vmem:[%s10502_s4 + $0x450] sm:$0xff]  ;;  %8140 = vmatpush3.bf16.msra.mxu0 %v10172_v27 }
 0x432   : > { %7950 = vmatprep.subr.bf16.mxu1 %v7949_v36  ;;  %v10188_v23 = vpack.c.bf16 %v5263_v56, %v5262_v40  ;;  %v5209_v56 = vld [vmem:[%s10502_s4 + $0x2a8] sm:$0xff] }
 0x434   : > { %8142 = vmatprep.subr.bf16.mxu0 %v10188_v23 }
 0x435   : > { %7952 = vmatpush3.bf16.msra.mxu1 %v7949_v36  ;;  %v5187_v36 = vld [vmem:[%s10502_s4 + $0x1f8] sm:$0xff]  ;;  %8144 = vmatpush3.bf16.msra.mxu0 %v10188_v23 }
 0x436   : > { %7954 = vmatprep.subr.bf16.mxu1 %v7953_v57  ;;  %8146 = vmatprep.subr.bf16.mxu0 %v10204_v58 }
 0x439   : > { %7956 = vmatpush3.bf16.msra.mxu1 %v7953_v57  ;;  %v7989_v57 = vpack.c.bf16 %v5187_v36, %v5186_v28  ;;  %8148 = vmatpush3.bf16.msra.mxu0 %v10204_v58  ;;  %v5210_v36 = vld [vmem:[%s10502_s4 + $0x2b0] sm:$0xff] }
 0x43a   : > { %7958 = vmatprep.subr.bf16.mxu1 %v7957_v26 }
 0x43d   : > { %7960 = vmatpush3.bf16.msra.mxu1 %v7957_v26  ;;  %v5189_v26 = vld [vmem:[%s10502_s4 + $0x208] sm:$0xff] }
 0x43e   : > { %7962 = vmatprep.subr.bf16.mxu1 %v7961_v18  ;;  %v7993_v33 = vpack.c.bf16 %v5189_v26, %v5188_v37  ;;  %v5213_v37 = vld [vmem:[%s10502_s4 + $0x2c8] sm:$0xff] }
 0x43f   : > { %v10313_v26 = vld [vmem:[#allocation4 + $0x69] sm:$0xff] }
 0x440   : > { %7014 = vmatmul.mubr.f32.vlgmr.msra.gmra.mrb[12].mxu1 %v3730_v41  ;;  %v5191_v41 = vld [vmem:[%s10502_s4 + $0x218] sm:$0xff] }
 0x441   : > { %7964 = vmatpush3.bf16.msra.mxu1 %v7961_v18  ;;  %7016 = vmatprep.mubr.f32.mxu1 %v10082_v59  ;;  %v5266_v18 = vld [vmem:[%s10502_s4 + $0x470] sm:$0xff] }
 0x442   : > { %7966 = vmatprep.subr.bf16.mxu1 %v7965_v1  ;;  %v10220_v55 = vpack.c.bf16 %v5267_v38, %v5266_v18  ;;  %v5214_v18 = vld [vmem:[%s10502_s4 + $0x2d0] sm:$0xff]  ;;  %v5215_v38 = vld [vmem:[%s10502_s4 + $0x2d8] sm:$0xff] }
 0x444   : > { %7017 = vmatmul.mubr.f32.gmra.mrb[14].mxu1 %v10096_v29  ;;  %8150 = vmatprep.subr.bf16.mxu0 %v10220_v55 }
 0x445   : > { %7968 = vmatpush3.bf16.msra.mxu1 %v7965_v1  ;;  %7019 = vmatprep.mubr.f32.mxu1 %v9938_v12  ;;  %v7997_v1 = vpack.c.bf16 %v5191_v41, %v5190_v61  ;;  %v8045_v61 = vpack.c.bf16 %v5215_v38, %v5214_v18  ;;  %v5216_v41 = vld [vmem:[%s10502_s4 + $0x2e0] sm:$0xff]  ;;  %v5243_v18 = vld [vmem:[%s10502_s4 + $0x3b8] sm:$0xff] }
 0x446   : > { %7970 = vmatprep.subr.bf16.mxu1 %v7969_v47  ;;  %8152 = vmatpush3.bf16.msra.mxu0 %v10220_v55  ;;  %v4289_v38 = vld [vmem:[#allocation4 + $0x78] sm:$0xff] }
 0x448   : > { %7020 = vmatmul.mubr.f32.gmra.mrb[16].mxu1 %v10116_v34 }
 0x449   : > { %7972 = vmatpush3.bf16.msra.mxu1 %v7969_v47  ;;  %7022 = vmatprep.mubr.f32.mxu1 %v10121_v32  ;;  %v5195_v47 = vld [vmem:[%s10502_s4 + $0x238] sm:$0xff] }
 0x44a   : > { %7974 = vmatprep.subr.bf16.mxu1 %v7973_v15  ;;  %7278 = vmatmul.mubr.f32.vlgmr.msra.gmra.mrb[12].mxu0 %v10116_v34 }
 0x44b   : > { %7280 = vmatprep.mubr.f32.mxu0 %v10121_v32 }
 0x44c   : > { %7023 = vmatmul.mubr.f32.gmra.mrb[18].mxu1 %v10138_v44 }
 0x44d   : > { %7976 = vmatpush3.bf16.msra.mxu1 %v7973_v15  ;;  %7057 = vmatprep.mubr.f32.mxu1 %v10013_v24  ;;  %v5185_v24 = vld [vmem:[%s10502_s4 + $0x1e8] sm:$0xff]  ;;  %v8009_v15 = vpack.c.bf16 %v5197_v35, %v5196_v22  ;;  %v5222_v22 = vld [vmem:[%s10502_s4 + $0x310] sm:$0xff]  ;;  %v5223_v35 = vld [vmem:[%s10502_s4 + $0x318] sm:$0xff] }
 0x44e   : > { %7978 = vmatprep.subr.bf16.mxu1 %v7977_v63  ;;  %v7985_v48 = vpack.c.bf16 %v5185_v24, %v5184_v4  ;;  %7281 = vmatmul.mubr.f32.gmra.mrb[14].mxu0 %v10138_v44  ;;  %v5206_v4 = vld [vmem:[%s10502_s4 + $0x290] sm:$0xff]  ;;  %v5207_v24 = vld [vmem:[%s10502_s4 + $0x298] sm:$0xff] }
 0x44f   : > { %v8029_v40 = vpack.c.bf16 %v5207_v24, %v5206_v4  ;;  %v5234_v4 = vld [vmem:[%s10502_s4 + $0x370] sm:$0xff] }
 0x451   : > { %7980 = vmatpush3.bf16.msra.mxu1 %v7977_v63  ;;  %v5201_v63 = vld [vmem:[%s10502_s4 + $0x268] sm:$0xff] }
 0x452   : > { %7982 = vmatprep.subr.bf16.mxu1 %v7981_v31  ;;  %v8017_v3 = vpack.c.bf16 %v5201_v63, %v5200_v60  ;;  %v5226_v60 = vld [vmem:[%s10502_s4 + $0x330] sm:$0xff]  ;;  %v5227_v63 = vld [vmem:[%s10502_s4 + $0x338] sm:$0xff] }
 0x455   : > { %7984 = vmatpush3.bf16.msra.mxu1 %v7981_v31  ;;  %v5205_v31 = vld [vmem:[%s10502_s4 + $0x288] sm:$0xff] }
 0x456   : > { %7986 = vmatprep.subr.bf16.mxu1 %v7985_v48  ;;  %v8025_v42 = vpack.c.bf16 %v5205_v31, %v5204_v10  ;;  %v5232_v10 = vld [vmem:[%s10502_s4 + $0x360] sm:$0xff]  ;;  %v5233_v31 = vld [vmem:[%s10502_s4 + $0x368] sm:$0xff] }
 0x459   : > { %7988 = vmatpush3.bf16.msra.mxu1 %v7985_v48  ;;  %v5208_v48 = vld [vmem:[%s10502_s4 + $0x2a0] sm:$0xff] }
 0x45a   : > { %7990 = vmatprep.subr.bf16.mxu1 %v7989_v57  ;;  %v8033_v28 = vpack.c.bf16 %v5209_v56, %v5208_v48  ;;  %v5237_v48 = vld [vmem:[%s10502_s4 + $0x388] sm:$0xff] }
 0x45d   : > { %7992 = vmatpush3.bf16.msra.mxu1 %v7989_v57  ;;  %v10303_v57 = vld [vmem:[#allocation4 + $0x61] sm:$0xff] }
 0x45e   : > { %7994 = vmatprep.subr.bf16.mxu1 %v7993_v33 }
 0x460   : > { %7058 = vmatmul.mubr.f32.vlgmr.msra.gmra.mrb[12].mxu1 %v10022_v21  ;;  %v8005_v21 = vpack.c.bf16 %v5195_v47, %v5194_v30  ;;  %v5220_v30 = vld [vmem:[%s10502_s4 + $0x300] sm:$0xff]  ;;  %v5221_v47 = vld [vmem:[%s10502_s4 + $0x308] sm:$0xff] }
 0x461   : > { %7996 = vmatpush3.bf16.msra.mxu1 %v7993_v33  ;;  %7060 = vmatprep.mubr.f32.mxu1 %v10024_v51  ;;  %v8041_v33 = vpack.c.bf16 %v5213_v37, %v5212_v6  ;;  %v5241_v6 = vld [vmem:[%s10502_s4 + $0x3a8] sm:$0xff] }
 0x462   : > { %7998 = vmatprep.subr.bf16.mxu1 %v7997_v1 }
 0x464   : > { %7061 = vmatmul.mubr.f32.gmra.mrb[14].mxu1 %v10034_v25 }
 0x465   : > { %8000 = vmatpush3.bf16.msra.mxu1 %v7997_v1  ;;  %7063 = vmatprep.mubr.f32.mxu1 %v10036_v17  ;;  %v5217_v1 = vld [vmem:[%s10502_s4 + $0x2e8] sm:$0xff] }
 0x466   : > { %8002 = vmatprep.subr.bf16.mxu1 %v8001_v5  ;;  %v8049_v7 = vpack.c.bf16 %v5217_v1, %v5216_v41  ;;  %v4290_v41 = vld [vmem:[#allocation4 + $0x80] sm:$0xff]  ;;  %v5247_v1 = vld [vmem:[%s10502_s4 + $0x3d8] sm:$0xff] }
 0x468   : > { %7064 = vmatmul.mubr.f32.gmra.mrb[16].mxu1 %v10046_v2 }
 0x469   : > { %8004 = vmatpush3.bf16.msra.mxu1 %v8001_v5  ;;  %7066 = vmatprep.mubr.f32.mxu1 %v10242_v13 }
 0x46a   : > { %8006 = vmatprep.subr.bf16.mxu1 %v8005_v21 }
 0x46c   : > { %7067 = vmatmul.mubr.f32.gmra.mrb[18].mxu1 %v10253_v46 }
 0x46d   : > { %8008 = vmatpush3.bf16.msra.mxu1 %v8005_v21  ;;  %7101 = vmatprep.mubr.f32.mxu1 %v9947_v49  ;;  %v5203_v49 = vld [vmem:[%s10502_s4 + $0x278] sm:$0xff]  ;;  %v8057_v21 = vpack.c.bf16 %v5221_v47, %v5220_v30 }
 0x46e   : > { %8010 = vmatprep.subr.bf16.mxu1 %v8009_v15  ;;  %v8021_v45 = vpack.c.bf16 %v5203_v49, %v5202_v52  ;;  %v5229_v52 = vld [vmem:[%s10502_s4 + $0x348] sm:$0xff]  ;;  %v5230_v49 = vld [vmem:[%s10502_s4 + $0x350] sm:$0xff]  ;;  %v4427_v47 = vld [vmem:[#allocation4 + $0x79] sm:$0xff] }
 0x471   : > { %8012 = vmatpush3.bf16.msra.mxu1 %v8009_v15  ;;  %v8061_v15 = vpack.c.bf16 %v5223_v35, %v5222_v22 }
 0x472   : > { %8014 = vmatprep.subr.bf16.mxu1 %v8013_v53 }
 0x475   : > { %8016 = vmatpush3.bf16.msra.mxu1 %v8013_v53  ;;  %v8065_v53 = vpack.c.bf16 %v5225_v54, %v5224_v39 }
 0x476   : > { %8018 = vmatprep.subr.bf16.mxu1 %v8017_v3 }
 0x479   : > { %8020 = vmatpush3.bf16.msra.mxu1 %v8017_v3  ;;  %v10363_v3 = vld [vmem:[#allocation4 + $0x62] sm:$0xff] }
 0x47a   : > { %8022 = vmatprep.subr.bf16.mxu1 %v8021_v45 }
 0x47d   : > { %8024 = vmatpush3.bf16.msra.mxu1 %v8021_v45  ;;  %v5231_v45 = vld [vmem:[%s10502_s4 + $0x358] sm:$0xff] }
 0x47e   : > { %8026 = vmatprep.subr.bf16.mxu1 %v8025_v42 }
 0x480   : > { %7102 = vmatmul.mubr.f32.vlgmr.msra.gmra.mrb[12].mxu1 %v9956_v20  ;;  %v8037_v20 = vpack.c.bf16 %v5211_v62, %v5210_v36  ;;  %v5239_v36 = vld [vmem:[%s10502_s4 + $0x398] sm:$0xff] }
 0x481   : > { %8028 = vmatpush3.bf16.msra.mxu1 %v8025_v42  ;;  %7104 = vmatprep.mubr.f32.mxu1 %v9958_v8  ;;  %v8081_v42 = vpack.c.bf16 %v5233_v31, %v5232_v10 }
 0x482   : > { %8030 = vmatprep.subr.bf16.mxu1 %v8029_v40 }
 0x484   : > { %7105 = vmatmul.mubr.f32.gmra.mrb[14].mxu1 %v9968_v16 }
 0x485   : > { %8032 = vmatpush3.bf16.msra.mxu1 %v8029_v40  ;;  %7107 = vmatprep.mubr.f32.mxu1 %v9970_v9  ;;  %v5236_v40 = vld [vmem:[%s10502_s4 + $0x380] sm:$0xff] }
 0x486   : > { %8034 = vmatprep.subr.bf16.mxu1 %v8033_v28  ;;  %v8089_v56 = vpack.c.bf16 %v5237_v48, %v5236_v40 }
 0x488   : > { %7108 = vmatmul.mubr.f32.gmra.mrb[16].mxu1 %v9980_v19 }
 0x489   : > { %8036 = vmatpush3.bf16.msra.mxu1 %v8033_v28  ;;  %7110 = vmatprep.mubr.f32.mxu1 %v10303_v57  ;;  %v5238_v28 = vld [vmem:[%s10502_s4 + $0x390] sm:$0xff] }
 0x48a   : > { %8038 = vmatprep.subr.bf16.mxu1 %v8037_v20  ;;  %v8093_v62 = vpack.c.bf16 %v5239_v36, %v5238_v28 }
 0x48c   : > { %7111 = vmatmul.mubr.f32.gmra.mrb[18].mxu1 %v10313_v26 }
 0x48d   : > { %8040 = vmatpush3.bf16.msra.mxu1 %v8037_v20  ;;  %7145 = vmatprep.mubr.f32.mxu1 %v10082_v59  ;;  %v5219_v59 = vld [vmem:[%s10502_s4 + $0x2f8] sm:$0xff]  ;;  %v5240_v20 = vld [vmem:[%s10502_s4 + $0x3a0] sm:$0xff] }
 0x48e   : > { %8042 = vmatprep.subr.bf16.mxu1 %v8041_v33  ;;  %v8053_v5 = vpack.c.bf16 %v5219_v59, %v5218_v0  ;;  %v8097_v37 = vpack.c.bf16 %v5241_v6, %v5240_v20  ;;  %v5249_v0 = vld [vmem:[%s10502_s4 + $0x3e8] sm:$0xff] }
 0x491   : > { %8044 = vmatpush3.bf16.msra.mxu1 %v8041_v33  ;;  %v5242_v33 = vld [vmem:[%s10502_s4 + $0x3b0] sm:$0xff] }
 0x492   : > { %8046 = vmatprep.subr.bf16.mxu1 %v8045_v61 }
 0x495   : > { %8048 = vmatpush3.bf16.msra.mxu1 %v8045_v61  ;;  %v5245_v61 = vld [vmem:[%s10502_s4 + $0x3c8] sm:$0xff] }
 0x496   : > { %8050 = vmatprep.subr.bf16.mxu1 %v8049_v7 }
 0x499   : > { %8052 = vmatpush3.bf16.msra.mxu1 %v8049_v7 }
 0x49a   : > { %8054 = vmatprep.subr.bf16.mxu1 %v8053_v5 }
 0x49d   : > { %8056 = vmatpush3.bf16.msra.mxu1 %v8053_v5  ;;  %v5250_v5 = vld [vmem:[%s10502_s4 + $0x3f0] sm:$0xff] }
 0x49e   : > { %8058 = vmatprep.subr.bf16.mxu1 %v8057_v21 }
 0x4a0   : > { %7146 = vmatmul.mubr.f32.vlgmr.msra.gmra.mrb[12].mxu1 %v10096_v29  ;;  %v8069_v29 = vpack.c.bf16 %v5227_v63, %v5226_v60 }
 0x4a1   : > { %8060 = vmatpush3.bf16.msra.mxu1 %v8057_v21  ;;  %7148 = vmatprep.mubr.f32.mxu1 %v9938_v12  ;;  %v5228_v12 = vld [vmem:[%s10502_s4 + $0x340] sm:$0xff] }
 0x4a2   : > { %8062 = vmatprep.subr.bf16.mxu1 %v8061_v15 }
 0x4a4   : > { %7149 = vmatmul.mubr.f32.gmra.mrb[14].mxu1 %v10116_v34  ;;  %v10373_v34 = vld [vmem:[#allocation4 + $0x6a] sm:$0xff] }
 0x4a5   : > { %8064 = vmatpush3.bf16.msra.mxu1 %v8061_v15  ;;  %7151 = vmatprep.mubr.f32.mxu1 %v10121_v32  ;;  %v8073_v32 = vpack.c.bf16 %v5229_v52, %v5228_v12 }
 0x4a6   : > { %8066 = vmatprep.subr.bf16.mxu1 %v8065_v53 }
 0x4a8   : > { %7152 = vmatmul.mubr.f32.gmra.mrb[16].mxu1 %v10138_v44  ;;  %v8077_v44 = vpack.c.bf16 %v5231_v45, %v5230_v49 }
 0x4a9   : > { %8068 = vmatpush3.bf16.msra.mxu1 %v8065_v53  ;;  %7154 = vmatprep.mubr.f32.mxu1 %v10363_v3 }
 0x4aa   : > { %8070 = vmatprep.subr.bf16.mxu1 %v8069_v29 }
 0x4ac   : > { %7155 = vmatmul.mubr.f32.gmra.mrb[18].mxu1 %v10373_v34 }
 0x4ad   : > { %8072 = vmatpush3.bf16.msra.mxu1 %v8069_v29  ;;  %7189 = vmatprep.mubr.f32.mxu1 %v10024_v51  ;;  %v5235_v51 = vld [vmem:[%s10502_s4 + $0x378] sm:$0xff] }
 0x4ae   : > { %8074 = vmatprep.subr.bf16.mxu1 %v8073_v32  ;;  %v8085_v24 = vpack.c.bf16 %v5235_v51, %v5234_v4 }
 0x4b1   : > { %8076 = vmatpush3.bf16.msra.mxu1 %v8073_v32 }
 0x4b2   : > { %8078 = vmatprep.subr.bf16.mxu1 %v8077_v44 }
 0x4b5   : > { %8080 = vmatpush3.bf16.msra.mxu1 %v8077_v44 }
 0x4b6   : > { %8082 = vmatprep.subr.bf16.mxu1 %v8081_v42 }
 0x4b9   : > { %8084 = vmatpush3.bf16.msra.mxu1 %v8081_v42 }
 0x4ba   : > { %8086 = vmatprep.subr.bf16.mxu1 %v8085_v24 }
 0x4bd   : > { %8088 = vmatpush3.bf16.msra.mxu1 %v8085_v24 }
 0x4be   : > { %8090 = vmatprep.subr.bf16.mxu1 %v8089_v56 }
 0x4c0   : > { %7190 = vmatmul.mubr.f32.vlgmr.msra.gmra.mrb[12].mxu1 %v10034_v25  ;;  %v8101_v25 = vpack.c.bf16 %v5243_v18, %v5242_v33 }
 0x4c1   : > { %8092 = vmatpush3.bf16.msra.mxu1 %v8089_v56  ;;  %7192 = vmatprep.mubr.f32.mxu1 %v10036_v17  ;;  %v5244_v17 = vld [vmem:[%s10502_s4 + $0x3c0] sm:$0xff] }
 0x4c2   : > { %8094 = vmatprep.subr.bf16.mxu1 %v8093_v62 }
 0x4c4   : > { %7193 = vmatmul.mubr.f32.gmra.mrb[14].mxu1 %v10046_v2  ;;  %v8105_v2 = vpack.c.bf16 %v5245_v61, %v5244_v17 }
 0x4c5   : > { %8096 = vmatpush3.bf16.msra.mxu1 %v8093_v62  ;;  %7195 = vmatprep.mubr.f32.mxu1 %v10242_v13  ;;  %v5246_v13 = vld [vmem:[%s10502_s4 + $0x3d0] sm:$0xff] }
 0x4c6   : > { %8098 = vmatprep.subr.bf16.mxu1 %v8097_v37  ;;  %v8109_v7 = vpack.c.bf16 %v5247_v1, %v5246_v13 }
 0x4c8   : > { %7196 = vmatmul.mubr.f32.gmra.mrb[16].mxu1 %v10253_v46  ;;  %v5248_v46 = vld [vmem:[%s10502_s4 + $0x3e0] sm:$0xff] }
 0x4c9   : > { %8100 = vmatpush3.bf16.msra.mxu1 %v8097_v37  ;;  %7198 = vmatprep.mubr.f32.mxu1 %v4289_v38  ;;  %v8113_v59 = vpack.c.bf16 %v5249_v0, %v5248_v46 }
 0x4ca   : > { %8102 = vmatprep.subr.bf16.mxu1 %v8101_v25 }
 0x4cc   : > { %7199 = vmatmul.mubr.f32.gmra.mrb[18].mxu1 %v4290_v41 }
 0x4cd   : > { %8104 = vmatpush3.bf16.msra.mxu1 %v8101_v25  ;;  %7233 = vmatprep.mubr.f32.mxu1 %v9958_v8  ;;  %v5251_v8 = vld [vmem:[%s10502_s4 + $0x3f8] sm:$0xff] }
 0x4ce   : > { %8106 = vmatprep.subr.bf16.mxu1 %v8105_v2  ;;  %v8117_v30 = vpack.c.bf16 %v5251_v8, %v5250_v5 }
 0x4d1   : > { %8108 = vmatpush3.bf16.msra.mxu1 %v8105_v2 }
 0x4d2   : > { %8110 = vmatprep.subr.bf16.mxu1 %v8109_v7 }
 0x4d5   : > { %8112 = vmatpush3.bf16.msra.mxu1 %v8109_v7 }
 0x4d6   : > { %8114 = vmatprep.subr.bf16.mxu1 %v8113_v59 }
 0x4d9   : > { %8116 = vmatpush3.bf16.msra.mxu1 %v8113_v59 }
 0x4da   : > { %8118 = vmatprep.subr.bf16.mxu1 %v8117_v30 }
 0x4dd   : > { %8120 = vmatpush3.bf16.msra.mxu1 %v8117_v30 }
 0x4de   : > { %8153 = vmatprep.subr.bf16.mxu1 %v10093_v11 }
 0x4e0   : > { %7234 = vmatmul.mubr.f32.vlgmr.msra.gmra.mrb[12].mxu1 %v9968_v16  ;;  %v4428_v16 = vld [vmem:[#allocation4 + $0x81] sm:$0xff] }
 0x4e1   : > { %8161 = vmatpush3.bf16.msra.mxu1 %v10093_v11  ;;  %7236 = vmatprep.mubr.f32.mxu1 %v9970_v9  ;;  %v4565_v9 = vld [vmem:[#allocation4 + $0x7a] sm:$0xff] }
 0x4e2   : > { %8154 = vmatprep.subr.bf16.mxu1 %v10112_v14 }
 0x4e4   : > { %7237 = vmatmul.mubr.f32.gmra.mrb[14].mxu1 %v9980_v19  ;;  %v4566_v19 = vld [vmem:[#allocation4 + $0x82] sm:$0xff] }
 0x4e5   : > { %8162 = vmatpush3.bf16.msra.mxu1 %v10112_v14  ;;  %7239 = vmatprep.mubr.f32.mxu1 %v10303_v57 }
 0x4e6   : > { %8155 = vmatprep.subr.bf16.mxu1 %v10134_v43 }
 0x4e8   : > { %7240 = vmatmul.mubr.f32.gmra.mrb[16].mxu1 %v10313_v26 }
 0x4e9   : > { %8163 = vmatpush3.bf16.msra.mxu1 %v10134_v43  ;;  %7242 = vmatprep.mubr.f32.mxu1 %v4427_v47 }
 0x4ea   : > { %8156 = vmatprep.subr.bf16.mxu1 %v10154_v50 }
 0x4ec   : > { %7243 = vmatmul.mubr.f32.gmra.mrb[18].mxu1 %v4428_v16 }
 0x4ed   : > { %8164 = vmatpush3.bf16.msra.mxu1 %v10154_v50  ;;  %7283 = vmatprep.mubr.f32.mxu1 %v10363_v3 }
 0x4ee   : > { %8157 = vmatprep.subr.bf16.mxu1 %v10172_v27 }
 0x4f1   : > { %8165 = vmatpush3.bf16.msra.mxu1 %v10172_v27 }
 0x4f2   : > { %8158 = vmatprep.subr.bf16.mxu1 %v10188_v23 }
 0x4f5   : > { %8166 = vmatpush3.bf16.msra.mxu1 %v10188_v23  ;;  %v5268_v23 = vld [vmem:[%s10503_s5] ss:$0 sm:$0xff] }
 0x4f6   : > { %8159 = vmatprep.subr.bf16.mxu1 %v10204_v58 }
 0x4f9   : > { %8167 = vmatpush3.bf16.msra.mxu1 %v10204_v58 }
 0x4fa   : > { %8160 = vmatprep.subr.bf16.mxu1 %v10220_v55 }
 0x4fd   : > { %8168 = vmatpush3.bf16.msra.mxu1 %v10220_v55 }
 0x500   : > { %7284 = vmatmul.mubr.f32.vlgmr.msra.gmra.mrb[16].mxu1 %v10373_v34 }
 0x501   : > { %7286 = vmatprep.mubr.f32.mxu1 %v4565_v9 }
 0x504   : > { %7287 = vmatmul.mubr.f32.gmra.mrb[18].mxu1 %v4566_v19 }
 0x51d   : > { %v7279_v11 = vpop.f32.mrb[12].mxu0 }
 0x51e   : > { %v4650_v14 = vpop.f32.mrb[13].mxu0 }
 0x521   : > { %v7282_v43 = vpop.f32.mrb[14].mxu0 }
 0x522   : > { %v4660_v50 = vpop.f32.mrb[15].mxu0 }
 0x5b3   : > { %v7235_v27 = vpop.f32.mrb[12].mxu1 }
 0x5b4   : > { %v8181_v58 = vadd.f32 %v7279_v11, %v7235_v27  ;;  %v4512_v57 = vpop.f32.mrb[13].mxu1 }
 0x5b5   : > { %v8182_v55 = vadd.f32 %v4650_v14, %v4512_v57 }
 0x5b6   : > { %v4705_v26 = vadd.f32 %v8181_v58, %v5268_v23 }
 0x5b7   : > { %v4704_v21 = vadd.f32 %v8182_v55, %v5268_v23  ;;  %v7238_v22 = vpop.f32.mrb[14].mxu1 }
 0x5b8   : > { %v4713_v35 = vmax.f32 %v4705_v26, 0.0  ;;  %v8183_v15 = vadd.f32 %v7282_v43, %v7238_v22  ;;  %v4522_v39 = vpop.f32.mrb[15].mxu1 }
 0x5b9   : > { %v4712_v54 = vmax.f32 %v4704_v21, 0.0  ;;  %v8184_v53 = vadd.f32 %v4660_v50, %v4522_v39 }
 0x5ba   : > { %4721 = vst [vmem:[%s8607_s18 + $0x8] sm:$0xff] %v4713_v35  ;;  %v4707_v60 = vadd.f32 %v8183_v15, %v5268_v23 }
 0x5bb   : > { %4720 = vst [vmem:[%s8607_s18] sm:$0xff] %v4712_v54  ;;  %v4706_v63 = vadd.f32 %v8184_v53, %v5268_v23 }
 0x5bc   : > { %v4715_v29 = vmax.f32 %v4707_v60, 0.0 }
 0x5bd   : > { %v4714_v3 = vmax.f32 %v4706_v63, 0.0 }
 0x5be   : > { %4723 = vst [vmem:[%s8607_s18 + $0x18] sm:$0xff] %v4715_v29 }
 0x5bf   : > { %4722 = vst [vmem:[%s8607_s18 + $0x10] sm:$0xff] %v4714_v3 }
 0x5d3   : > { %v7285_v12 = vpop.f32.mrb[16].mxu1 }
 0x5d4   : > { %v4709_v52 = vadd.f32 %v7285_v12, %v5268_v23  ;;  %v4670_v34 = vpop.f32.mrb[17].mxu1 }
 0x5d5   : > { %v4708_v32 = vadd.f32 %v5268_v23, %v4670_v34 }
 0x5d6   : > { %v4717_v49 = vmax.f32 %v4709_v52, 0.0 }
 0x5d7   : > { %v4716_v45 = vmax.f32 %v4708_v32, 0.0  ;;  %v7288_v44 = vpop.f32.mrb[18].mxu1 }
 0x5d8   : > { %4725 = vst [vmem:[%s8607_s18 + $0x28] sm:$0xff] %v4717_v49  ;;  %v4711_v10 = vadd.f32 %v7288_v44, %v5268_v23  ;;  %v4680_v31 = vpop.f32.mrb[19].mxu1 }
 0x5d9   : > { %4724 = vst [vmem:[%s8607_s18 + $0x20] sm:$0xff] %v4716_v45  ;;  %v4710_v42 = vadd.f32 %v5268_v23, %v4680_v31 }
 0x5da   : > { %v4719_v4 = vmax.f32 %v4711_v10, 0.0 }
 0x5db   : > { %v4718_v51 = vmax.f32 %v4710_v42, 0.0 }
 0x5dc   : > { %4727 = vst [vmem:[%s8607_s18 + $0x38] sm:$0xff] %v4719_v4 }
 0x5dd   : > { %4726 = vst [vmem:[%s8607_s18 + $0x30] sm:$0xff] %v4718_v51 }
 0x5de PF: > { %s16_s25 = sadd.s32 1, %s8522_s25   ;;  %s10505_s21 = smov %s8514_s23 }
 0x5df   : > { %p13_p9 = scmp.ge.s32.totalorder %s16_s25, 10   ;;  %s10506_s22 = smov %s8518_s24 }
 0x5e0   : > { %s10507_s23 = smov %s10510_s26  ;;  %s10508_s24 = smov %s10514_s27 }
 0x5e1   :  { %15 = sbr.rel (!%p13_p9) target bundleno = 3 (0x3), region = 200 }
 0x5e8   :  { %4760 = vsyncmov [#allocation5] }
 0x5eb   :  { %s4761_s18 = vpop.sfrf %4760 }
 0x5ec   :  { %p5271_p10 = scmp.ne.s32.totalorder %s4761_s18, 0 }
 0x5ee   :  { %4765 = shalt.err (%p5271_p10)  }
 0x5ef   :  { %4767 = vsyncmov [#allocation5 + $0x1] }
 0x5f2   :  { %s4768_s30 = vpop.sfrf %4767 }
 0x5f3   :  { %p5272_p11 = scmp.ne.s32.totalorder %s4768_s30, 0 }
 0x5f5   :  { %4772 = shalt.err (%p5272_p11)  }

</bundles_post_ra>
